<compile_context>
chip_gen: v7x
topology: tpu7x:2x2x1
jax: 0.10.0
libtpu: 0.0.40
codegen_flags: <defaults>
</compile_context>

<pallas_src>
import functools

import jax
import jax.numpy as jnp
from jax.experimental import pallas as pl
from jax.experimental.pallas import tpu as pltpu


def _layernorm(x, gamma, beta, eps=1e-5):
    mean = jnp.mean(x, axis=-1, keepdims=True)
    var = jnp.mean((x - mean) ** 2, axis=-1, keepdims=True)
    return (x - mean) * jax.lax.rsqrt(var + eps) * gamma + beta


def _gelu_exact(x):
    # F.gelu default = exact erf-based GELU (f32 elementwise)
    return 0.5 * x * (1.0 + jax.lax.erf(x * 0.7071067811865476))


def encoder_layer_kernel(
    x_ref,
    ln0_g_ref, ln0_b_ref,
    wq_ref, wk_ref, wv_ref,
    proj_w_ref, proj_b_ref,
    ln1_g_ref, ln1_b_ref,
    w1_ref, b1_ref,
    w2_ref, b2_ref,
    o_ref,
    *, num_heads,
):
    f32 = jnp.float32
    bf16 = jnp.bfloat16

    x = x_ref[0]                              # (N, C) f32 tile for one batch element
    N, C = x.shape
    hd = C // num_heads
    scale = f32(hd) ** -0.5

    # ---- hoisted parameter reads (one load each, outside all loops) ----
    ln0_g = ln0_g_ref[0]
    ln0_b = ln0_b_ref[0]
    ln1_g = ln1_g_ref[0]
    ln1_b = ln1_b_ref[0]
    proj_b = proj_b_ref[0]
    b1 = b1_ref[0]
    b2 = b2_ref[0]

    # ---- pre_norm (f32) ----
    xn = _layernorm(x, ln0_g, ln0_b)
    xn_b = xn.astype(bf16)

    # ---- self-attention: accumulate each head's contribution through its slice
    #      of the projection weight (no activation lane-slicing, no concat) ----
    acc = jnp.zeros((N, C), f32)
    for h in range(num_heads):                # static, unrolled
        qh = jnp.dot(xn_b, wq_ref[h], preferred_element_type=f32) * scale    # (N, hd)
        kh = jnp.dot(xn_b, wk_ref[h], preferred_element_type=f32)            # (N, hd)
        vh = jnp.dot(xn_b, wv_ref[h], preferred_element_type=f32)            # (N, hd)

        # logits = q @ k^T, contracting the head dim of both (no explicit transpose)
        logits = jax.lax.dot_general(
            qh.astype(bf16), kh.astype(bf16),
            (((1,), (1,)), ((), ())),
            preferred_element_type=f32)                                       # (N, N)

        logits = logits - jnp.max(logits, axis=-1, keepdims=True)
        p = jnp.exp(logits)
        p = p * pl.reciprocal(jnp.sum(p, axis=-1, keepdims=True), approx=True)

        ctx = jnp.dot(p.astype(bf16), vh.astype(bf16),
                      preferred_element_type=f32)                             # (N, hd)
        acc = acc + jnp.dot(ctx.astype(bf16), proj_w_ref[h],
                            preferred_element_type=f32)                       # (N, C)

    attn_out = acc + proj_b

    # ---- residual + norm1 (f32) ----
    src = _layernorm(x + attn_out, ln1_g, ln1_b)

    # ---- feed-forward (bf16 matmuls, f32 accumulate, f32 GELU) ----
    h1 = jnp.dot(src.astype(bf16), w1_ref[...], preferred_element_type=f32) + b1
    h1 = _gelu_exact(h1)
    h2 = jnp.dot(h1.astype(bf16), w2_ref[...], preferred_element_type=f32) + b2

    o_ref[0] = (src + h2).astype(o_ref.dtype)


def transformer_encoder_layer(x, kparams, num_heads):
    B, N, C = x.shape

    kernel = functools.partial(encoder_layer_kernel, num_heads=num_heads)

    def vmem_full():
        # Whole array resident in VMEM for the whole kernel: single-buffered,
        # never re-fetched across the batch grid (weights / biases / LN params).
        return pl.BlockSpec(memory_space=pltpu.MemorySpace.VMEM)

    return pl.pallas_call(
        kernel,
        out_shape=jax.ShapeDtypeStruct((B, N, C), x.dtype),
        grid=(B,),
        in_specs=[
            pl.BlockSpec((1, N, C), lambda b: (b, 0, 0)),    # x  (per-batch tile)
            vmem_full(), vmem_full(),                         # pre_norm gamma/beta
            vmem_full(), vmem_full(), vmem_full(),            # per-head Wq / Wk / Wv
            vmem_full(), vmem_full(),                         # per-head proj W / bias
            vmem_full(), vmem_full(),                         # norm1 gamma/beta
            vmem_full(), vmem_full(),                         # linear1 weight / bias
            vmem_full(), vmem_full(),                         # linear2 weight / bias
        ],
        out_specs=pl.BlockSpec((1, N, C), lambda b: (b, 0, 0)),
        compiler_params=pltpu.CompilerParams(
            dimension_semantics=("parallel",),
            vmem_limit_bytes=48 * 1024 * 1024,
        ),
    )(x,
      kparams["ln0_g"], kparams["ln0_b"],
      kparams["wq"], kparams["wk"], kparams["wv"],
      kparams["proj_w"], kparams["proj_b"],
      kparams["ln1_g"], kparams["ln1_b"],
      kparams["w1"], kparams["b1"],
      kparams["w2"], kparams["b2"])


def prepare_params(p, num_heads):
    """Convert f32 reference params to the kernel layout: per-head weight slabs,
    bf16 matmul weights, f32 biases / LN params."""
    C = p["qkv_w"].shape[0]
    hd = C // num_heads
    bf16 = jnp.bfloat16
    # qkv_w columns are laid out as [3, num_heads, hd] (matches the torch reshape)
    qkv4 = p["qkv_w"].reshape(C, 3, num_heads, hd)
    per_head = lambda i: jnp.transpose(qkv4[:, i], (1, 0, 2)).astype(bf16)  # (nh, C, hd)
    return {
        "ln0_g": p["ln0_g"], "ln0_b": p["ln0_b"],
        "wq": per_head(0), "wk": per_head(1), "wv": per_head(2),
        "proj_w": p["proj_w"].reshape(num_heads, hd, C).astype(bf16),       # (nh, hd, C)
        "proj_b": p["proj_b"],
        "ln1_g": p["ln1_g"], "ln1_b": p["ln1_b"],
        "w1": p["w1"].astype(bf16), "b1": p["b1"],
        "w2": p["w2"].astype(bf16), "b2": p["b2"],
    }


def reference(x, p, num_heads):
    """Pure-JAX f32 reference mirroring the PyTorch forward (eval mode)."""
    def ln(y, g, b):
        m = y.mean(-1, keepdims=True)
        v = ((y - m) ** 2).mean(-1, keepdims=True)
        return (y - m) / jnp.sqrt(v + 1e-5) * g + b

    B, N, C = x.shape
    hd = C // num_heads
    xn = ln(x, p["ln0_g"][0], p["ln0_b"][0])
    qkv = xn @ p["qkv_w"]
    q, k, v = jnp.split(qkv, 3, axis=-1)
    q = q.reshape(B, N, num_heads, hd).transpose(0, 2, 1, 3)
    k = k.reshape(B, N, num_heads, hd).transpose(0, 2, 1, 3)
    v = v.reshape(B, N, num_heads, hd).transpose(0, 2, 1, 3)
    attn = jax.nn.softmax((q @ k.transpose(0, 1, 3, 2)) * hd ** -0.5, axis=-1)
    out = (attn @ v).transpose(0, 2, 1, 3).reshape(B, N, C)
    out = out @ p["proj_w"] + p["proj_b"][0]
    src = x + out
    src = ln(src, p["ln1_g"][0], p["ln1_b"][0])
    h1 = jax.nn.gelu(src @ p["w1"] + p["b1"][0], approximate=False)
    h2 = h1 @ p["w2"] + p["b2"][0]
    return src + h2


def init_params(key, d_model, dim_feedforward):
    ks = jax.random.split(key, 6)
    s = 0.05
    return {
        "ln0_g": jnp.ones((1, d_model), jnp.float32),
        "ln0_b": jnp.zeros((1, d_model), jnp.float32),
        "qkv_w": s * jax.random.normal(ks[0], (d_model, 3 * d_model), jnp.float32),
        "proj_w": s * jax.random.normal(ks[1], (d_model, d_model), jnp.float32),
        "proj_b": s * jax.random.normal(ks[2], (1, d_model), jnp.float32),
        "ln1_g": jnp.ones((1, d_model), jnp.float32),
        "ln1_b": jnp.zeros((1, d_model), jnp.float32),
        "w1": s * jax.random.normal(ks[3], (d_model, dim_feedforward), jnp.float32),
        "b1": s * jax.random.normal(ks[4], (1, dim_feedforward), jnp.float32),
        "w2": s * jax.random.normal(ks[5], (dim_feedforward, d_model), jnp.float32),
        "b2": jnp.zeros((1, d_model), jnp.float32),
    }


if __name__ == "__main__":
    # TODO(synk): Dropout / DropPath / attention-dropout are training-only stochastic
    # ops; eval-mode (identity) semantics are implemented here.
    # Lane-aligned small config: C and F are multiples of 128 per review feedback.
    B, N, d_model, nhead, dim_ff = 2, 128, 128, 4, 256

    key = jax.random.PRNGKey(0)
    kx, kp = jax.random.split(key)
    x = jax.random.normal(kx, (B, N, d_model), jnp.float32)
    params = init_params(kp, d_model, dim_ff)
    kparams = prepare_params(params, nhead)

    out = transformer_encoder_layer(x, kparams, nhead)
    out = jax.block_until_ready(out)

    ref = reference(x, params, nhead)
    assert out.shape == (B, N, d_model)
    err = float(jnp.max(jnp.abs(out - ref)))
    # bf16 matmul operands + approx reciprocal => relaxed tolerance vs f32 reference.
    assert err < 3e-2, f"mismatch vs reference: max abs err = {err}"

    print("KERNEL_OK")
</pallas_src>

<mosaic_0001>
module attributes {stable_mosaic.version = 11 : i64} {
  func.func @encoder_layer_kernel(%arg0: i32, %arg1: memref<1x128x128xf32, #tpu.memory_space<vmem>>, %arg2: memref<1x128xf32, #tpu.memory_space<vmem>>, %arg3: memref<1x128xf32, #tpu.memory_space<vmem>>, %arg4: memref<4x128x32xbf16, #tpu.memory_space<vmem>>, %arg5: memref<4x128x32xbf16, #tpu.memory_space<vmem>>, %arg6: memref<4x128x32xbf16, #tpu.memory_space<vmem>>, %arg7: memref<4x32x128xbf16, #tpu.memory_space<vmem>>, %arg8: memref<1x128xf32, #tpu.memory_space<vmem>>, %arg9: memref<1x128xf32, #tpu.memory_space<vmem>>, %arg10: memref<1x128xf32, #tpu.memory_space<vmem>>, %arg11: memref<128x256xbf16, #tpu.memory_space<vmem>>, %arg12: memref<1x256xf32, #tpu.memory_space<vmem>>, %arg13: memref<256x128xbf16, #tpu.memory_space<vmem>>, %arg14: memref<1x128xf32, #tpu.memory_space<vmem>>, %arg15: memref<1x128x128xf32, #tpu.memory_space<vmem>>) attributes {dimension_semantics = [#tpu.dimension_semantics<parallel>], iteration_bounds = array<i64: 2>, scalar_prefetch = 0 : i64, scratch_operands = 0 : i64, tpu.core_type = #tpu.core_type<tc>, window_params = [{transform_indices = @transform_0, window_bounds = array<i64: 1, 128, 128>}, {pipeline_mode = #tpu.pipeline_mode<synchronous>, transform_indices = @transform_1, window_bounds = array<i64: 1, 128>}, {pipeline_mode = #tpu.pipeline_mode<synchronous>, transform_indices = @transform_2, window_bounds = array<i64: 1, 128>}, {pipeline_mode = #tpu.pipeline_mode<synchronous>, transform_indices = @transform_3, window_bounds = array<i64: 4, 128, 32>}, {pipeline_mode = #tpu.pipeline_mode<synchronous>, transform_indices = @transform_4, window_bounds = array<i64: 4, 128, 32>}, {pipeline_mode = #tpu.pipeline_mode<synchronous>, transform_indices = @transform_5, window_bounds = array<i64: 4, 128, 32>}, {pipeline_mode = #tpu.pipeline_mode<synchronous>, transform_indices = @transform_6, window_bounds = array<i64: 4, 32, 128>}, {pipeline_mode = #tpu.pipeline_mode<synchronous>, transform_indices = @transform_7, window_bounds = array<i64: 1, 128>}, {pipeline_mode = #tpu.pipeline_mode<synchronous>, transform_indices = @transform_8, window_bounds = array<i64: 1, 128>}, {pipeline_mode = #tpu.pipeline_mode<synchronous>, transform_indices = @transform_9, window_bounds = array<i64: 1, 128>}, {pipeline_mode = #tpu.pipeline_mode<synchronous>, transform_indices = @transform_10, window_bounds = array<i64: 128, 256>}, {pipeline_mode = #tpu.pipeline_mode<synchronous>, transform_indices = @transform_11, window_bounds = array<i64: 1, 256>}, {pipeline_mode = #tpu.pipeline_mode<synchronous>, transform_indices = @transform_12, window_bounds = array<i64: 256, 128>}, {pipeline_mode = #tpu.pipeline_mode<synchronous>, transform_indices = @transform_13, window_bounds = array<i64: 1, 128>}, {transform_indices = @transform_14, window_bounds = array<i64: 1, 128, 128>}]} {
    %c0 = arith.constant 0 : index
    %c0_0 = arith.constant 0 : index
    %c0_1 = arith.constant 0 : index
    %0 = vector.load %arg1[%c0, %c0_0, %c0_1] : memref<1x128x128xf32, #tpu.memory_space<vmem>>, vector<1x128x128xf32>
    %1 = vector.shape_cast %0 : vector<1x128x128xf32> to vector<128x128xf32>
    %cst = arith.constant 3.200000e+01 : f32
    %cst_2 = arith.constant -5.000000e-01 : f32
    %2 = math.powf %cst, %cst_2 : f32
    %c0_3 = arith.constant 0 : index
    %c0_4 = arith.constant 0 : index
    %3 = vector.load %arg2[%c0_3, %c0_4] : memref<1x128xf32, #tpu.memory_space<vmem>>, vector<1x128xf32>
    %4 = vector.shape_cast %3 : vector<1x128xf32> to vector<128xf32>
    %c0_5 = arith.constant 0 : index
    %c0_6 = arith.constant 0 : index
    %5 = vector.load %arg3[%c0_5, %c0_6] : memref<1x128xf32, #tpu.memory_space<vmem>>, vector<1x128xf32>
    %6 = vector.shape_cast %5 : vector<1x128xf32> to vector<128xf32>
    %c0_7 = arith.constant 0 : index
    %c0_8 = arith.constant 0 : index
    %7 = vector.load %arg9[%c0_7, %c0_8] : memref<1x128xf32, #tpu.memory_space<vmem>>, vector<1x128xf32>
    %8 = vector.shape_cast %7 : vector<1x128xf32> to vector<128xf32>
    %c0_9 = arith.constant 0 : index
    %c0_10 = arith.constant 0 : index
    %9 = vector.load %arg10[%c0_9, %c0_10] : memref<1x128xf32, #tpu.memory_space<vmem>>, vector<1x128xf32>
    %10 = vector.shape_cast %9 : vector<1x128xf32> to vector<128xf32>
    %c0_11 = arith.constant 0 : index
    %c0_12 = arith.constant 0 : index
    %11 = vector.load %arg8[%c0_11, %c0_12] : memref<1x128xf32, #tpu.memory_space<vmem>>, vector<1x128xf32>
    %12 = vector.shape_cast %11 : vector<1x128xf32> to vector<128xf32>
    %c0_13 = arith.constant 0 : index
    %c0_14 = arith.constant 0 : index
    %13 = vector.load %arg12[%c0_13, %c0_14] : memref<1x256xf32, #tpu.memory_space<vmem>>, vector<1x256xf32>
    %14 = vector.shape_cast %13 : vector<1x256xf32> to vector<256xf32>
    %c0_15 = arith.constant 0 : index
    %c0_16 = arith.constant 0 : index
    %15 = vector.load %arg14[%c0_15, %c0_16] : memref<1x128xf32, #tpu.memory_space<vmem>>, vector<1x128xf32>
    %16 = vector.shape_cast %15 : vector<1x128xf32> to vector<128xf32>
    %cst_17 = arith.constant dense<0.000000e+00> : vector<128xf32>
    %17 = vector.multi_reduction <add>, %1, %cst_17 [1] : vector<128x128xf32> to vector<128xf32>
    %18 = vector.shape_cast %17 : vector<128xf32> to vector<128x1xf32>
    %cst_18 = arith.constant 1.280000e+02 : f32
    %19 = vector.broadcast %cst_18 : f32 to vector<128x1xf32>
    %20 = arith.divf %18, %19 : vector<128x1xf32>
    %21 = vector.broadcast %20 : vector<128x1xf32> to vector<128x128xf32>
    %22 = arith.subf %1, %21 : vector<128x128xf32>
    %23 = arith.mulf %22, %22 : vector<128x128xf32>
    %cst_19 = arith.constant dense<0.000000e+00> : vector<128xf32>
    %24 = vector.multi_reduction <add>, %23, %cst_19 [1] : vector<128x128xf32> to vector<128xf32>
    %25 = vector.shape_cast %24 : vector<128xf32> to vector<128x1xf32>
    %cst_20 = arith.constant 1.280000e+02 : f32
    %26 = vector.broadcast %cst_20 : f32 to vector<128x1xf32>
    %27 = arith.divf %25, %26 : vector<128x1xf32>
    %28 = vector.broadcast %20 : vector<128x1xf32> to vector<128x128xf32>
    %29 = arith.subf %1, %28 : vector<128x128xf32>
    %cst_21 = arith.constant 9.99999974E-6 : f32
    %30 = vector.broadcast %cst_21 : f32 to vector<128x1xf32>
    %31 = arith.addf %27, %30 : vector<128x1xf32>
    %32 = math.rsqrt %31 : vector<128x1xf32>
    %33 = vector.broadcast %32 : vector<128x1xf32> to vector<128x128xf32>
    %34 = arith.mulf %29, %33 : vector<128x128xf32>
    %35 = vector.shape_cast %4 : vector<128xf32> to vector<1x128xf32>
    %36 = vector.broadcast %35 : vector<1x128xf32> to vector<128x128xf32>
    %37 = arith.mulf %34, %36 : vector<128x128xf32>
    %38 = vector.shape_cast %6 : vector<128xf32> to vector<1x128xf32>
    %39 = vector.broadcast %38 : vector<1x128xf32> to vector<128x128xf32>
    %40 = arith.addf %37, %39 : vector<128x128xf32>
    %41 = arith.truncf %40 : vector<128x128xf32> to vector<128x128xbf16>
    %cst_22 = arith.constant 0.000000e+00 : f32
    %42 = vector.broadcast %cst_22 : f32 to vector<128x128xf32>
    %c0_23 = arith.constant 0 : index
    %c0_24 = arith.constant 0 : index
    %c0_25 = arith.constant 0 : index
    %43 = vector.load %arg4[%c0_23, %c0_24, %c0_25] : memref<4x128x32xbf16, #tpu.memory_space<vmem>>, vector<1x128x32xbf16>
    %44 = vector.shape_cast %43 : vector<1x128x32xbf16> to vector<128x32xbf16>
    %cst_26 = arith.constant dense<0.000000e+00> : vector<128x32xf32>
    %45 = tpu.matmul %41, %44, %cst_26 {dimension_numbers = #tpu.dot_dimension_numbers<[1], [0], [0], [1], [0, 0, 1, 1], [], []>} : vector<128x128xbf16>, vector<128x32xbf16>, vector<128x32xf32> -> vector<128x32xf32>
    %46 = vector.broadcast %2 : f32 to vector<128x32xf32>
    %47 = arith.mulf %45, %46 : vector<128x32xf32>
    %c0_27 = arith.constant 0 : index
    %c0_28 = arith.constant 0 : index
    %c0_29 = arith.constant 0 : index
    %48 = vector.load %arg5[%c0_27, %c0_28, %c0_29] : memref<4x128x32xbf16, #tpu.memory_space<vmem>>, vector<1x128x32xbf16>
    %49 = vector.shape_cast %48 : vector<1x128x32xbf16> to vector<128x32xbf16>
    %cst_30 = arith.constant dense<0.000000e+00> : vector<128x32xf32>
    %50 = tpu.matmul %41, %49, %cst_30 {dimension_numbers = #tpu.dot_dimension_numbers<[1], [0], [0], [1], [0, 0, 1, 1], [], []>} : vector<128x128xbf16>, vector<128x32xbf16>, vector<128x32xf32> -> vector<128x32xf32>
    %c0_31 = arith.constant 0 : index
    %c0_32 = arith.constant 0 : index
    %c0_33 = arith.constant 0 : index
    %51 = vector.load %arg6[%c0_31, %c0_32, %c0_33] : memref<4x128x32xbf16, #tpu.memory_space<vmem>>, vector<1x128x32xbf16>
    %52 = vector.shape_cast %51 : vector<1x128x32xbf16> to vector<128x32xbf16>
    %cst_34 = arith.constant dense<0.000000e+00> : vector<128x32xf32>
    %53 = tpu.matmul %41, %52, %cst_34 {dimension_numbers = #tpu.dot_dimension_numbers<[1], [0], [0], [1], [0, 0, 1, 1], [], []>} : vector<128x128xbf16>, vector<128x32xbf16>, vector<128x32xf32> -> vector<128x32xf32>
    %54 = arith.truncf %47 : vector<128x32xf32> to vector<128x32xbf16>
    %55 = arith.truncf %50 : vector<128x32xf32> to vector<128x32xbf16>
    %cst_35 = arith.constant dense<0.000000e+00> : vector<128x128xf32>
    %56 = tpu.matmul %54, %55, %cst_35 {dimension_numbers = #tpu.dot_dimension_numbers<[1], [1], [0], [0], [0, 0, 1, 0], [], []>} : vector<128x32xbf16>, vector<128x32xbf16>, vector<128x128xf32> -> vector<128x128xf32>
    %cst_36 = arith.constant dense<0xFF800000> : vector<128xf32>
    %57 = vector.multi_reduction <maximumf>, %56, %cst_36 [1] : vector<128x128xf32> to vector<128xf32>
    %58 = vector.shape_cast %57 : vector<128xf32> to vector<128x1xf32>
    %59 = vector.broadcast %58 : vector<128x1xf32> to vector<128x128xf32>
    %60 = arith.subf %56, %59 : vector<128x128xf32>
    %61 = math.exp %60 : vector<128x128xf32>
    %cst_37 = arith.constant dense<0.000000e+00> : vector<128xf32>
    %62 = vector.multi_reduction <add>, %61, %cst_37 [1] : vector<128x128xf32> to vector<128xf32>
    %63 = vector.shape_cast %62 : vector<128xf32> to vector<128x1xf32>
    %64 = tpu.reciprocal %63 {approx = true} : vector<128x1xf32> -> vector<128x1xf32>
    %65 = vector.broadcast %64 : vector<128x1xf32> to vector<128x128xf32>
    %66 = arith.mulf %61, %65 : vector<128x128xf32>
    %67 = arith.truncf %66 : vector<128x128xf32> to vector<128x128xbf16>
    %68 = arith.truncf %53 : vector<128x32xf32> to vector<128x32xbf16>
    %cst_38 = arith.constant dense<0.000000e+00> : vector<128x32xf32>
    %69 = tpu.matmul %67, %68, %cst_38 {dimension_numbers = #tpu.dot_dimension_numbers<[1], [0], [0], [1], [0, 0, 1, 1], [], []>} : vector<128x128xbf16>, vector<128x32xbf16>, vector<128x32xf32> -> vector<128x32xf32>
    %70 = arith.truncf %69 : vector<128x32xf32> to vector<128x32xbf16>
    %c0_39 = arith.constant 0 : index
    %c0_40 = arith.constant 0 : index
    %c0_41 = arith.constant 0 : index
    %71 = vector.load %arg7[%c0_39, %c0_40, %c0_41] : memref<4x32x128xbf16, #tpu.memory_space<vmem>>, vector<1x32x128xbf16>
    %72 = vector.shape_cast %71 : vector<1x32x128xbf16> to vector<32x128xbf16>
    %cst_42 = arith.constant dense<0.000000e+00> : vector<128x128xf32>
    %73 = tpu.matmul %70, %72, %cst_42 {dimension_numbers = #tpu.dot_dimension_numbers<[1], [0], [0], [1], [0, 0, 1, 1], [], []>} : vector<128x32xbf16>, vector<32x128xbf16>, vector<128x128xf32> -> vector<128x128xf32>
    %74 = arith.addf %42, %73 : vector<128x128xf32>
    %c1 = arith.constant 1 : index
    %c0_43 = arith.constant 0 : index
    %c0_44 = arith.constant 0 : index
    %75 = vector.load %arg4[%c1, %c0_43, %c0_44] : memref<4x128x32xbf16, #tpu.memory_space<vmem>>, vector<1x128x32xbf16>
    %76 = vector.shape_cast %75 : vector<1x128x32xbf16> to vector<128x32xbf16>
    %cst_45 = arith.constant dense<0.000000e+00> : vector<128x32xf32>
    %77 = tpu.matmul %41, %76, %cst_45 {dimension_numbers = #tpu.dot_dimension_numbers<[1], [0], [0], [1], [0, 0, 1, 1], [], []>} : vector<128x128xbf16>, vector<128x32xbf16>, vector<128x32xf32> -> vector<128x32xf32>
    %78 = vector.broadcast %2 : f32 to vector<128x32xf32>
    %79 = arith.mulf %77, %78 : vector<128x32xf32>
    %c1_46 = arith.constant 1 : index
    %c0_47 = arith.constant 0 : index
    %c0_48 = arith.constant 0 : index
    %80 = vector.load %arg5[%c1_46, %c0_47, %c0_48] : memref<4x128x32xbf16, #tpu.memory_space<vmem>>, vector<1x128x32xbf16>
    %81 = vector.shape_cast %80 : vector<1x128x32xbf16> to vector<128x32xbf16>
    %cst_49 = arith.constant dense<0.000000e+00> : vector<128x32xf32>
    %82 = tpu.matmul %41, %81, %cst_49 {dimension_numbers = #tpu.dot_dimension_numbers<[1], [0], [0], [1], [0, 0, 1, 1], [], []>} : vector<128x128xbf16>, vector<128x32xbf16>, vector<128x32xf32> -> vector<128x32xf32>
    %c1_50 = arith.constant 1 : index
    %c0_51 = arith.constant 0 : index
    %c0_52 = arith.constant 0 : index
    %83 = vector.load %arg6[%c1_50, %c0_51, %c0_52] : memref<4x128x32xbf16, #tpu.memory_space<vmem>>, vector<1x128x32xbf16>
    %84 = vector.shape_cast %83 : vector<1x128x32xbf16> to vector<128x32xbf16>
    %cst_53 = arith.constant dense<0.000000e+00> : vector<128x32xf32>
    %85 = tpu.matmul %41, %84, %cst_53 {dimension_numbers = #tpu.dot_dimension_numbers<[1], [0], [0], [1], [0, 0, 1, 1], [], []>} : vector<128x128xbf16>, vector<128x32xbf16>, vector<128x32xf32> -> vector<128x32xf32>
    %86 = arith.truncf %79 : vector<128x32xf32> to vector<128x32xbf16>
    %87 = arith.truncf %82 : vector<128x32xf32> to vector<128x32xbf16>
    %cst_54 = arith.constant dense<0.000000e+00> : vector<128x128xf32>
    %88 = tpu.matmul %86, %87, %cst_54 {dimension_numbers = #tpu.dot_dimension_numbers<[1], [1], [0], [0], [0, 0, 1, 0], [], []>} : vector<128x32xbf16>, vector<128x32xbf16>, vector<128x128xf32> -> vector<128x128xf32>
    %cst_55 = arith.constant dense<0xFF800000> : vector<128xf32>
    %89 = vector.multi_reduction <maximumf>, %88, %cst_55 [1] : vector<128x128xf32> to vector<128xf32>
    %90 = vector.shape_cast %89 : vector<128xf32> to vector<128x1xf32>
    %91 = vector.broadcast %90 : vector<128x1xf32> to vector<128x128xf32>
    %92 = arith.subf %88, %91 : vector<128x128xf32>
    %93 = math.exp %92 : vector<128x128xf32>
    %cst_56 = arith.constant dense<0.000000e+00> : vector<128xf32>
    %94 = vector.multi_reduction <add>, %93, %cst_56 [1] : vector<128x128xf32> to vector<128xf32>
    %95 = vector.shape_cast %94 : vector<128xf32> to vector<128x1xf32>
    %96 = tpu.reciprocal %95 {approx = true} : vector<128x1xf32> -> vector<128x1xf32>
    %97 = vector.broadcast %96 : vector<128x1xf32> to vector<128x128xf32>
    %98 = arith.mulf %93, %97 : vector<128x128xf32>
    %99 = arith.truncf %98 : vector<128x128xf32> to vector<128x128xbf16>
    %100 = arith.truncf %85 : vector<128x32xf32> to vector<128x32xbf16>
    %cst_57 = arith.constant dense<0.000000e+00> : vector<128x32xf32>
    %101 = tpu.matmul %99, %100, %cst_57 {dimension_numbers = #tpu.dot_dimension_numbers<[1], [0], [0], [1], [0, 0, 1, 1], [], []>} : vector<128x128xbf16>, vector<128x32xbf16>, vector<128x32xf32> -> vector<128x32xf32>
    %102 = arith.truncf %101 : vector<128x32xf32> to vector<128x32xbf16>
    %c1_58 = arith.constant 1 : index
    %c0_59 = arith.constant 0 : index
    %c0_60 = arith.constant 0 : index
    %103 = vector.load %arg7[%c1_58, %c0_59, %c0_60] : memref<4x32x128xbf16, #tpu.memory_space<vmem>>, vector<1x32x128xbf16>
    %104 = vector.shape_cast %103 : vector<1x32x128xbf16> to vector<32x128xbf16>
    %cst_61 = arith.constant dense<0.000000e+00> : vector<128x128xf32>
    %105 = tpu.matmul %102, %104, %cst_61 {dimension_numbers = #tpu.dot_dimension_numbers<[1], [0], [0], [1], [0, 0, 1, 1], [], []>} : vector<128x32xbf16>, vector<32x128xbf16>, vector<128x128xf32> -> vector<128x128xf32>
    %106 = arith.addf %74, %105 : vector<128x128xf32>
    %c2 = arith.constant 2 : index
    %c0_62 = arith.constant 0 : index
    %c0_63 = arith.constant 0 : index
    %107 = vector.load %arg4[%c2, %c0_62, %c0_63] : memref<4x128x32xbf16, #tpu.memory_space<vmem>>, vector<1x128x32xbf16>
    %108 = vector.shape_cast %107 : vector<1x128x32xbf16> to vector<128x32xbf16>
    %cst_64 = arith.constant dense<0.000000e+00> : vector<128x32xf32>
    %109 = tpu.matmul %41, %108, %cst_64 {dimension_numbers = #tpu.dot_dimension_numbers<[1], [0], [0], [1], [0, 0, 1, 1], [], []>} : vector<128x128xbf16>, vector<128x32xbf16>, vector<128x32xf32> -> vector<128x32xf32>
    %110 = vector.broadcast %2 : f32 to vector<128x32xf32>
    %111 = arith.mulf %109, %110 : vector<128x32xf32>
    %c2_65 = arith.constant 2 : index
    %c0_66 = arith.constant 0 : index
    %c0_67 = arith.constant 0 : index
    %112 = vector.load %arg5[%c2_65, %c0_66, %c0_67] : memref<4x128x32xbf16, #tpu.memory_space<vmem>>, vector<1x128x32xbf16>
    %113 = vector.shape_cast %112 : vector<1x128x32xbf16> to vector<128x32xbf16>
    %cst_68 = arith.constant dense<0.000000e+00> : vector<128x32xf32>
    %114 = tpu.matmul %41, %113, %cst_68 {dimension_numbers = #tpu.dot_dimension_numbers<[1], [0], [0], [1], [0, 0, 1, 1], [], []>} : vector<128x128xbf16>, vector<128x32xbf16>, vector<128x32xf32> -> vector<128x32xf32>
    %c2_69 = arith.constant 2 : index
    %c0_70 = arith.constant 0 : index
    %c0_71 = arith.constant 0 : index
    %115 = vector.load %arg6[%c2_69, %c0_70, %c0_71] : memref<4x128x32xbf16, #tpu.memory_space<vmem>>, vector<1x128x32xbf16>
    %116 = vector.shape_cast %115 : vector<1x128x32xbf16> to vector<128x32xbf16>
    %cst_72 = arith.constant dense<0.000000e+00> : vector<128x32xf32>
    %117 = tpu.matmul %41, %116, %cst_72 {dimension_numbers = #tpu.dot_dimension_numbers<[1], [0], [0], [1], [0, 0, 1, 1], [], []>} : vector<128x128xbf16>, vector<128x32xbf16>, vector<128x32xf32> -> vector<128x32xf32>
    %118 = arith.truncf %111 : vector<128x32xf32> to vector<128x32xbf16>
    %119 = arith.truncf %114 : vector<128x32xf32> to vector<128x32xbf16>
    %cst_73 = arith.constant dense<0.000000e+00> : vector<128x128xf32>
    %120 = tpu.matmul %118, %119, %cst_73 {dimension_numbers = #tpu.dot_dimension_numbers<[1], [1], [0], [0], [0, 0, 1, 0], [], []>} : vector<128x32xbf16>, vector<128x32xbf16>, vector<128x128xf32> -> vector<128x128xf32>
    %cst_74 = arith.constant dense<0xFF800000> : vector<128xf32>
    %121 = vector.multi_reduction <maximumf>, %120, %cst_74 [1] : vector<128x128xf32> to vector<128xf32>
    %122 = vector.shape_cast %121 : vector<128xf32> to vector<128x1xf32>
    %123 = vector.broadcast %122 : vector<128x1xf32> to vector<128x128xf32>
    %124 = arith.subf %120, %123 : vector<128x128xf32>
    %125 = math.exp %124 : vector<128x128xf32>
    %cst_75 = arith.constant dense<0.000000e+00> : vector<128xf32>
    %126 = vector.multi_reduction <add>, %125, %cst_75 [1] : vector<128x128xf32> to vector<128xf32>
    %127 = vector.shape_cast %126 : vector<128xf32> to vector<128x1xf32>
    %128 = tpu.reciprocal %127 {approx = true} : vector<128x1xf32> -> vector<128x1xf32>
    %129 = vector.broadcast %128 : vector<128x1xf32> to vector<128x128xf32>
    %130 = arith.mulf %125, %129 : vector<128x128xf32>
    %131 = arith.truncf %130 : vector<128x128xf32> to vector<128x128xbf16>
    %132 = arith.truncf %117 : vector<128x32xf32> to vector<128x32xbf16>
    %cst_76 = arith.constant dense<0.000000e+00> : vector<128x32xf32>
    %133 = tpu.matmul %131, %132, %cst_76 {dimension_numbers = #tpu.dot_dimension_numbers<[1], [0], [0], [1], [0, 0, 1, 1], [], []>} : vector<128x128xbf16>, vector<128x32xbf16>, vector<128x32xf32> -> vector<128x32xf32>
    %134 = arith.truncf %133 : vector<128x32xf32> to vector<128x32xbf16>
    %c2_77 = arith.constant 2 : index
    %c0_78 = arith.constant 0 : index
    %c0_79 = arith.constant 0 : index
    %135 = vector.load %arg7[%c2_77, %c0_78, %c0_79] : memref<4x32x128xbf16, #tpu.memory_space<vmem>>, vector<1x32x128xbf16>
    %136 = vector.shape_cast %135 : vector<1x32x128xbf16> to vector<32x128xbf16>
    %cst_80 = arith.constant dense<0.000000e+00> : vector<128x128xf32>
    %137 = tpu.matmul %134, %136, %cst_80 {dimension_numbers = #tpu.dot_dimension_numbers<[1], [0], [0], [1], [0, 0, 1, 1], [], []>} : vector<128x32xbf16>, vector<32x128xbf16>, vector<128x128xf32> -> vector<128x128xf32>
    %138 = arith.addf %106, %137 : vector<128x128xf32>
    %c3 = arith.constant 3 : index
    %c0_81 = arith.constant 0 : index
    %c0_82 = arith.constant 0 : index
    %139 = vector.load %arg4[%c3, %c0_81, %c0_82] : memref<4x128x32xbf16, #tpu.memory_space<vmem>>, vector<1x128x32xbf16>
    %140 = vector.shape_cast %139 : vector<1x128x32xbf16> to vector<128x32xbf16>
    %cst_83 = arith.constant dense<0.000000e+00> : vector<128x32xf32>
    %141 = tpu.matmul %41, %140, %cst_83 {dimension_numbers = #tpu.dot_dimension_numbers<[1], [0], [0], [1], [0, 0, 1, 1], [], []>} : vector<128x128xbf16>, vector<128x32xbf16>, vector<128x32xf32> -> vector<128x32xf32>
    %142 = vector.broadcast %2 : f32 to vector<128x32xf32>
    %143 = arith.mulf %141, %142 : vector<128x32xf32>
    %c3_84 = arith.constant 3 : index
    %c0_85 = arith.constant 0 : index
    %c0_86 = arith.constant 0 : index
    %144 = vector.load %arg5[%c3_84, %c0_85, %c0_86] : memref<4x128x32xbf16, #tpu.memory_space<vmem>>, vector<1x128x32xbf16>
    %145 = vector.shape_cast %144 : vector<1x128x32xbf16> to vector<128x32xbf16>
    %cst_87 = arith.constant dense<0.000000e+00> : vector<128x32xf32>
    %146 = tpu.matmul %41, %145, %cst_87 {dimension_numbers = #tpu.dot_dimension_numbers<[1], [0], [0], [1], [0, 0, 1, 1], [], []>} : vector<128x128xbf16>, vector<128x32xbf16>, vector<128x32xf32> -> vector<128x32xf32>
    %c3_88 = arith.constant 3 : index
    %c0_89 = arith.constant 0 : index
    %c0_90 = arith.constant 0 : index
    %147 = vector.load %arg6[%c3_88, %c0_89, %c0_90] : memref<4x128x32xbf16, #tpu.memory_space<vmem>>, vector<1x128x32xbf16>
    %148 = vector.shape_cast %147 : vector<1x128x32xbf16> to vector<128x32xbf16>
    %cst_91 = arith.constant dense<0.000000e+00> : vector<128x32xf32>
    %149 = tpu.matmul %41, %148, %cst_91 {dimension_numbers = #tpu.dot_dimension_numbers<[1], [0], [0], [1], [0, 0, 1, 1], [], []>} : vector<128x128xbf16>, vector<128x32xbf16>, vector<128x32xf32> -> vector<128x32xf32>
    %150 = arith.truncf %143 : vector<128x32xf32> to vector<128x32xbf16>
    %151 = arith.truncf %146 : vector<128x32xf32> to vector<128x32xbf16>
    %cst_92 = arith.constant dense<0.000000e+00> : vector<128x128xf32>
    %152 = tpu.matmul %150, %151, %cst_92 {dimension_numbers = #tpu.dot_dimension_numbers<[1], [1], [0], [0], [0, 0, 1, 0], [], []>} : vector<128x32xbf16>, vector<128x32xbf16>, vector<128x128xf32> -> vector<128x128xf32>
    %cst_93 = arith.constant dense<0xFF800000> : vector<128xf32>
    %153 = vector.multi_reduction <maximumf>, %152, %cst_93 [1] : vector<128x128xf32> to vector<128xf32>
    %154 = vector.shape_cast %153 : vector<128xf32> to vector<128x1xf32>
    %155 = vector.broadcast %154 : vector<128x1xf32> to vector<128x128xf32>
    %156 = arith.subf %152, %155 : vector<128x128xf32>
    %157 = math.exp %156 : vector<128x128xf32>
    %cst_94 = arith.constant dense<0.000000e+00> : vector<128xf32>
    %158 = vector.multi_reduction <add>, %157, %cst_94 [1] : vector<128x128xf32> to vector<128xf32>
    %159 = vector.shape_cast %158 : vector<128xf32> to vector<128x1xf32>
    %160 = tpu.reciprocal %159 {approx = true} : vector<128x1xf32> -> vector<128x1xf32>
    %161 = vector.broadcast %160 : vector<128x1xf32> to vector<128x128xf32>
    %162 = arith.mulf %157, %161 : vector<128x128xf32>
    %163 = arith.truncf %162 : vector<128x128xf32> to vector<128x128xbf16>
    %164 = arith.truncf %149 : vector<128x32xf32> to vector<128x32xbf16>
    %cst_95 = arith.constant dense<0.000000e+00> : vector<128x32xf32>
    %165 = tpu.matmul %163, %164, %cst_95 {dimension_numbers = #tpu.dot_dimension_numbers<[1], [0], [0], [1], [0, 0, 1, 1], [], []>} : vector<128x128xbf16>, vector<128x32xbf16>, vector<128x32xf32> -> vector<128x32xf32>
    %166 = arith.truncf %165 : vector<128x32xf32> to vector<128x32xbf16>
    %c3_96 = arith.constant 3 : index
    %c0_97 = arith.constant 0 : index
    %c0_98 = arith.constant 0 : index
    %167 = vector.load %arg7[%c3_96, %c0_97, %c0_98] : memref<4x32x128xbf16, #tpu.memory_space<vmem>>, vector<1x32x128xbf16>
    %168 = vector.shape_cast %167 : vector<1x32x128xbf16> to vector<32x128xbf16>
    %cst_99 = arith.constant dense<0.000000e+00> : vector<128x128xf32>
    %169 = tpu.matmul %166, %168, %cst_99 {dimension_numbers = #tpu.dot_dimension_numbers<[1], [0], [0], [1], [0, 0, 1, 1], [], []>} : vector<128x32xbf16>, vector<32x128xbf16>, vector<128x128xf32> -> vector<128x128xf32>
    %170 = arith.addf %138, %169 : vector<128x128xf32>
    %171 = vector.shape_cast %12 : vector<128xf32> to vector<1x128xf32>
    %172 = vector.broadcast %171 : vector<1x128xf32> to vector<128x128xf32>
    %173 = arith.addf %170, %172 : vector<128x128xf32>
    %174 = arith.addf %1, %173 : vector<128x128xf32>
    %cst_100 = arith.constant dense<0.000000e+00> : vector<128xf32>
    %175 = vector.multi_reduction <add>, %174, %cst_100 [1] : vector<128x128xf32> to vector<128xf32>
    %176 = vector.shape_cast %175 : vector<128xf32> to vector<128x1xf32>
    %cst_101 = arith.constant 1.280000e+02 : f32
    %177 = vector.broadcast %cst_101 : f32 to vector<128x1xf32>
    %178 = arith.divf %176, %177 : vector<128x1xf32>
    %179 = vector.broadcast %178 : vector<128x1xf32> to vector<128x128xf32>
    %180 = arith.subf %174, %179 : vector<128x128xf32>
    %181 = arith.mulf %180, %180 : vector<128x128xf32>
    %cst_102 = arith.constant dense<0.000000e+00> : vector<128xf32>
    %182 = vector.multi_reduction <add>, %181, %cst_102 [1] : vector<128x128xf32> to vector<128xf32>
    %183 = vector.shape_cast %182 : vector<128xf32> to vector<128x1xf32>
    %cst_103 = arith.constant 1.280000e+02 : f32
    %184 = vector.broadcast %cst_103 : f32 to vector<128x1xf32>
    %185 = arith.divf %183, %184 : vector<128x1xf32>
    %186 = vector.broadcast %178 : vector<128x1xf32> to vector<128x128xf32>
    %187 = arith.subf %174, %186 : vector<128x128xf32>
    %cst_104 = arith.constant 9.99999974E-6 : f32
    %188 = vector.broadcast %cst_104 : f32 to vector<128x1xf32>
    %189 = arith.addf %185, %188 : vector<128x1xf32>
    %190 = math.rsqrt %189 : vector<128x1xf32>
    %191 = vector.broadcast %190 : vector<128x1xf32> to vector<128x128xf32>
    %192 = arith.mulf %187, %191 : vector<128x128xf32>
    %193 = vector.shape_cast %8 : vector<128xf32> to vector<1x128xf32>
    %194 = vector.broadcast %193 : vector<1x128xf32> to vector<128x128xf32>
    %195 = arith.mulf %192, %194 : vector<128x128xf32>
    %196 = vector.shape_cast %10 : vector<128xf32> to vector<1x128xf32>
    %197 = vector.broadcast %196 : vector<1x128xf32> to vector<128x128xf32>
    %198 = arith.addf %195, %197 : vector<128x128xf32>
    %199 = arith.truncf %198 : vector<128x128xf32> to vector<128x128xbf16>
    %c0_105 = arith.constant 0 : index
    %c0_106 = arith.constant 0 : index
    %200 = vector.load %arg11[%c0_105, %c0_106] : memref<128x256xbf16, #tpu.memory_space<vmem>>, vector<128x256xbf16>
    %cst_107 = arith.constant dense<0.000000e+00> : vector<128x256xf32>
    %201 = tpu.matmul %199, %200, %cst_107 {dimension_numbers = #tpu.dot_dimension_numbers<[1], [0], [0], [1], [0, 0, 1, 1], [], []>} : vector<128x128xbf16>, vector<128x256xbf16>, vector<128x256xf32> -> vector<128x256xf32>
    %202 = vector.shape_cast %14 : vector<256xf32> to vector<1x256xf32>
    %203 = vector.broadcast %202 : vector<1x256xf32> to vector<128x256xf32>
    %204 = arith.addf %201, %203 : vector<128x256xf32>
    %cst_108 = arith.constant 5.000000e-01 : f32
    %205 = vector.broadcast %cst_108 : f32 to vector<128x256xf32>
    %206 = arith.mulf %205, %204 : vector<128x256xf32>
    %cst_109 = arith.constant 0.707106769 : f32
    %207 = vector.broadcast %cst_109 : f32 to vector<128x256xf32>
    %208 = arith.mulf %204, %207 : vector<128x256xf32>
    %209 = math.erf %208 : vector<128x256xf32>
    %cst_110 = arith.constant 1.000000e+00 : f32
    %210 = vector.broadcast %cst_110 : f32 to vector<128x256xf32>
    %211 = arith.addf %210, %209 : vector<128x256xf32>
    %212 = arith.mulf %206, %211 : vector<128x256xf32>
    %213 = arith.truncf %212 : vector<128x256xf32> to vector<128x256xbf16>
    %c0_111 = arith.constant 0 : index
    %c0_112 = arith.constant 0 : index
    %214 = vector.load %arg13[%c0_111, %c0_112] : memref<256x128xbf16, #tpu.memory_space<vmem>>, vector<256x128xbf16>
    %cst_113 = arith.constant dense<0.000000e+00> : vector<128x128xf32>
    %215 = tpu.matmul %213, %214, %cst_113 {dimension_numbers = #tpu.dot_dimension_numbers<[1], [0], [0], [1], [0, 0, 1, 1], [], []>} : vector<128x256xbf16>, vector<256x128xbf16>, vector<128x128xf32> -> vector<128x128xf32>
    %216 = vector.shape_cast %16 : vector<128xf32> to vector<1x128xf32>
    %217 = vector.broadcast %216 : vector<1x128xf32> to vector<128x128xf32>
    %218 = arith.addf %215, %217 : vector<128x128xf32>
    %219 = arith.addf %198, %218 : vector<128x128xf32>
    %c0_114 = arith.constant 0 : index
    %c0_115 = arith.constant 0 : index
    %c0_116 = arith.constant 0 : index
    %220 = vector.load %arg15[%c0_114, %c0_115, %c0_116] : memref<1x128x128xf32, #tpu.memory_space<vmem>>, vector<1x128x128xf32>
    %221 = vector.shape_cast %220 : vector<1x128x128xf32> to vector<128x128xf32>
    %222 = vector.shape_cast %219 : vector<128x128xf32> to vector<1x128x128xf32>
    tpu.vector_store %arg15[%c0_114, %c0_115, %c0_116], %222 {strides = array<i32>} : memref<1x128x128xf32, #tpu.memory_space<vmem>>, vector<1x128x128xf32>,
    return
  }
  func.func @transform_0(%arg0: i32) -> (i32, i32, i32) {
    %c0_i32 = arith.constant 0 : i32
    %c0_i32_0 = arith.constant 0 : i32
    %c0_i32_1 = arith.constant 0 : i32
    return %arg0, %c0_i32, %c0_i32_0 : i32, i32, i32
  }
  func.func @transform_1(%arg0: i32) -> (i32, i32) {
    %c0_i32 = arith.constant 0 : i32
    %c0_i32_0 = arith.constant 0 : i32
    %c0_i32_1 = arith.constant 0 : i32
    return %c0_i32, %c0_i32_0 : i32, i32
  }
  func.func @transform_2(%arg0: i32) -> (i32, i32) {
    %c0_i32 = arith.constant 0 : i32
    %c0_i32_0 = arith.constant 0 : i32
    %c0_i32_1 = arith.constant 0 : i32
    return %c0_i32, %c0_i32_0 : i32, i32
  }
  func.func @transform_3(%arg0: i32) -> (i32, i32, i32) {
    %c0_i32 = arith.constant 0 : i32
    %c0_i32_0 = arith.constant 0 : i32
    %c0_i32_1 = arith.constant 0 : i32
    %c0_i32_2 = arith.constant 0 : i32
    return %c0_i32, %c0_i32_0, %c0_i32_1 : i32, i32, i32
  }
  func.func @transform_4(%arg0: i32) -> (i32, i32, i32) {
    %c0_i32 = arith.constant 0 : i32
    %c0_i32_0 = arith.constant 0 : i32
    %c0_i32_1 = arith.constant 0 : i32
    %c0_i32_2 = arith.constant 0 : i32
    return %c0_i32, %c0_i32_0, %c0_i32_1 : i32, i32, i32
  }
  func.func @transform_5(%arg0: i32) -> (i32, i32, i32) {
    %c0_i32 = arith.constant 0 : i32
    %c0_i32_0 = arith.constant 0 : i32
    %c0_i32_1 = arith.constant 0 : i32
    %c0_i32_2 = arith.constant 0 : i32
    return %c0_i32, %c0_i32_0, %c0_i32_1 : i32, i32, i32
  }
  func.func @transform_6(%arg0: i32) -> (i32, i32, i32) {
    %c0_i32 = arith.constant 0 : i32
    %c0_i32_0 = arith.constant 0 : i32
    %c0_i32_1 = arith.constant 0 : i32
    %c0_i32_2 = arith.constant 0 : i32
    return %c0_i32, %c0_i32_0, %c0_i32_1 : i32, i32, i32
  }
  func.func @transform_7(%arg0: i32) -> (i32, i32) {
    %c0_i32 = arith.constant 0 : i32
    %c0_i32_0 = arith.constant 0 : i32
    %c0_i32_1 = arith.constant 0 : i32
    return %c0_i32, %c0_i32_0 : i32, i32
  }
  func.func @transform_8(%arg0: i32) -> (i32, i32) {
    %c0_i32 = arith.constant 0 : i32
    %c0_i32_0 = arith.constant 0 : i32
    %c0_i32_1 = arith.constant 0 : i32
    return %c0_i32, %c0_i32_0 : i32, i32
  }
  func.func @transform_9(%arg0: i32) -> (i32, i32) {
    %c0_i32 = arith.constant 0 : i32
    %c0_i32_0 = arith.constant 0 : i32
    %c0_i32_1 = arith.constant 0 : i32
    return %c0_i32, %c0_i32_0 : i32, i32
  }
  func.func @transform_10(%arg0: i32) -> (i32, i32) {
    %c0_i32 = arith.constant 0 : i32
    %c0_i32_0 = arith.constant 0 : i32
    %c0_i32_1 = arith.constant 0 : i32
    return %c0_i32, %c0_i32_0 : i32, i32
  }
  func.func @transform_11(%arg0: i32) -> (i32, i32) {
    %c0_i32 = arith.constant 0 : i32
    %c0_i32_0 = arith.constant 0 : i32
    %c0_i32_1 = arith.constant 0 : i32
    return %c0_i32, %c0_i32_0 : i32, i32
  }
  func.func @transform_12(%arg0: i32) -> (i32, i32) {
    %c0_i32 = arith.constant 0 : i32
    %c0_i32_0 = arith.constant 0 : i32
    %c0_i32_1 = arith.constant 0 : i32
    return %c0_i32, %c0_i32_0 : i32, i32
  }
  func.func @transform_13(%arg0: i32) -> (i32, i32) {
    %c0_i32 = arith.constant 0 : i32
    %c0_i32_0 = arith.constant 0 : i32
    %c0_i32_1 = arith.constant 0 : i32
    return %c0_i32, %c0_i32_0 : i32, i32
  }
  func.func @transform_14(%arg0: i32) -> (i32, i32, i32) {
    %c0_i32 = arith.constant 0 : i32
    %c0_i32_0 = arith.constant 0 : i32
    %c0_i32_1 = arith.constant 0 : i32
    return %arg0, %c0_i32, %c0_i32_0 : i32, i32, i32
  }
}

</mosaic_0001>

<bundles_post_ra>
// kernel: tpu_custom_call.1
= control target key start
LH: loop header
LB: loop body
LE: loop exit
PB: predicated region body
PF: predicated region fallthrough
CT: control target
= control target key end

     0   :  { %s10449_s0 = inlined_call_operand.vmem [shape: f32[2,128,128], index: 0, kind: input, shape index: {}]   ;;  %s10450_s1 = inlined_call_operand.vmem [shape: f32[1,128], index: 1, kind: input, shape index: {}]   ;;  %s10451_s2 = inlined_call_operand.vmem [shape: f32[1,128], index: 2, kind: input, shape index: {}]   ;;  %s10452_s3 = inlined_call_operand.vmem [shape: bf16[4,128,32], index: 3, kind: input, shape index: {}]   ;;  %s10453_s4 = inlined_call_operand.vmem [shape: bf16[4,128,32], index: 4, kind: input, shape index: {}]   ;;  %s10454_s5 = inlined_call_operand.vmem [shape: bf16[4,128,32], index: 5, kind: input, shape index: {}]   ;;  %s10455_s6 = inlined_call_operand.vmem [shape: bf16[4,32,128], index: 6, kind: input, shape index: {}]   ;;  %s10456_s7 = inlined_call_operand.vmem [shape: f32[1,128], index: 7, kind: input, shape index: {}]   ;;  %s10457_s8 = inlined_call_operand.vmem [shape: f32[1,128], index: 8, kind: input, shape index: {}]   ;;  %s10458_s9 = inlined_call_operand.vmem [shape: f32[1,128], index: 9, kind: input, shape index: {}]   ;;  %s10459_s10 = inlined_call_operand.vmem [shape: bf16[128,256], index: 10, kind: input, shape index: {}]   ;;  %s10460_s11 = inlined_call_operand.vmem [shape: f32[1,256], index: 11, kind: input, shape index: {}]   ;;  %s10461_s12 = inlined_call_operand.vmem [shape: bf16[256,128], index: 12, kind: input, shape index: {}]   ;;  %s10462_s13 = inlined_call_operand.vmem [shape: f32[1,128], index: 13, kind: input, shape index: {}]   ;;  %s10463_s14 = inlined_call_operand.hbm [shape: f32[2,128,128], index: 14, kind: output, shape index: {}]  }
   0x1   :  { %10473 = sst [smem:[#allocation15_spill]] %s10449_s0 }
   0x2   :  { %10474 = sst [smem:[#allocation16_spill]] %s10450_s1 }
   0x3   :  { %19 = vsyncpa [#allocation3], 0 }
   0x4   :  { %21 = vsyncpa [#allocation3 + $0x1], 0  ;;  %s8342_s29 = smov 0   ;;  %s8344_s30 = smov 0  }
   0x5   :  { %s8346_s15 = smov 0   ;;  %s8348_s16 = smov 0  }
   0x6 LB: > { %s8363_s17 = sadd.s32 4294967295, %s8261_s16   ;;  %s6013_s18 = sadd.s32 4294967294, %s8261_s16   ;;  %s8261_s16 = sphi %s8348_s16, %s10525_s16   ;;  %s8257_s15 = sphi %s8346_s15, %s10524_s15   ;;  %s8253_s30 = sphi %s8344_s30, %s10523_s30   ;;  %s8249_s29 = sphi %s8342_s29, %s10522_s29  }
   0x7   : > { %s8367_s19 = sadd.s32 1, %s8261_s16   ;;  %s333_s20 = sadd.s32 1, %s8257_s15 }
   0x8   : > { %s330_s21 = ssub.s32 %s8261_s16, %s8367_s19  ;;  %p343_p0 = scmp.ne.s32.totalorder %s8257_s15, %s8253_s30 }
   0x9   : > { %p331_p1 = scmp.eq.s32.totalorder %s330_s21, 0  ;;  %p344_p2 = scmp.eq.s32.totalorder %s8363_s17, 1 }
   0xa   : > { %p349_p3 = scmp.ne.s32.totalorder %s8253_s30, %s8249_s29  ;;  %p350_p4 = scmp.eq.s32.totalorder %s6013_s18, 1 }
   0xb   : > { %s8378_s22 = scalar_select %p331_p1, %s8257_s15, %s333_s20  }
   0xc   : > { %p8380_p5 = por %p344_p2, %p343_p0  ;;  %p8384_p6 = por %p350_p4, %p349_p3 }
   0xd   : > { %10475 = sst [smem:[#allocation5_spill]] %s8378_s22  ;;  %p6016_p7 = scmp.ge.s32.totalorder %s8261_s16, 1 }
   0xe   : > { %p415_p8 = scmp.lt.s32.totalorder %s8261_s16, 3 }
  0x10   : > { %p416_p9 = pnand %p6016_p7, %p415_p8 }
  0x12   : > { %419 = sbr.rel (%p416_p9) target bundleno = 4859 (0x12fb), region = 76 }
  0x19   : > { %p461_p10 = scmp.lt.s32.totalorder %s8363_s17, 1  ;;  %s10478_s0 = sld [smem:[#allocation15_spill]]  ;;  %v7655_v16 = vld [vmem:[%s10452_s3] sm:$0xff]   ;;  %v7657_v61 = vld [vmem:[%s10452_s3 + $0x8] sm:$0xff]   ;;  %vm1234_vm0 = vcmask 261120  }
  0x1a   : > { %v7656_v17 = vld [vmem:[%s10454_s5] sm:$0xff]   ;;  %6813 = vmatprep.subr.bf16.mxu1 %v7655_v16  ;;  %v7658_v62 = vld [vmem:[%s10454_s5 + $0x8] sm:$0xff]   ;;  %s10479_s1 = sld [smem:[#allocation16_spill]]  ;;  %s458_s21 = sand.u32 1, %s8253_s30  }
  0x1b   : > { %s462_s25 = scalar_select %p461_p10, %s8363_s17, 1  ;;  %6877 = vmatprep.subr.bf16.mxu0 %v7656_v17  ;;  %6814 = vmatpush3.bf16.msra.mxu1 %v7655_v16 }
  0x1c   : > { %6878 = vmatpush3.bf16.msra.mxu0 %v7656_v17  ;;  %6815 = vmatprep.subr.bf16.mxu1 %v7657_v61 }
  0x1d   : > { %s6387_s26 = sshll.u32 %s462_s25, 7  ;;  %6879 = vmatprep.subr.bf16.mxu0 %v7658_v62  ;;  %s6017_s25 = sshll.u32 %s458_s21, 7 }
  0x1f   : > { %s8395_s18 = scalar_lea.vmem %s10478_s0, %s6387_s26  ;;  %6816 = vmatpush3.bf16.msra.mxu1 %v7657_v61  ;;  %s10350_s26 = scalar_lea.vmem [#allocation2], %s6017_s25 }
  0x20   : > { %v467_v0 = vld [vmem:[%s8395_s18] sm:$0xff]  ;;  %v469_v1 = vld [vmem:[%s8395_s18 + $0x10] sm:$0xff]  ;;  %v468_v2 = vld [vmem:[%s8395_s18 + $0x8] sm:$0xff]  ;;  %6880 = vmatpush3.bf16.msra.mxu0 %v7658_v62  ;;  %s6388_s0 = sshll.u32 %s8363_s17, 11  ;;  %s5951_s22 = sshll.u32 %s10350_s26, 4  ;;  %s10401_s22 = int_to_ptr.vmem [resolvable:$true] %s5951_s22 }
  0x21   : > { %490 = vadd.xlane.f32.xlu0 %v467_v0  ;;  %494 = vadd.xlane.f32.xlu1 %v469_v1  ;;  %v470_v3 = vld [vmem:[%s8395_s18 + $0x18] sm:$0xff]  ;;  %v471_v4 = vld [vmem:[%s8395_s18 + $0x20] sm:$0xff]  ;;  %v472_v5 = vld [vmem:[%s8395_s18 + $0x28] sm:$0xff]  ;;  %s10399_s20 = scalar_lea.hbm %s10463_s14, %s6388_s0  ;;  %s10408_s17 = scalar_lea.sflag [#allocation3], %s458_s21 }
  0x22   : > { %v473_v6 = vld [vmem:[%s8395_s18 + $0x30] sm:$0xff]  ;;  %v474_v7 = vld [vmem:[%s8395_s18 + $0x38] sm:$0xff]  ;;  %v8406_v8 = vld [vmem:[%s8395_s18 + $0x40] sm:$0xff] }
  0x23   : > { %v8409_v9 = vld [vmem:[%s8395_s18 + $0x48] sm:$0xff]  ;;  %v8412_v10 = vld [vmem:[%s8395_s18 + $0x50] sm:$0xff]  ;;  %v8415_v11 = vld [vmem:[%s8395_s18 + $0x58] sm:$0xff] }
  0x24   : > { %v8420_v12 = vld [vmem:[%s8395_s18 + $0x60] sm:$0xff]  ;;  %v8423_v13 = vld [vmem:[%s8395_s18 + $0x68] sm:$0xff]  ;;  %v8428_v14 = vld [vmem:[%s8395_s18 + $0x70] sm:$0xff] }
  0x25   : > { %492 = vadd.xlane.f32.xlu0 %v468_v2  ;;  %496 = vadd.xlane.f32.xlu1 %v470_v3  ;;  %v8431_v15 = vld [vmem:[%s8395_s18 + $0x78] sm:$0xff] }
  0x29   : > { %498 = vadd.xlane.f32.xlu0 %v471_v4  ;;  %500 = vadd.xlane.f32.xlu1 %v472_v5 }
  0x2d   : > { %502 = vadd.xlane.f32.xlu0 %v473_v6  ;;  %504 = vadd.xlane.f32.xlu1 %v474_v7 }
  0x31   : > { %506 = vadd.xlane.f32.xlu0 %v8406_v8  ;;  %508 = vadd.xlane.f32.xlu1 %v8409_v9 }
  0x35   : > { %510 = vadd.xlane.f32.xlu0 %v8412_v10  ;;  %512 = vadd.xlane.f32.xlu1 %v8415_v11 }
  0x39   : > { %514 = vadd.xlane.f32.xlu0 %v8420_v12  ;;  %516 = vadd.xlane.f32.xlu1 %v8423_v13 }
  0x3d   : > { %518 = vadd.xlane.f32.xlu0 %v8428_v14  ;;  %520 = vadd.xlane.f32.xlu1 %v8431_v15 }
  0xae   : > { %v491_v18 = vpop.xlane.xlu0 %490  ;;  %v495_v19 = vpop.xlane.xlu1 %494 }
  0xaf   : > { %v523_v20 = vmul.f32 0.0078125, %v491_v18  ;;  %v525_v21 = vmul.f32 0.0078125, %v495_v19 }
  0xb1   : > { %v8443_v22 = vsub.f32 %v467_v0, %v523_v20  ;;  %v8445_v23 = vsub.f32 %v469_v1, %v525_v21 }
  0xb2   : > { %v493_v24 = vpop.xlane.xlu0 %492  ;;  %v497_v25 = vpop.xlane.xlu1 %496 }
  0xb3   : > { %v524_v26 = vmul.f32 0.0078125, %v493_v24  ;;  %v555_v27 = vmul.f32 %v8443_v22, %v8443_v22  ;;  %v526_v28 = vmul.f32 0.0078125, %v497_v25  ;;  %v557_v29 = vmul.f32 %v8445_v23, %v8445_v23  ;;  %v7661_v24 = vld [vmem:[%s10452_s3 + $0x18] sm:$0xff]  }
  0xb4   : > { %v7662_v25 = vld [vmem:[%s10454_s5 + $0x18] sm:$0xff]  }
  0xb5   : > { %571 = vadd.xlane.f32.xlu0 %v555_v27  ;;  %v8451_v30 = vsub.f32 %v468_v2, %v524_v26  ;;  %v8453_v31 = vsub.f32 %v470_v3, %v526_v28  ;;  %v7664_v27 = vld [vmem:[%s10454_s5 + $0x20] sm:$0xff]   ;;  %v7665_v28 = vld [vmem:[%s10452_s3 + $0x28] sm:$0xff]  }
  0xb6   : > { %v499_v32 = vpop.xlane.xlu0 %498  ;;  %v501_v33 = vpop.xlane.xlu1 %500 }
  0xb7   : > { %v527_v34 = vmul.f32 0.0078125, %v499_v32  ;;  %v556_v35 = vmul.f32 %v8451_v30, %v8451_v30  ;;  %v528_v36 = vmul.f32 0.0078125, %v501_v33  ;;  %v558_v37 = vmul.f32 %v8453_v31, %v8453_v31  ;;  %v7667_v32 = vld [vmem:[%s10452_s3 + $0x30] sm:$0xff]  }
  0xb8   : > { %v7668_v33 = vld [vmem:[%s10454_s5 + $0x30] sm:$0xff]  }
  0xb9   : > { %575 = vadd.xlane.f32.xlu0 %v557_v29  ;;  %573 = vadd.xlane.f32.xlu1 %v556_v35  ;;  %v8459_v38 = vsub.f32 %v471_v4, %v527_v34  ;;  %v8461_v39 = vsub.f32 %v472_v5, %v528_v36  ;;  %v7666_v29 = vld [vmem:[%s10454_s5 + $0x28] sm:$0xff]   ;;  %v7669_v34 = vld [vmem:[%s10452_s3 + $0x38] sm:$0xff]   ;;  %v8560_v36 = vld [vmem:[%s10453_s4] sm:$0xff]  }
  0xba   : > { %v503_v40 = vpop.xlane.xlu0 %502  ;;  %v505_v41 = vpop.xlane.xlu1 %504  ;;  %v7670_v35 = vld [vmem:[%s10454_s5 + $0x38] sm:$0xff]  }
  0xbb   : > { %v529_v42 = vmul.f32 0.0078125, %v503_v40  ;;  %v559_v43 = vmul.f32 %v8459_v38, %v8459_v38  ;;  %v530_v44 = vmul.f32 0.0078125, %v505_v41  ;;  %v560_v45 = vmul.f32 %v8461_v39, %v8461_v39 }
  0xbd   : > { %577 = vadd.xlane.f32.xlu1 %v558_v37  ;;  %579 = vadd.xlane.f32.xlu0 %v559_v43  ;;  %v8467_v46 = vsub.f32 %v473_v6, %v529_v42  ;;  %v8469_v47 = vsub.f32 %v474_v7, %v530_v44 }
  0xbe   : > { %v507_v48 = vpop.xlane.xlu0 %506  ;;  %v509_v49 = vpop.xlane.xlu1 %508 }
  0xbf   : > { %v531_v50 = vmul.f32 0.0078125, %v507_v48  ;;  %v561_v51 = vmul.f32 %v8467_v46, %v8467_v46  ;;  %v532_v52 = vmul.f32 0.0078125, %v509_v49  ;;  %v562_v53 = vmul.f32 %v8469_v47, %v8469_v47 }
  0xc1   : > { %581 = vadd.xlane.f32.xlu1 %v560_v45  ;;  %583 = vadd.xlane.f32.xlu0 %v561_v51  ;;  %v8476_v54 = vsub.f32 %v8406_v8, %v531_v50  ;;  %v8479_v55 = vsub.f32 %v8409_v9, %v532_v52 }
  0xc2   : > { %v511_v56 = vpop.xlane.xlu0 %510  ;;  %v513_v57 = vpop.xlane.xlu1 %512 }
  0xc3   : > { %v533_v58 = vmul.f32 0.0078125, %v511_v56  ;;  %v563_v59 = vmul.f32 %v8476_v54, %v8476_v54  ;;  %v534_v60 = vmul.f32 0.0078125, %v513_v57  ;;  %v564_v63 = vmul.f32 %v8479_v55, %v8479_v55 }
  0xc5   : > { %585 = vadd.xlane.f32.xlu1 %v562_v53  ;;  %587 = vadd.xlane.f32.xlu0 %v563_v59  ;;  %v8492_v0 = vsub.f32 %v8412_v10, %v533_v58  ;;  %v8495_v1 = vsub.f32 %v8415_v11, %v534_v60  ;;  %v7659_v10 = vld [vmem:[%s10452_s3 + $0x10] sm:$0xff]  }
  0xc6   : > { %v515_v2 = vpop.xlane.xlu0 %514  ;;  %v517_v3 = vpop.xlane.xlu1 %516  ;;  %v7660_v11 = vld [vmem:[%s10454_s5 + $0x10] sm:$0xff]   ;;  %6817 = vmatprep.subr.bf16.mxu1 %v7659_v10 }
  0xc7   : > { %v535_v4 = vmul.f32 0.0078125, %v515_v2  ;;  %v565_v5 = vmul.f32 %v8492_v0, %v8492_v0  ;;  %v536_v6 = vmul.f32 0.0078125, %v517_v3  ;;  %v566_v7 = vmul.f32 %v8495_v1, %v8495_v1  ;;  %6881 = vmatprep.subr.bf16.mxu0 %v7660_v11  ;;  %6818 = vmatpush3.bf16.msra.mxu1 %v7659_v10 }
  0xc8   : > { %6882 = vmatpush3.bf16.msra.mxu0 %v7660_v11  ;;  %6819 = vmatprep.subr.bf16.mxu1 %v7661_v24 }
  0xc9   : > { %589 = vadd.xlane.f32.xlu1 %v564_v63  ;;  %591 = vadd.xlane.f32.xlu0 %v565_v5  ;;  %v8502_v8 = vsub.f32 %v8420_v12, %v535_v4  ;;  %v8505_v9 = vsub.f32 %v8423_v13, %v536_v6  ;;  %v8567_v6 = vld [vmem:[%s10479_s1] ss:$0 sm:$0xff]  ;;  %s8264_s1 = smov [#allocation2]  }
  0xca   : > { %v519_v16 = vpop.xlane.xlu0 %518  ;;  %v521_v17 = vpop.xlane.xlu1 %520  ;;  %6883 = vmatprep.subr.bf16.mxu0 %v7662_v25  ;;  %s8203_s25 = sshll.u32 %s8264_s1, 4  ;;  %s8204_s25 = int_to_ptr.vmem [resolvable:$false] %s8203_s25 }
  0xcb   : > { %v537_v18 = vmul.f32 0.0078125, %v519_v16  ;;  %v567_v19 = vmul.f32 %v8502_v8, %v8502_v8  ;;  %v538_v20 = vmul.f32 0.0078125, %v521_v17  ;;  %v568_v12 = vmul.f32 %v8505_v9, %v8505_v9  ;;  %6820 = vmatpush3.bf16.msra.mxu1 %v7661_v24  ;;  %v8574_v24 = vld [vmem:[%s10451_s2] ss:$0 sm:$0xff]  ;;  %s8205_s0 = scalar_lea.vmem %s8204_s25, 4096  ;;  %p8206_p0 = scmp.lt.s32.totalorder %s10401_s22, %s8204_s25 }
  0xcc   : > { %6884 = vmatpush3.bf16.msra.mxu0 %v7662_v25 }
  0xcd   : > { %593 = vadd.xlane.f32.xlu1 %v566_v7  ;;  %595 = vadd.xlane.f32.xlu0 %v567_v19  ;;  %v8518_v13 = vsub.f32 %v8428_v14, %v537_v18  ;;  %v8521_v21 = vsub.f32 %v8431_v15, %v538_v20  ;;  %v7663_v15 = vld [vmem:[%s10452_s3 + $0x20] sm:$0xff]  }
  0xce   : > { %6821 = vmatprep.subr.bf16.mxu1 %v7663_v15  ;;  %6885 = vmatprep.subr.bf16.mxu0 %v7664_v27 }
  0xcf   : > { %v569_v26 = vmul.f32 %v8518_v13, %v8518_v13  ;;  %v570_v14 = vmul.f32 %v8521_v21, %v8521_v21  ;;  %6822 = vmatpush3.bf16.msra.mxu1 %v7663_v15 }
  0xd0   : > { %6886 = vmatpush3.bf16.msra.mxu0 %v7664_v27  ;;  %6823 = vmatprep.subr.bf16.mxu1 %v7665_v28 }
  0xd1   : > { %597 = vadd.xlane.f32.xlu1 %v568_v12  ;;  %599 = vadd.xlane.f32.xlu0 %v569_v26 }
  0xd2   : > { %6887 = vmatprep.subr.bf16.mxu0 %v7666_v29 }
  0xd3   : > { %6824 = vmatpush3.bf16.msra.mxu1 %v7665_v28 }
  0xd4   : > { %6888 = vmatpush3.bf16.msra.mxu0 %v7666_v29  ;;  %6825 = vmatprep.subr.bf16.mxu1 %v7667_v32 }
  0xd5   : > { %601 = vadd.xlane.f32.xlu1 %v570_v14  ;;  %6889 = vmatprep.subr.bf16.mxu0 %v7668_v33 }
  0xd7   : > { %6826 = vmatpush3.bf16.msra.mxu1 %v7667_v32 }
  0xd8   : > { %6890 = vmatpush3.bf16.msra.mxu0 %v7668_v33  ;;  %6827 = vmatprep.subr.bf16.mxu1 %v7669_v34 }
  0xd9   : > { %6891 = vmatprep.subr.bf16.mxu0 %v7670_v35 }
  0xdb   : > { %6828 = vmatpush3.bf16.msra.mxu1 %v7669_v34 }
  0xdc   : > { %6892 = vmatpush3.bf16.msra.mxu0 %v7670_v35  ;;  %6845 = vmatprep.subr.bf16.mxu1 %v8560_v36 }
 0x142   : > { %v572_v37 = vpop.xlane.xlu0 %571 }
 0x143   : > { %v603_v40 = vmul.f32 0.0078125, %v572_v37 }
 0x145   : > { %v619_v41 = vadd.f32 1e-05, %v603_v40 }
 0x146   : > { %v574_v42 = vpop.xlane.xlu1 %573  ;;  %v576_v43 = vpop.xlane.xlu0 %575 }
 0x147   : > { %7799 = vrsqrt.f32 %v619_v41  ;;  %v604_v44 = vmul.f32 0.0078125, %v574_v42  ;;  %v605_v45 = vmul.f32 0.0078125, %v576_v43 }
 0x149   : > { %v620_v48 = vadd.f32 1e-05, %v604_v44  ;;  %v621_v49 = vadd.f32 1e-05, %v605_v45 }
 0x14a   : > { %v578_v50 = vpop.xlane.xlu1 %577  ;;  %v580_v51 = vpop.xlane.xlu0 %579 }
 0x14b   : > { %7801 = vrsqrt.f32 %v620_v48  ;;  %v606_v52 = vmul.f32 0.0078125, %v578_v50  ;;  %v607_v53 = vmul.f32 0.0078125, %v580_v51 }
 0x14c   : > { %7803 = vrsqrt.f32 %v621_v49 }
 0x14d   : > { %v622_v56 = vadd.f32 1e-05, %v606_v52  ;;  %v623_v57 = vadd.f32 1e-05, %v607_v53 }
 0x14e   : > { %v582_v58 = vpop.xlane.xlu1 %581  ;;  %v584_v59 = vpop.xlane.xlu0 %583 }
 0x14f   : > { %7805 = vrsqrt.f32 %v622_v56  ;;  %v608_v60 = vmul.f32 0.0078125, %v582_v58  ;;  %v609_v61 = vmul.f32 0.0078125, %v584_v59 }
 0x150   : > { %7807 = vrsqrt.f32 %v623_v57 }
 0x151   : > { %v7800_v62 = vpop.eup %7799  ;;  %v624_v63 = vadd.f32 1e-05, %v608_v60  ;;  %v625_v2 = vadd.f32 1e-05, %v609_v61 }
 0x152   : > { %v651_v3 = vmul.f32 %v7800_v62, %v8443_v22  ;;  %v586_v4 = vpop.xlane.xlu1 %585  ;;  %v588_v5 = vpop.xlane.xlu0 %587 }
 0x153   : > { %7809 = vrsqrt.f32 %v624_v63  ;;  %v610_v7 = vmul.f32 0.0078125, %v586_v4  ;;  %v611_v10 = vmul.f32 0.0078125, %v588_v5 }
 0x154   : > { %7811 = vrsqrt.f32 %v625_v2  ;;  %v673_v19 = vmul.f32 %v8567_v6, %v651_v3 }
 0x155   : > { %v7802_v11 = vpop.eup %7801  ;;  %v626_v16 = vadd.f32 1e-05, %v610_v7  ;;  %v627_v17 = vadd.f32 1e-05, %v611_v10 }
 0x156   : > { %v7804_v18 = vpop.eup %7803  ;;  %v652_v20 = vmul.f32 %v7802_v11, %v8451_v30  ;;  %v590_v22 = vpop.xlane.xlu1 %589  ;;  %v695_v30 = vadd.f32 %v8574_v24, %v673_v19 }
 0x157   : > { %v592_v12 = vpop.xlane.xlu0 %591  ;;  %v653_v25 = vmul.f32 %v7804_v18, %v8445_v23  ;;  %7813 = vrsqrt.f32 %v626_v16  ;;  %v612_v26 = vmul.f32 0.0078125, %v590_v22 }
 0x158   : > { %v613_v14 = vmul.f32 0.0078125, %v592_v12  ;;  %v674_v15 = vmul.f32 %v8567_v6, %v652_v20  ;;  %7815 = vrsqrt.f32 %v627_v17 }
 0x159   : > { %v7806_v27 = vpop.eup %7805  ;;  %v628_v28 = vadd.f32 1e-05, %v612_v26  ;;  %v675_v34 = vmul.f32 %v8567_v6, %v653_v25 }
 0x15a   : > { %v629_v29 = vadd.f32 1e-05, %v613_v14  ;;  %v7808_v32 = vpop.eup %7807  ;;  %v696_v33 = vadd.f32 %v8574_v24, %v674_v15  ;;  %v654_v35 = vmul.f32 %v7806_v27, %v8453_v31  ;;  %v594_v37 = vpop.xlane.xlu1 %593  ;;  %v7674_v27 = vld [vmem:[%s10453_s4 + $0x18] sm:$0xff]  }
 0x15b   : > { %v596_v23 = vpop.xlane.xlu0 %595  ;;  %v655_v40 = vmul.f32 %v7808_v32, %v8459_v38  ;;  %7817 = vrsqrt.f32 %v628_v28  ;;  %v614_v41 = vmul.f32 0.0078125, %v594_v37  ;;  %v697_v51 = vadd.f32 %v8574_v24, %v675_v34  ;;  %v7675_v37 = vld [vmem:[%s10453_s4 + $0x20] sm:$0xff]  }
 0x15c   : > { %v8583_v42 = vpack.c.bf16 %v696_v33, %v695_v30  ;;  %v676_v43 = vmul.f32 %v8567_v6, %v654_v35  ;;  %7819 = vrsqrt.f32 %v629_v29  ;;  %v615_v44 = vmul.f32 0.0078125, %v596_v23 }
 0x15d   : > { %v7810_v45 = vpop.eup %7809  ;;  %v677_v48 = vmul.f32 %v8567_v6, %v655_v40  ;;  %v630_v49 = vadd.f32 1e-05, %v614_v41 }
 0x15e   : > { %v7812_v50 = vpop.eup %7811  ;;  %v698_v31 = vadd.f32 %v8574_v24, %v676_v43  ;;  %v656_v52 = vmul.f32 %v7810_v45, %v8461_v39  ;;  %v631_v38 = vadd.f32 1e-05, %v615_v44  ;;  %v598_v53 = vpop.xlane.xlu1 %597  ;;  %6829 = vmatprep.mubr.bf16.mxu1 %v8583_v42  ;;  %6893 = vmatprep.mubr.bf16.mxu0 %v8583_v42  ;;  %v7672_v39 = vld [vmem:[%s10453_s4 + $0x8] sm:$0xff]  }
 0x15f   : > { %v600_v56 = vpop.xlane.xlu0 %599  ;;  %v657_v57 = vmul.f32 %v7812_v50, %v8467_v46  ;;  %7821 = vrsqrt.f32 %v630_v49  ;;  %v616_v58 = vmul.f32 0.0078125, %v598_v53  ;;  %v699_v63 = vadd.f32 %v8574_v24, %v677_v48  ;;  %v7676_v49 = vld [vmem:[%s10453_s4 + $0x28] sm:$0xff]   ;;  %v7677_v53 = vld [vmem:[%s10453_s4 + $0x30] sm:$0xff]  }
 0x160   : > { %v8593_v59 = vpack.c.bf16 %v698_v31, %v697_v51  ;;  %v678_v60 = vmul.f32 %v8567_v6, %v656_v52  ;;  %7823 = vrsqrt.f32 %v631_v38  ;;  %v617_v61 = vmul.f32 0.0078125, %v600_v56 }
 0x161   : > { %v7814_v62 = vpop.eup %7813  ;;  %v632_v2 = vadd.f32 1e-05, %v616_v58  ;;  %v679_v46 = vmul.f32 %v8567_v6, %v657_v57 }
 0x162   : > { %v7816_v3 = vpop.eup %7815  ;;  %v700_v4 = vadd.f32 %v8574_v24, %v678_v60  ;;  %v658_v5 = vmul.f32 %v7814_v62, %v8469_v47  ;;  %v633_v7 = vadd.f32 1e-05, %v617_v61  ;;  %v602_v10 = vpop.xlane.xlu1 %601  ;;  %6830 = vmatmul.mubr.bf16.vlgmr.msra.gmra.mrb[0].mxu1 %v8593_v59  ;;  %6894 = vmatmul.mubr.bf16.vlgmr.msra.gmra.mrb[0].mxu0 %v8593_v59  ;;  %v7673_v47 = vld [vmem:[%s10453_s4 + $0x10] sm:$0xff]  }
 0x163   : > { %v659_v11 = vmul.f32 %v7816_v3, %v8476_v54  ;;  %7825 = vrsqrt.f32 %v632_v2  ;;  %v618_v16 = vmul.f32 0.0078125, %v602_v10  ;;  %6846 = vmatpush3.bf16.msra.mxu1 %v8560_v36  ;;  %v701_v54 = vadd.f32 %v8574_v24, %v679_v46 }
 0x164   : > { %v8607_v17 = vpack.c.bf16 %v700_v4, %v699_v63  ;;  %v680_v18 = vmul.f32 %v8567_v6, %v658_v5  ;;  %7827 = vrsqrt.f32 %v633_v7  ;;  %6847 = vmatprep.subr.bf16.mxu1 %v7672_v39 }
 0x165   : > { %v7818_v19 = vpop.eup %7817  ;;  %v681_v20 = vmul.f32 %v8567_v6, %v659_v11  ;;  %v634_v22 = vadd.f32 1e-05, %v618_v16 }
 0x166   : > { %v7820_v12 = vpop.eup %7819  ;;  %v702_v25 = vadd.f32 %v8574_v24, %v680_v18  ;;  %v660_v36 = vmul.f32 %v7818_v19, %v8479_v55  ;;  %6833 = vmatprep.mubr.bf16.mxu1 %v8607_v17  ;;  %6897 = vmatprep.mubr.bf16.mxu0 %v8607_v17 }
 0x167   : > { %v661_v26 = vmul.f32 %v7820_v12, %v8492_v0  ;;  %7829 = vrsqrt.f32 %v634_v22  ;;  %6848 = vmatpush3.bf16.msra.mxu1 %v7672_v39  ;;  %v703_v55 = vadd.f32 %v8574_v24, %v681_v20 }
 0x168   : > { %v8620_v14 = vpack.c.bf16 %v702_v25, %v701_v54  ;;  %v682_v15 = vmul.f32 %v8567_v6, %v660_v36  ;;  %6849 = vmatprep.subr.bf16.mxu1 %v7673_v47 }
 0x169   : > { %v7822_v28 = vpop.eup %7821  ;;  %v683_v30 = vmul.f32 %v8567_v6, %v661_v26 }
 0x16a   : > { %v7824_v29 = vpop.eup %7823  ;;  %v704_v32 = vadd.f32 %v8574_v24, %v682_v15  ;;  %v662_v0 = vmul.f32 %v7822_v28, %v8495_v1  ;;  %6834 = vmatmul.mubr.bf16.gmra.mrb[4].mxu1 %v8620_v14  ;;  %6898 = vmatmul.mubr.bf16.gmra.mrb[4].mxu0 %v8620_v14 }
 0x16b   : > { %v663_v33 = vmul.f32 %v7824_v29, %v8502_v8  ;;  %6850 = vmatpush3.bf16.msra.mxu1 %v7673_v47  ;;  %v705_v41 = vadd.f32 %v8574_v24, %v683_v30 }
 0x16c   : > { %v8633_v34 = vpack.c.bf16 %v704_v32, %v703_v55  ;;  %v684_v35 = vmul.f32 %v8567_v6, %v662_v0  ;;  %6851 = vmatprep.subr.bf16.mxu1 %v7674_v27 }
 0x16d   : > { %v7826_v23 = vpop.eup %7825  ;;  %v685_v40 = vmul.f32 %v8567_v6, %v663_v33 }
 0x16e   : > { %v7828_v1 = vpop.eup %7827  ;;  %v706_v43 = vadd.f32 %v8574_v24, %v684_v35  ;;  %v664_v8 = vmul.f32 %v7826_v23, %v8505_v9  ;;  %6837 = vmatprep.mubr.bf16.mxu1 %v8633_v34  ;;  %6901 = vmatprep.mubr.bf16.mxu0 %v8633_v34 }
 0x16f   : > { %v665_v44 = vmul.f32 %v7828_v1, %v8518_v13  ;;  %6852 = vmatpush3.bf16.msra.mxu1 %v7674_v27  ;;  %v707_v51 = vadd.f32 %v8574_v24, %v685_v40 }
 0x170   : > { %v8646_v45 = vpack.c.bf16 %v706_v43, %v705_v41  ;;  %v686_v48 = vmul.f32 %v8567_v6, %v664_v8  ;;  %6853 = vmatprep.subr.bf16.mxu1 %v7675_v37 }
 0x171   : > { %v7830_v50 = vpop.eup %7829  ;;  %v687_v31 = vmul.f32 %v8567_v6, %v665_v44 }
 0x172   : > { %v708_v9 = vadd.f32 %v8574_v24, %v686_v48  ;;  %v666_v52 = vmul.f32 %v7830_v50, %v8521_v21  ;;  %6838 = vmatmul.mubr.bf16.gmra.mrb[8].mxu1 %v8646_v45  ;;  %6902 = vmatmul.mubr.bf16.gmra.mrb[8].mxu0 %v8646_v45 }
 0x173   : > { %6854 = vmatpush3.bf16.msra.mxu1 %v7675_v37  ;;  %v709_v56 = vadd.f32 %v8574_v24, %v687_v31 }
 0x174   : > { %v8658_v13 = vpack.c.bf16 %v708_v9, %v707_v51  ;;  %v688_v38 = vmul.f32 %v8567_v6, %v666_v52  ;;  %6855 = vmatprep.subr.bf16.mxu1 %v7676_v49  ;;  %v7678_v6 = vld [vmem:[%s10453_s4 + $0x38] sm:$0xff]  }
 0x176   : > { %v710_v57 = vadd.f32 %v8574_v24, %v688_v38  ;;  %6841 = vmatprep.mubr.bf16.mxu1 %v8658_v13  ;;  %6905 = vmatprep.mubr.bf16.mxu0 %v8658_v13 }
 0x177   : > { %6856 = vmatpush3.bf16.msra.mxu1 %v7676_v49 }
 0x178   : > { %v8668_v21 = vpack.c.bf16 %v710_v57, %v709_v56  ;;  %6857 = vmatprep.subr.bf16.mxu1 %v7677_v53 }
 0x17a   : > { %6842 = vmatmul.mubr.bf16.gmra.mrb[12].mxu1 %v8668_v21  ;;  %6906 = vmatmul.mubr.bf16.gmra.mrb[12].mxu0 %v8668_v21 }
 0x17b   : > { %6858 = vmatpush3.bf16.msra.mxu1 %v7677_v53  ;;  %6861 = vmatprep.mubr.bf16.mxu1 %v8583_v42 }
 0x17c   : > { %6859 = vmatprep.subr.bf16.mxu1 %v7678_v6 }
 0x17f   : > { %6860 = vmatpush3.bf16.msra.mxu1 %v7678_v6 }
 0x182   : > { %6862 = vmatmul.mubr.bf16.vlgmr.msra.gmra.mrb[16].mxu1 %v8593_v59 }
 0x183   : > { %6865 = vmatprep.mubr.bf16.mxu1 %v8607_v17 }
 0x18a   : > { %6866 = vmatmul.mubr.bf16.gmra.mrb[20].mxu1 %v8620_v14 }
 0x18b   : > { %6869 = vmatprep.mubr.bf16.mxu1 %v8633_v34 }
 0x192   : > { %6870 = vmatmul.mubr.bf16.gmra.mrb[24].mxu1 %v8646_v45 }
 0x193   : > { %6873 = vmatprep.mubr.bf16.mxu1 %v8658_v13 }
 0x19a   : > { %6874 = vmatmul.mubr.bf16.gmra.mrb[28].mxu1 %v8668_v21 }
 0x235   : > { %v6831_v24 = vpop.f32.mrb[0].mxu1  ;;  %v6895_v58 = vpop.f32.mrb[0].mxu0 }
 0x236   : > { %v817_v60 = vpop.f32.mrb[1].mxu1  ;;  %v1155_v61 = vpop.f32.mrb[1].mxu0  ;;  %v8683_v63 = vmul.f32 0.17677669, %v6831_v24 }
 0x237   : > { %v6832_v39 = vpop.f32.mrb[2].mxu1  ;;  %v6896_v62 = vpop.f32.mrb[2].mxu0  ;;  %v880_v5 = vmul.f32 0.17677669, %v817_v60 }
 0x238   : > { %v8685_v2 = vmul.f32 0.17677669, %v6832_v39  ;;  %v1533_v3 = vpack.c.bf16 %v6896_v62, %v6895_v58  ;;  %v820_v4 = vpop.f32.mrb[3].mxu1  ;;  %v1158_v46 = vpop.f32.mrb[3].mxu0 }
 0x239   : > { %v881_v7 = vmul.f32 0.17677669, %v820_v4  ;;  %v1532_v10 = vpack.c.bf16 %v1158_v46, %v1155_v61 }
 0x23a   : > { %v1219_v11 = vpack.c.bf16 %v8685_v2, %v8683_v63  ;;  %v7683_v63 = vld [vmem:[%s10453_s4 + $0x60] sm:$0xff]   ;;  %v7684_v2 = vld [vmem:[%s10453_s4 + $0x68] sm:$0xff]  }
 0x23b   : > { %v1218_v16 = vpack.c.bf16 %v881_v7, %v880_v5  ;;  %6941 = vmatprep.subr.bf16.mxu0 %v1532_v10 }
 0x23c   : > { %6942 = vmatpush3.bf16.msra.mxu0 %v1532_v10 }
 0x23d   : > { %v6835_v18 = vpop.f32.mrb[4].mxu1  ;;  %v6899_v47 = vpop.f32.mrb[4].mxu0  ;;  %6925 = vmatprep.mubr.msk.bf16.mxu1 %vm1234_vm0, %v1218_v16  ;;  %6943 = vmatprep.subr.bf16.mxu0 %v1533_v3 }
 0x23e   : > { %v833_v19 = vpop.f32.mrb[5].mxu1  ;;  %v1171_v20 = vpop.f32.mrb[5].mxu0  ;;  %v8690_v54 = vmul.f32 0.17677669, %v6835_v18 }
 0x23f   : > { %v6836_v22 = vpop.f32.mrb[6].mxu1  ;;  %v6900_v12 = vpop.f32.mrb[6].mxu0  ;;  %v8694_v27 = vmul.f32 0.17677669, %v833_v19 }
 0x240   : > { %v8692_v25 = vmul.f32 0.17677669, %v6836_v22  ;;  %v1535_v36 = vpack.c.bf16 %v6900_v12, %v6899_v47  ;;  %v836_v26 = vpop.f32.mrb[7].mxu1  ;;  %v1174_v15 = vpop.f32.mrb[7].mxu0  ;;  %6944 = vmatpush3.bf16.msra.mxu0 %v1533_v3 }
 0x241   : > { %v8696_v28 = vmul.f32 0.17677669, %v836_v26  ;;  %v1534_v55 = vpack.c.bf16 %v1174_v15, %v1171_v20 }
 0x242   : > { %v1221_v29 = vpack.c.bf16 %v8692_v25, %v8690_v54  ;;  %v7686_v54 = vld [vmem:[%s10453_s4 + $0x78] sm:$0xff]  }
 0x243   : > { %v1220_v32 = vpack.c.bf16 %v8696_v28, %v8694_v27  ;;  %6945 = vmatprep.subr.bf16.mxu0 %v1534_v55 }
 0x244   : > { %6946 = vmatpush3.bf16.msra.mxu0 %v1534_v55 }
 0x245   : > { %v6839_v30 = vpop.f32.mrb[8].mxu1  ;;  %v6903_v0 = vpop.f32.mrb[8].mxu0  ;;  %6947 = vmatprep.subr.bf16.mxu0 %v1535_v36 }
 0x246   : > { %v849_v33 = vpop.f32.mrb[9].mxu1  ;;  %v1187_v35 = vpop.f32.mrb[9].mxu0  ;;  %v8702_v40 = vmul.f32 0.17677669, %v6839_v30 }
 0x247   : > { %v6840_v37 = vpop.f32.mrb[10].mxu1  ;;  %v6904_v23 = vpop.f32.mrb[10].mxu0  ;;  %v8706_v44 = vmul.f32 0.17677669, %v849_v33 }
 0x248   : > { %v8704_v1 = vmul.f32 0.17677669, %v6840_v37  ;;  %v1537_v41 = vpack.c.bf16 %v6904_v23, %v6903_v0  ;;  %v852_v43 = vpop.f32.mrb[11].mxu1  ;;  %v1190_v8 = vpop.f32.mrb[11].mxu0  ;;  %6948 = vmatpush3.bf16.msra.mxu0 %v1535_v36 }
 0x249   : > { %v8708_v48 = vmul.f32 0.17677669, %v852_v43  ;;  %v1536_v49 = vpack.c.bf16 %v1190_v8, %v1187_v35 }
 0x24a   : > { %v1223_v50 = vpack.c.bf16 %v8704_v1, %v8702_v40 }
 0x24b   : > { %v1222_v51 = vpack.c.bf16 %v8708_v48, %v8706_v44  ;;  %6949 = vmatprep.subr.bf16.mxu0 %v1536_v49 }
 0x24c   : > { %6950 = vmatpush3.bf16.msra.mxu0 %v1536_v49 }
 0x24d   : > { %v6843_v9 = vpop.f32.mrb[12].mxu1  ;;  %v6907_v31 = vpop.f32.mrb[12].mxu0  ;;  %6951 = vmatprep.subr.bf16.mxu0 %v1537_v41 }
 0x24e   : > { %v865_v52 = vpop.f32.mrb[13].mxu1  ;;  %v1203_v38 = vpop.f32.mrb[13].mxu0  ;;  %v8714_v57 = vmul.f32 0.17677669, %v6843_v9 }
 0x24f   : > { %v6844_v53 = vpop.f32.mrb[14].mxu1  ;;  %v6908_v56 = vpop.f32.mrb[14].mxu0  ;;  %v8718_v61 = vmul.f32 0.17677669, %v865_v52 }
 0x250   : > { %v8716_v6 = vmul.f32 0.17677669, %v6844_v53  ;;  %v1539_v24 = vpack.c.bf16 %v6908_v56, %v6907_v31  ;;  %v868_v58 = vpop.f32.mrb[15].mxu1  ;;  %v1206_v60 = vpop.f32.mrb[15].mxu0  ;;  %6952 = vmatpush3.bf16.msra.mxu0 %v1537_v41 }
 0x251   : > { %v8720_v39 = vmul.f32 0.17677669, %v868_v58  ;;  %v1538_v62 = vpack.c.bf16 %v1206_v60, %v1203_v38  ;;  %v7680_v60 = vld [vmem:[%s10453_s4 + $0x48] sm:$0xff]  }
 0x252   : > { %v1225_v3 = vpack.c.bf16 %v8716_v6, %v8714_v57 }
 0x253   : > { %v1224_v4 = vpack.c.bf16 %v8720_v39, %v8718_v61  ;;  %6953 = vmatprep.subr.bf16.mxu0 %v1538_v62 }
 0x254   : > { %6954 = vmatpush3.bf16.msra.mxu0 %v1538_v62  ;;  %v7681_v62 = vld [vmem:[%s10453_s4 + $0x50] sm:$0xff]  }
 0x255   : > { %v6863_v46 = vpop.f32.mrb[16].mxu1  ;;  %6955 = vmatprep.subr.bf16.mxu0 %v1539_v24 }
 0x256   : > { %v994_v5 = vpop.f32.mrb[17].mxu1 }
 0x257   : > { %v6864_v7 = vpop.f32.mrb[18].mxu1 }
 0x258   : > { %v1227_v10 = vpack.c.bf16 %v6864_v7, %v6863_v46  ;;  %v997_v16 = vpop.f32.mrb[19].mxu1  ;;  %6956 = vmatpush3.bf16.msra.mxu0 %v1539_v24  ;;  %v7679_v24 = vld [vmem:[%s10453_s4 + $0x40] sm:$0xff]   ;;  %v7682_v46 = vld [vmem:[%s10453_s4 + $0x58] sm:$0xff]  }
 0x259   : > { %v1226_v18 = vpack.c.bf16 %v997_v16, %v994_v5 }
 0x25a   : > { %v1263_v15 = vsel %vm1234_vm0, %v1227_v10, 0 }
 0x25b   : > { %v1260_v47 = vsel %vm1234_vm0, %v1226_v18, 0  ;;  %7581 = vmatprep.subr.msk.bf16.mxu1 %vm1234_vm0, %v1226_v18 }
 0x25c   : > { %6910 = vmatpush3.bf16.xpose.msra.mxu1 %v1260_v47 }
 0x25d   : > { %v6867_v19 = vpop.f32.mrb[20].mxu1  ;;  %7582 = vmatprep.subr.msk.bf16.mxu1 %vm1234_vm0, %v1227_v10 }
 0x25e   : > { %v1010_v20 = vpop.f32.mrb[21].mxu1 }
 0x25f   : > { %v6868_v22 = vpop.f32.mrb[22].mxu1 }
 0x260   : > { %v1229_v12 = vpack.c.bf16 %v6868_v22, %v6867_v19  ;;  %v1013_v36 = vpop.f32.mrb[23].mxu1 }
 0x261   : > { %v1228_v26 = vpack.c.bf16 %v1013_v36, %v1010_v20 }
 0x262   : > { %v1269_v52 = vsel %vm1234_vm0, %v1229_v12, 0 }
 0x263   : > { %v1266_v23 = vsel %vm1234_vm0, %v1228_v26, 0 }
 0x264   : > { %6912 = vmatpush3.bf16.xpose.msra.mxu1 %v1263_v15 }
 0x265   : > { %v6871_v55 = vpop.f32.mrb[24].mxu1  ;;  %7583 = vmatprep.subr.msk.bf16.mxu1 %vm1234_vm0, %v1228_v26 }
 0x266   : > { %v1026_v30 = vpop.f32.mrb[25].mxu1 }
 0x267   : > { %v6872_v0 = vpop.f32.mrb[26].mxu1 }
 0x268   : > { %v1231_v33 = vpack.c.bf16 %v6872_v0, %v6871_v55  ;;  %v1029_v35 = vpop.f32.mrb[27].mxu1 }
 0x269   : > { %v1230_v37 = vpack.c.bf16 %v1029_v35, %v1026_v30 }
 0x26a   : > { %v1275_v53 = vsel %vm1234_vm0, %v1231_v33, 0 }
 0x26b   : > { %v1272_v38 = vsel %vm1234_vm0, %v1230_v37, 0 }
 0x26c   : > { %6914 = vmatpush3.bf16.xpose.msra.mxu1 %v1266_v23 }
 0x26d   : > { %v6875_v41 = vpop.f32.mrb[28].mxu1  ;;  %7584 = vmatprep.subr.msk.bf16.mxu1 %vm1234_vm0, %v1229_v12 }
 0x26e   : > { %v1042_v43 = vpop.f32.mrb[29].mxu1 }
 0x26f   : > { %v6876_v8 = vpop.f32.mrb[30].mxu1 }
 0x270   : > { %v1233_v49 = vpack.c.bf16 %v6876_v8, %v6875_v41  ;;  %v1045_v9 = vpop.f32.mrb[31].mxu1 }
 0x271   : > { %v1232_v31 = vpack.c.bf16 %v1045_v9, %v1042_v43 }
 0x272   : > { %v1281_v58 = vsel %vm1234_vm0, %v1233_v49, 0 }
 0x273   : > { %v1278_v56 = vsel %vm1234_vm0, %v1232_v31, 0 }
 0x274   : > { %6916 = vmatpush3.bf16.xpose.msra.mxu1 %v1269_v52 }
 0x275   : > { %7585 = vmatprep.subr.msk.bf16.mxu1 %vm1234_vm0, %v1230_v37 }
 0x27c   : > { %6918 = vmatpush3.bf16.xpose.msra.mxu1 %v1272_v38 }
 0x27d   : > { %7586 = vmatprep.subr.msk.bf16.mxu1 %vm1234_vm0, %v1231_v33 }
 0x284   : > { %6920 = vmatpush3.bf16.xpose.msra.mxu1 %v1275_v53 }
 0x285   : > { %7587 = vmatprep.subr.msk.bf16.mxu1 %vm1234_vm0, %v1232_v31 }
 0x28c   : > { %6922 = vmatpush3.bf16.xpose.msra.mxu1 %v1278_v56 }
 0x28d   : > { %7588 = vmatprep.subr.msk.bf16.mxu1 %vm1234_vm0, %v1233_v49 }
 0x294   : > { %6924 = vmatpush3.bf16.xpose.msra.mxu1 %v1281_v58 }
 0x295   : > { %7005 = vmatprep.subr.bf16.mxu1 %v7679_v24 }
 0x29b   : > { %6926 = vmatmul.mubr.msk.bf16.vlgmr.msra.gmra.mrb[32].mxu1 %vm1234_vm0, %v1219_v11  ;;  %v7685_v11 = vld [vmem:[%s10453_s4 + $0x70] sm:$0xff]  }
 0x29c   : > { %6929 = vmatprep.mubr.msk.bf16.mxu1 %vm1234_vm0, %v1220_v32  ;;  %7006 = vmatpush3.bf16.msra.mxu1 %v7679_v24 }
 0x29d   : > { %7007 = vmatprep.subr.bf16.mxu1 %v7680_v60 }
 0x2a0   : > { %7008 = vmatpush3.bf16.msra.mxu1 %v7680_v60 }
 0x2a1   : > { %7009 = vmatprep.subr.bf16.mxu1 %v7681_v62 }
 0x2a3   : > { %6930 = vmatmul.mubr.msk.bf16.gmra.mrb[36].mxu1 %vm1234_vm0, %v1221_v29 }
 0x2a4   : > { %6933 = vmatprep.mubr.msk.bf16.mxu1 %vm1234_vm0, %v1222_v51  ;;  %7010 = vmatpush3.bf16.msra.mxu1 %v7681_v62 }
 0x2a5   : > { %7011 = vmatprep.subr.bf16.mxu1 %v7682_v46 }
 0x2a8   : > { %7012 = vmatpush3.bf16.msra.mxu1 %v7682_v46 }
 0x2a9   : > { %7013 = vmatprep.subr.bf16.mxu1 %v7683_v63 }
 0x2ab   : > { %6934 = vmatmul.mubr.msk.bf16.gmra.mrb[40].mxu1 %vm1234_vm0, %v1223_v50 }
 0x2ac   : > { %6937 = vmatprep.mubr.msk.bf16.mxu1 %vm1234_vm0, %v1224_v4  ;;  %7014 = vmatpush3.bf16.msra.mxu1 %v7683_v63 }
 0x2ad   : > { %7015 = vmatprep.subr.bf16.mxu1 %v7684_v2 }
 0x2b0   : > { %7016 = vmatpush3.bf16.msra.mxu1 %v7684_v2 }
 0x2b1   : > { %7017 = vmatprep.subr.bf16.mxu1 %v7685_v11 }
 0x2b3   : > { %6938 = vmatmul.mubr.msk.bf16.gmra.mrb[44].mxu1 %vm1234_vm0, %v1225_v3 }
 0x2b4   : > { %7018 = vmatpush3.bf16.msra.mxu1 %v7685_v11  ;;  %7021 = vmatprep.mubr.bf16.mxu1 %v8583_v42 }
 0x2b5   : > { %7019 = vmatprep.subr.bf16.mxu1 %v7686_v54 }
 0x2b8   : > { %7020 = vmatpush3.bf16.msra.mxu1 %v7686_v54 }
 0x2bb   : > { %7022 = vmatmul.mubr.bf16.vlgmr.msra.gmra.mrb[48].mxu1 %v8593_v59 }
 0x2bc   : > { %7025 = vmatprep.mubr.bf16.mxu1 %v8607_v17 }
 0x2c3   : > { %7026 = vmatmul.mubr.bf16.gmra.mrb[52].mxu1 %v8620_v14 }
 0x2c4   : > { %7029 = vmatprep.mubr.bf16.mxu1 %v8633_v34 }
 0x2cb   : > { %7030 = vmatmul.mubr.bf16.gmra.mrb[56].mxu1 %v8646_v45 }
 0x2cc   : > { %7033 = vmatprep.mubr.bf16.mxu1 %v8658_v13 }
 0x2d3   : > { %7034 = vmatmul.mubr.bf16.gmra.mrb[60].mxu1 %v8668_v21 }
 0x36e   : > { %v8802_v25 = vpop.f32.mrb[32].mxu1 }
 0x36f   : > { %v8804_v27 = vpop.f32.mrb[33].mxu1 }
 0x370   : > { %1380 = vmax.xlane.f32.xlu0 %v8804_v27  ;;  %v8807_v28 = vpop.f32.mrb[34].mxu1 }
 0x371   : > { %v8809_v29 = vpop.f32.mrb[35].mxu1 }
 0x372   : > { %1382 = vmax.xlane.f32.xlu1 %v8809_v29 }
 0x374   : > { %1384 = vmax.xlane.f32.xlu0 %v8802_v25 }
 0x376   : > { %1386 = vmax.xlane.f32.xlu1 %v8807_v28  ;;  %v8814_v32 = vpop.f32.mrb[36].mxu1 }
 0x377   : > { %v8816_v40 = vpop.f32.mrb[37].mxu1 }
 0x378   : > { %1388 = vmax.xlane.f32.xlu0 %v8816_v40  ;;  %v8819_v1 = vpop.f32.mrb[38].mxu1 }
 0x379   : > { %v8821_v44 = vpop.f32.mrb[39].mxu1 }
 0x37a   : > { %1390 = vmax.xlane.f32.xlu1 %v8821_v44 }
 0x37c   : > { %1392 = vmax.xlane.f32.xlu0 %v8814_v32 }
 0x37e   : > { %1394 = vmax.xlane.f32.xlu1 %v8819_v1  ;;  %v8826_v48 = vpop.f32.mrb[40].mxu1 }
 0x37f   : > { %v8828_v50 = vpop.f32.mrb[41].mxu1 }
 0x380   : > { %1396 = vmax.xlane.f32.xlu0 %v8828_v50  ;;  %v8831_v51 = vpop.f32.mrb[42].mxu1 }
 0x381   : > { %v8833_v57 = vpop.f32.mrb[43].mxu1 }
 0x382   : > { %1398 = vmax.xlane.f32.xlu1 %v8833_v57 }
 0x384   : > { %1400 = vmax.xlane.f32.xlu0 %v8826_v48 }
 0x386   : > { %1402 = vmax.xlane.f32.xlu1 %v8831_v51  ;;  %v8838_v6 = vpop.f32.mrb[44].mxu1 }
 0x387   : > { %v8840_v61 = vpop.f32.mrb[45].mxu1 }
 0x388   : > { %1404 = vmax.xlane.f32.xlu0 %v8840_v61  ;;  %v8843_v39 = vpop.f32.mrb[46].mxu1 }
 0x389   : > { %v8845_v3 = vpop.f32.mrb[47].mxu1 }
 0x38a   : > { %1406 = vmax.xlane.f32.xlu1 %v8845_v3 }
 0x38c   : > { %1408 = vmax.xlane.f32.xlu0 %v8838_v6 }
 0x38e   : > { %1410 = vmax.xlane.f32.xlu1 %v8843_v39  ;;  %v7023_v4 = vpop.f32.mrb[48].mxu1 }
 0x38f   : > { %v1926_v5 = vpop.f32.mrb[49].mxu1 }
 0x390   : > { %v7024_v7 = vpop.f32.mrb[50].mxu1 }
 0x391   : > { %v2160_v10 = vpack.c.bf16 %v7024_v7, %v7023_v4  ;;  %v1929_v16 = vpop.f32.mrb[51].mxu1 }
 0x392   : > { %v2159_v18 = vpack.c.bf16 %v1929_v16, %v1926_v5 }
 0x393   : > { %v2195_v15 = vsel %vm1234_vm0, %v2160_v10, 0 }
 0x394   : > { %v2192_v47 = vsel %vm1234_vm0, %v2159_v18, 0  ;;  %7589 = vmatprep.subr.msk.bf16.mxu1 %vm1234_vm0, %v2159_v18 }
 0x395   : > { %7070 = vmatpush3.bf16.xpose.msra.mxu1 %v2192_v47 }
 0x396   : > { %v7027_v19 = vpop.f32.mrb[52].mxu1  ;;  %7590 = vmatprep.subr.msk.bf16.mxu1 %vm1234_vm0, %v2160_v10 }
 0x397   : > { %v1942_v20 = vpop.f32.mrb[53].mxu1 }
 0x398   : > { %v7028_v22 = vpop.f32.mrb[54].mxu1 }
 0x399   : > { %v2162_v12 = vpack.c.bf16 %v7028_v22, %v7027_v19  ;;  %v1945_v36 = vpop.f32.mrb[55].mxu1 }
 0x39a   : > { %v2161_v26 = vpack.c.bf16 %v1945_v36, %v1942_v20 }
 0x39b   : > { %v2201_v52 = vsel %vm1234_vm0, %v2162_v12, 0 }
 0x39c   : > { %v2198_v23 = vsel %vm1234_vm0, %v2161_v26, 0 }
 0x39d   : > { %7072 = vmatpush3.bf16.xpose.msra.mxu1 %v2195_v15 }
 0x39e   : > { %v7031_v55 = vpop.f32.mrb[56].mxu1  ;;  %7591 = vmatprep.subr.msk.bf16.mxu1 %vm1234_vm0, %v2161_v26 }
 0x39f   : > { %v1958_v30 = vpop.f32.mrb[57].mxu1 }
 0x3a0   : > { %v7032_v0 = vpop.f32.mrb[58].mxu1 }
 0x3a1   : > { %v2164_v33 = vpack.c.bf16 %v7032_v0, %v7031_v55  ;;  %v1961_v35 = vpop.f32.mrb[59].mxu1 }
 0x3a2   : > { %v2163_v37 = vpack.c.bf16 %v1961_v35, %v1958_v30 }
 0x3a3   : > { %v2207_v53 = vsel %vm1234_vm0, %v2164_v33, 0 }
 0x3a4   : > { %v2204_v38 = vsel %vm1234_vm0, %v2163_v37, 0 }
 0x3a5   : > { %7074 = vmatpush3.bf16.xpose.msra.mxu1 %v2198_v23 }
 0x3a6   : > { %v7035_v41 = vpop.f32.mrb[60].mxu1  ;;  %7592 = vmatprep.subr.msk.bf16.mxu1 %vm1234_vm0, %v2162_v12 }
 0x3a7   : > { %v1974_v43 = vpop.f32.mrb[61].mxu1 }
 0x3a8   : > { %v7036_v8 = vpop.f32.mrb[62].mxu1 }
 0x3a9   : > { %v2166_v49 = vpack.c.bf16 %v7036_v8, %v7035_v41  ;;  %v1977_v9 = vpop.f32.mrb[63].mxu1 }
 0x3aa   : > { %v2165_v31 = vpack.c.bf16 %v1977_v9, %v1974_v43 }
 0x3ab   : > { %v2213_v24 = vsel %vm1234_vm0, %v2166_v49, 0 }
 0x3ac   : > { %v2210_v56 = vsel %vm1234_vm0, %v2165_v31, 0 }
 0x3ad   : > { %7076 = vmatpush3.bf16.xpose.msra.mxu1 %v2201_v52 }
 0x3ae   : > { %7593 = vmatprep.subr.msk.bf16.mxu1 %vm1234_vm0, %v2163_v37 }
 0x3b5   : > { %7078 = vmatpush3.bf16.xpose.msra.mxu1 %v2204_v38 }
 0x3b6   : > { %7594 = vmatprep.subr.msk.bf16.mxu1 %vm1234_vm0, %v2164_v33 }
 0x3bd   : > { %7080 = vmatpush3.bf16.xpose.msra.mxu1 %v2207_v53 }
 0x3be   : > { %7595 = vmatprep.subr.msk.bf16.mxu1 %vm1234_vm0, %v2165_v31 }
 0x3c5   : > { %7082 = vmatpush3.bf16.xpose.msra.mxu1 %v2210_v56 }
 0x3c6   : > { %7596 = vmatprep.subr.msk.bf16.mxu1 %vm1234_vm0, %v2166_v49 }
 0x3cd   : > { %7084 = vmatpush3.bf16.xpose.msra.mxu1 %v2213_v24 }
 0x3fd   : > { %v1381_v58 = vpop.xlane.xlu0 %1380 }
 0x3fe   : > { %v1412_v60 = vsub.f32 %v8804_v27, %v1381_v58 }
 0x3ff   : > { %v1383_v62 = vpop.xlane.xlu1 %1382 }
 0x400   : > { %v1428_v46 = vmul.f32 1.442695, %v1412_v60  ;;  %v1413_v63 = vsub.f32 %v8809_v29, %v1383_v62 }
 0x401   : > { %v1385_v2 = vpop.xlane.xlu0 %1384 }
 0x402   : > { %7831 = vpow2.f32 %v1428_v46  ;;  %v1430_v11 = vmul.f32 1.442695, %v1413_v63  ;;  %v1414_v54 = vsub.f32 %v8802_v25, %v1385_v2 }
 0x403   : > { %v1387_v4 = vpop.xlane.xlu1 %1386 }
 0x404   : > { %7833 = vpow2.f32 %v1430_v11  ;;  %v1432_v5 = vmul.f32 1.442695, %v1414_v54  ;;  %v1415_v7 = vsub.f32 %v8807_v28, %v1387_v4  ;;  %v7687_v4 = vld [vmem:[%s10452_s3 + $0x40] sm:$0xff]  }
 0x405   : > { %v1389_v10 = vpop.xlane.xlu0 %1388  ;;  %6973 = vmatprep.subr.bf16.mxu0 %v7687_v4 }
 0x406   : > { %7835 = vpow2.f32 %v1432_v5  ;;  %v1434_v16 = vmul.f32 1.442695, %v1415_v7  ;;  %v1416_v18 = vsub.f32 %v8816_v40, %v1389_v10 }
 0x407   : > { %v1391_v27 = vpop.xlane.xlu1 %1390 }
 0x408   : > { %7837 = vpow2.f32 %v1434_v16  ;;  %v1436_v47 = vmul.f32 1.442695, %v1416_v18  ;;  %v1417_v29 = vsub.f32 %v8821_v44, %v1391_v27 }
 0x409   : > { %v1393_v19 = vpop.xlane.xlu0 %1392 }
 0x40a   : > { %7839 = vpow2.f32 %v1436_v47  ;;  %v1438_v20 = vmul.f32 1.442695, %v1417_v29  ;;  %v1418_v25 = vsub.f32 %v8814_v32, %v1393_v19 }
 0x40b   : > { %v1395_v22 = vpop.xlane.xlu1 %1394 }
 0x40c   : > { %v8873_v12 = vpop.eup %7831  ;;  %7841 = vpow2.f32 %v1438_v20  ;;  %v1440_v28 = vmul.f32 1.442695, %v1418_v25  ;;  %v1419_v36 = vsub.f32 %v8819_v1, %v1395_v22 }
 0x40d   : > { %v1397_v26 = vpop.xlane.xlu0 %1396  ;;  %1460 = vadd.xlane.f32.xlu0 %v8873_v12 }
 0x40e   : > { %v8877_v40 = vpop.eup %7833  ;;  %7843 = vpow2.f32 %v1440_v28  ;;  %v1442_v15 = vmul.f32 1.442695, %v1419_v36  ;;  %v1420_v44 = vsub.f32 %v8828_v50, %v1397_v26 }
 0x40f   : > { %v1399_v55 = vpop.xlane.xlu1 %1398  ;;  %1462 = vadd.xlane.f32.xlu1 %v8877_v40 }
 0x410   : > { %v8881_v32 = vpop.eup %7835  ;;  %7845 = vpow2.f32 %v1442_v15  ;;  %v1444_v30 = vmul.f32 1.442695, %v1420_v44  ;;  %v1421_v0 = vsub.f32 %v8833_v57, %v1399_v55 }
 0x411   : > { %v1401_v33 = vpop.xlane.xlu0 %1400  ;;  %1464 = vadd.xlane.f32.xlu0 %v8881_v32 }
 0x412   : > { %v8885_v1 = vpop.eup %7837  ;;  %7847 = vpow2.f32 %v1444_v30  ;;  %v1446_v35 = vmul.f32 1.442695, %v1421_v0  ;;  %v1422_v37 = vsub.f32 %v8826_v48, %v1401_v33 }
 0x413   : > { %v1403_v23 = vpop.xlane.xlu1 %1402  ;;  %1466 = vadd.xlane.f32.xlu1 %v8885_v1 }
 0x414   : > { %v8889_v50 = vpop.eup %7839  ;;  %7849 = vpow2.f32 %v1446_v35  ;;  %v1448_v41 = vmul.f32 1.442695, %v1422_v37  ;;  %v1423_v43 = vsub.f32 %v8831_v51, %v1403_v23 }
 0x415   : > { %1468 = vadd.xlane.f32.xlu0 %v8889_v50  ;;  %v1405_v57 = vpop.xlane.xlu0 %1404 }
 0x416   : > { %v8893_v8 = vpop.eup %7841  ;;  %7851 = vpow2.f32 %v1448_v41  ;;  %v1450_v49 = vmul.f32 1.442695, %v1423_v43  ;;  %v1424_v9 = vsub.f32 %v8840_v61, %v1405_v57  ;;  %v7689_v57 = vld [vmem:[%s10452_s3 + $0x50] sm:$0xff]  }
 0x417   : > { %1470 = vadd.xlane.f32.xlu1 %v8893_v8  ;;  %v1407_v48 = vpop.xlane.xlu1 %1406 }
 0x418   : > { %v8897_v31 = vpop.eup %7843  ;;  %7853 = vpow2.f32 %v1450_v49  ;;  %v1452_v52 = vmul.f32 1.442695, %v1424_v9  ;;  %v1425_v38 = vsub.f32 %v8845_v3, %v1407_v48 }
 0x419   : > { %1472 = vadd.xlane.f32.xlu0 %v8897_v31  ;;  %v1409_v51 = vpop.xlane.xlu0 %1408 }
 0x41a   : > { %v8901_v53 = vpop.eup %7845  ;;  %7855 = vpow2.f32 %v1452_v52  ;;  %v1454_v56 = vmul.f32 1.442695, %v1425_v38  ;;  %v1426_v24 = vsub.f32 %v8838_v6, %v1409_v51  ;;  %v7690_v51 = vld [vmem:[%s10452_s3 + $0x58] sm:$0xff]  }
 0x41b   : > { %1474 = vadd.xlane.f32.xlu1 %v8901_v53  ;;  %v1411_v61 = vpop.xlane.xlu1 %1410 }
 0x41c   : > { %v8905_v58 = vpop.eup %7847  ;;  %7857 = vpow2.f32 %v1454_v56  ;;  %v1456_v60 = vmul.f32 1.442695, %v1426_v24  ;;  %v1427_v62 = vsub.f32 %v8843_v39, %v1411_v61 }
 0x41d   : > { %1476 = vadd.xlane.f32.xlu0 %v8905_v58 }
 0x41e   : > { %v8909_v3 = vpop.eup %7849  ;;  %7859 = vpow2.f32 %v1456_v60  ;;  %v1458_v46 = vmul.f32 1.442695, %v1427_v62  ;;  %v7691_v62 = vld [vmem:[%s10452_s3 + $0x60] sm:$0xff]  }
 0x41f   : > { %1478 = vadd.xlane.f32.xlu1 %v8909_v3 }
 0x420   : > { %v8912_v63 = vpop.eup %7851  ;;  %7861 = vpow2.f32 %v1458_v46 }
 0x421   : > { %1480 = vadd.xlane.f32.xlu0 %v8912_v63 }
 0x422   : > { %v8915_v6 = vpop.eup %7853 }
 0x423   : > { %1482 = vadd.xlane.f32.xlu1 %v8915_v6 }
 0x424   : > { %v8918_v2 = vpop.eup %7855 }
 0x425   : > { %1484 = vadd.xlane.f32.xlu0 %v8918_v2 }
 0x426   : > { %v8921_v39 = vpop.eup %7857 }
 0x427   : > { %1486 = vadd.xlane.f32.xlu1 %v8921_v39 }
 0x428   : > { %v8924_v11 = vpop.eup %7859 }
 0x429   : > { %1488 = vadd.xlane.f32.xlu0 %v8924_v11 }
 0x42a   : > { %v8927_v54 = vpop.eup %7861 }
 0x42b   : > { %1490 = vadd.xlane.f32.xlu1 %v8927_v54 }
 0x49a   : > { %v1461_v5 = vpop.xlane.xlu0 %1460 }
 0x49b   : > { %7863 = vrcp.f32 %v1461_v5 }
 0x49c   : > { %v1463_v7 = vpop.xlane.xlu1 %1462 }
 0x49d   : > { %7865 = vrcp.f32 %v1463_v7 }
 0x49e   : > { %v1465_v10 = vpop.xlane.xlu0 %1464 }
 0x49f   : > { %7867 = vrcp.f32 %v1465_v10 }
 0x4a0   : > { %v1467_v16 = vpop.xlane.xlu1 %1466 }
 0x4a1   : > { %7869 = vrcp.f32 %v1467_v16 }
 0x4a2   : > { %v1469_v18 = vpop.xlane.xlu0 %1468 }
 0x4a3   : > { %7871 = vrcp.f32 %v1469_v18 }
 0x4a4   : > { %v1471_v27 = vpop.xlane.xlu1 %1470 }
 0x4a5   : > { %v7864_v47 = vpop.eup %7863  ;;  %7873 = vrcp.f32 %v1471_v27 }
 0x4a6   : > { %v1473_v29 = vpop.xlane.xlu0 %1472  ;;  %v1508_v25 = vmul.f32 %v7864_v47, %v8873_v12  ;;  %v7688_v12 = vld [vmem:[%s10452_s3 + $0x48] sm:$0xff]  }
 0x4a7   : > { %v7866_v19 = vpop.eup %7865  ;;  %7875 = vrcp.f32 %v1473_v29 }
 0x4a8   : > { %v1475_v20 = vpop.xlane.xlu1 %1474  ;;  %v1509_v22 = vmul.f32 %v7866_v19, %v8877_v40 }
 0x4a9   : > { %v7868_v28 = vpop.eup %7867  ;;  %7877 = vrcp.f32 %v1475_v20 }
 0x4aa   : > { %v1477_v36 = vpop.xlane.xlu0 %1476  ;;  %v1524_v26 = vpack.c.bf16 %v1509_v22, %v1508_v25  ;;  %v1510_v44 = vmul.f32 %v7868_v28, %v8881_v32  ;;  %v7698_v25 = vld [vmem:[%s10454_s5 + $0x58] sm:$0xff]   ;;  %v7699_v22 = vld [vmem:[%s10454_s5 + $0x60] sm:$0xff]   ;;  %v7700_v28 = vld [vmem:[%s10454_s5 + $0x68] sm:$0xff]  }
 0x4ab   : > { %v7870_v15 = vpop.eup %7869  ;;  %7879 = vrcp.f32 %v1477_v36  ;;  %v7701_v36 = vld [vmem:[%s10454_s5 + $0x70] sm:$0xff]  }
 0x4ac   : > { %v1511_v55 = vmul.f32 %v7870_v15, %v8885_v1  ;;  %6957 = vmatprep.mubr.bf16.mxu0 %v1524_v26  ;;  %v1479_v30 = vpop.xlane.xlu1 %1478  ;;  %v7702_v26 = vld [vmem:[%s10454_s5 + $0x78] sm:$0xff]   ;;  %v7703_v15 = vld [vmem:[%s10452_s3 + $0x80] sm:$0xff]  }
 0x4ad   : > { %v7872_v0 = vpop.eup %7871  ;;  %7881 = vrcp.f32 %v1479_v30  ;;  %7173 = vmatprep.subr.bf16.mxu1 %v7703_v15 }
 0x4ae   : > { %v1481_v33 = vpop.xlane.xlu0 %1480  ;;  %v1525_v35 = vpack.c.bf16 %v1511_v55, %v1510_v44  ;;  %v1512_v23 = vmul.f32 %v7872_v0, %v8889_v50 }
 0x4af   : > { %v7874_v40 = vpop.eup %7873  ;;  %7883 = vrcp.f32 %v1481_v33 }
 0x4b0   : > { %6958 = vmatmul.mubr.bf16.vlgmr.msra.gmra.mrb[16].mxu0 %v1525_v35  ;;  %v1483_v37 = vpop.xlane.xlu1 %1482  ;;  %v1513_v32 = vmul.f32 %v7874_v40, %v8893_v8 }
 0x4b1   : > { %v7876_v41 = vpop.eup %7875  ;;  %7885 = vrcp.f32 %v1483_v37  ;;  %6974 = vmatpush3.bf16.msra.mxu0 %v7687_v4 }
 0x4b2   : > { %v1485_v1 = vpop.xlane.xlu0 %1484  ;;  %v1526_v43 = vpack.c.bf16 %v1513_v32, %v1512_v23  ;;  %6975 = vmatprep.subr.bf16.mxu0 %v7688_v12  ;;  %v1514_v48 = vmul.f32 %v7876_v41, %v8897_v31 }
 0x4b3   : > { %v7878_v49 = vpop.eup %7877  ;;  %7887 = vrcp.f32 %v1485_v1 }
 0x4b4   : > { %6961 = vmatprep.mubr.bf16.mxu0 %v1526_v43  ;;  %v1487_v9 = vpop.xlane.xlu1 %1486  ;;  %v1515_v50 = vmul.f32 %v7878_v49, %v8901_v53 }
 0x4b5   : > { %v7880_v52 = vpop.eup %7879  ;;  %7889 = vrcp.f32 %v1487_v9  ;;  %6976 = vmatpush3.bf16.msra.mxu0 %v7688_v12 }
 0x4b6   : > { %v1489_v8 = vpop.xlane.xlu0 %1488  ;;  %v1527_v38 = vpack.c.bf16 %v1515_v50, %v1514_v48  ;;  %6977 = vmatprep.subr.bf16.mxu0 %v7689_v57  ;;  %v1516_v61 = vmul.f32 %v7880_v52, %v8905_v58 }
 0x4b7   : > { %v7882_v56 = vpop.eup %7881  ;;  %7891 = vrcp.f32 %v1489_v8 }
 0x4b8   : > { %6962 = vmatmul.mubr.bf16.gmra.mrb[20].mxu0 %v1527_v38  ;;  %v1491_v24 = vpop.xlane.xlu1 %1490  ;;  %v1517_v31 = vmul.f32 %v7882_v56, %v8909_v3  ;;  %v7692_v3 = vld [vmem:[%s10452_s3 + $0x68] sm:$0xff]  }
 0x4b9   : > { %v7884_v60 = vpop.eup %7883  ;;  %7893 = vrcp.f32 %v1491_v24  ;;  %6978 = vmatpush3.bf16.msra.mxu0 %v7689_v57 }
 0x4ba   : > { %v1528_v53 = vpack.c.bf16 %v1517_v31, %v1516_v61  ;;  %6979 = vmatprep.subr.bf16.mxu0 %v7690_v51  ;;  %v1518_v4 = vmul.f32 %v7884_v60, %v8912_v63  ;;  %v7693_v63 = vld [vmem:[%s10452_s3 + $0x70] sm:$0xff]  }
 0x4bb   : > { %v7886_v46 = vpop.eup %7885 }
 0x4bc   : > { %6965 = vmatprep.mubr.bf16.mxu0 %v1528_v53  ;;  %v1519_v5 = vmul.f32 %v7886_v46, %v8915_v6 }
 0x4bd   : > { %v7888_v7 = vpop.eup %7887  ;;  %6980 = vmatpush3.bf16.msra.mxu0 %v7690_v51 }
 0x4be   : > { %v1529_v58 = vpack.c.bf16 %v1519_v5, %v1518_v4  ;;  %6981 = vmatprep.subr.bf16.mxu0 %v7691_v62  ;;  %v1520_v16 = vmul.f32 %v7888_v7, %v8918_v2  ;;  %v7694_v2 = vld [vmem:[%s10452_s3 + $0x78] sm:$0xff]  }
 0x4bf   : > { %v7890_v10 = vpop.eup %7889 }
 0x4c0   : > { %6966 = vmatmul.mubr.bf16.gmra.mrb[24].mxu0 %v1529_v58  ;;  %v1521_v18 = vmul.f32 %v7890_v10, %v8921_v39  ;;  %v7695_v39 = vld [vmem:[%s10454_s5 + $0x40] sm:$0xff]   ;;  %v7704_v58 = vld [vmem:[%s10452_s3 + $0x88] sm:$0xff]  }
 0x4c1   : > { %v7892_v27 = vpop.eup %7891  ;;  %6982 = vmatpush3.bf16.msra.mxu0 %v7691_v62 }
 0x4c2   : > { %v1530_v47 = vpack.c.bf16 %v1521_v18, %v1520_v16  ;;  %6983 = vmatprep.subr.bf16.mxu0 %v7692_v3  ;;  %v1522_v29 = vmul.f32 %v7892_v27, %v8924_v11  ;;  %v7696_v11 = vld [vmem:[%s10454_s5 + $0x48] sm:$0xff]  }
 0x4c3   : > { %v7894_v6 = vpop.eup %7893 }
 0x4c4   : > { %6969 = vmatprep.mubr.bf16.mxu0 %v1530_v47  ;;  %v1523_v19 = vmul.f32 %v7894_v6, %v8927_v54  ;;  %v7697_v54 = vld [vmem:[%s10454_s5 + $0x50] sm:$0xff]  }
 0x4c5   : > { %6984 = vmatpush3.bf16.msra.mxu0 %v7692_v3 }
 0x4c6   : > { %v1531_v20 = vpack.c.bf16 %v1523_v19, %v1522_v29  ;;  %6985 = vmatprep.subr.bf16.mxu0 %v7693_v63 }
 0x4c8   : > { %6970 = vmatmul.mubr.bf16.gmra.mrb[28].mxu0 %v1531_v20 }
 0x4c9   : > { %6986 = vmatpush3.bf16.msra.mxu0 %v7693_v63  ;;  %6989 = vmatprep.mubr.bf16.mxu0 %v8583_v42  ;;  %v7705_v63 = vld [vmem:[%s10452_s3 + $0x90] sm:$0xff]  }
 0x4ca   : > { %6987 = vmatprep.subr.bf16.mxu0 %v7694_v2 }
 0x4cd   : > { %6988 = vmatpush3.bf16.msra.mxu0 %v7694_v2  ;;  %v7706_v2 = vld [vmem:[%s10452_s3 + $0x98] sm:$0xff]  }
 0x4ce   : > { %7037 = vmatprep.subr.bf16.mxu0 %v7695_v39 }
 0x4d0   : > { %6990 = vmatmul.mubr.bf16.vlgmr.msra.gmra.mrb[32].mxu0 %v8593_v59 }
 0x4d1   : > { %6993 = vmatprep.mubr.bf16.mxu0 %v8607_v17  ;;  %7038 = vmatpush3.bf16.msra.mxu0 %v7695_v39 }
 0x4d2   : > { %7039 = vmatprep.subr.bf16.mxu0 %v7696_v11 }
 0x4d5   : > { %7040 = vmatpush3.bf16.msra.mxu0 %v7696_v11 }
 0x4d6   : > { %7041 = vmatprep.subr.bf16.mxu0 %v7697_v54 }
 0x4d8   : > { %6994 = vmatmul.mubr.bf16.gmra.mrb[36].mxu0 %v8620_v14 }
 0x4d9   : > { %6997 = vmatprep.mubr.bf16.mxu0 %v8633_v34  ;;  %7042 = vmatpush3.bf16.msra.mxu0 %v7697_v54 }
 0x4da   : > { %7043 = vmatprep.subr.bf16.mxu0 %v7698_v25 }
 0x4dd   : > { %7044 = vmatpush3.bf16.msra.mxu0 %v7698_v25 }
 0x4de   : > { %7045 = vmatprep.subr.bf16.mxu0 %v7699_v22 }
 0x4e0   : > { %6998 = vmatmul.mubr.bf16.gmra.mrb[40].mxu0 %v8646_v45 }
 0x4e1   : > { %7001 = vmatprep.mubr.bf16.mxu0 %v8658_v13  ;;  %7046 = vmatpush3.bf16.msra.mxu0 %v7699_v22 }
 0x4e2   : > { %7047 = vmatprep.subr.bf16.mxu0 %v7700_v28 }
 0x4e5   : > { %7048 = vmatpush3.bf16.msra.mxu0 %v7700_v28 }
 0x4e6   : > { %7049 = vmatprep.subr.bf16.mxu0 %v7701_v36 }
 0x4e8   : > { %7002 = vmatmul.mubr.bf16.gmra.mrb[44].mxu0 %v8668_v21 }
 0x4e9   : > { %7050 = vmatpush3.bf16.msra.mxu0 %v7701_v36  ;;  %7053 = vmatprep.mubr.bf16.mxu0 %v8583_v42  ;;  %v7707_v36 = vld [vmem:[%s10452_s3 + $0xa0] sm:$0xff]  }
 0x4ea   : > { %7051 = vmatprep.subr.bf16.mxu0 %v7702_v26 }
 0x4ed   : > { %7052 = vmatpush3.bf16.msra.mxu0 %v7702_v26 }
 0x4f0   : > { %7054 = vmatmul.mubr.bf16.vlgmr.msra.gmra.mrb[48].mxu0 %v8593_v59 }
 0x4f1   : > { %7057 = vmatprep.mubr.bf16.mxu0 %v8607_v17 }
 0x4f8   : > { %7058 = vmatmul.mubr.bf16.gmra.mrb[52].mxu0 %v8620_v14 }
 0x4f9   : > { %7061 = vmatprep.mubr.bf16.mxu0 %v8633_v34 }
 0x500   : > { %7062 = vmatmul.mubr.bf16.gmra.mrb[56].mxu0 %v8646_v45 }
 0x501   : > { %7065 = vmatprep.mubr.bf16.mxu0 %v8658_v13 }
 0x508   : > { %7066 = vmatmul.mubr.bf16.gmra.mrb[60].mxu0 %v8668_v21 }
 0x583   : > { %v9013_v44 = vpop.f32.mrb[16].mxu0 }
 0x584   : > { %v9015_v55 = vpop.f32.mrb[17].mxu0 }
 0x585   : > { %v9017_v30 = vpop.f32.mrb[18].mxu0 }
 0x586   : > { %v9021_v33 = vpop.f32.mrb[19].mxu0 }
 0x58b   : > { %v9025_v12 = vpop.f32.mrb[20].mxu0 }
 0x58c   : > { %v9027_v40 = vpop.f32.mrb[21].mxu0 }
 0x58d   : > { %v9029_v37 = vpop.f32.mrb[22].mxu0 }
 0x58e   : > { %v9033_v32 = vpop.f32.mrb[23].mxu0 }
 0x593   : > { %v9037_v1 = vpop.f32.mrb[24].mxu0 }
 0x594   : > { %10480 = vst [vmem:[#allocation6_spill] sm:$0xff] %v9037_v1  ;;  %v9039_v43 = vpop.f32.mrb[25].mxu0 }
 0x595   : > { %v9041_v57 = vpop.f32.mrb[26].mxu0 }
 0x596   : > { %10481 = vst [vmem:[#allocation7_spill] sm:$0xff] %v9041_v57  ;;  %v9045_v9 = vpop.f32.mrb[27].mxu0 }
 0x59b   : > { %v9049_v50 = vpop.f32.mrb[28].mxu0 }
 0x59c   : > { %10482 = vst [vmem:[#allocation8_spill] sm:$0xff] %v9049_v50  ;;  %v9051_v52 = vpop.f32.mrb[29].mxu0 }
 0x59d   : > { %10483 = vst [vmem:[#allocation9_spill] sm:$0xff] %v9051_v52  ;;  %v9053_v8 = vpop.f32.mrb[30].mxu0 }
 0x59e   : > { %10484 = vst [vmem:[#allocation10_spill] sm:$0xff] %v9053_v8  ;;  %v9057_v51 = vpop.f32.mrb[31].mxu0 }
 0x59f   : > { %10485 = vst [vmem:[#allocation11_spill] sm:$0xff] %v9057_v51 }
 0x5a3   : > { %v6991_v24 = vpop.f32.mrb[32].mxu0 }
 0x5a4   : > { %v1748_v61 = vpop.f32.mrb[33].mxu0  ;;  %v1813_v60 = vmul.f32 0.17677669, %v6991_v24 }
 0x5a5   : > { %v6992_v31 = vpop.f32.mrb[34].mxu0  ;;  %v1811_v46 = vmul.f32 0.17677669, %v1748_v61 }
 0x5a6   : > { %v1814_v53 = vmul.f32 0.17677669, %v6992_v31  ;;  %v1751_v62 = vpop.f32.mrb[35].mxu0  ;;  %v7708_v31 = vld [vmem:[%s10452_s3 + $0xa8] sm:$0xff]  }
 0x5a7   : > { %v1812_v4 = vmul.f32 0.17677669, %v1751_v62 }
 0x5a8   : > { %v2152_v5 = vpack.c.bf16 %v1814_v53, %v1813_v60 }
 0x5a9   : > { %v2151_v7 = vpack.c.bf16 %v1812_v4, %v1811_v46 }
 0x5ab   : > { %v6995_v3 = vpop.f32.mrb[36].mxu0  ;;  %7085 = vmatprep.mubr.msk.bf16.mxu1 %vm1234_vm0, %v2151_v7  ;;  %v7709_v7 = vld [vmem:[%s10452_s3 + $0xb0] sm:$0xff]  }
 0x5ac   : > { %v1764_v10 = vpop.f32.mrb[37].mxu0  ;;  %7086 = vmatmul.mubr.msk.bf16.vlgmr.msra.gmra.mrb[64].mxu1 %vm1234_vm0, %v2152_v5  ;;  %v1817_v18 = vmul.f32 0.17677669, %v6995_v3 }
 0x5ad   : > { %v6996_v16 = vpop.f32.mrb[38].mxu0  ;;  %7174 = vmatpush3.bf16.msra.mxu1 %v7703_v15  ;;  %v1815_v6 = vmul.f32 0.17677669, %v1764_v10 }
 0x5ae   : > { %v1818_v27 = vmul.f32 0.17677669, %v6996_v16  ;;  %v1767_v47 = vpop.f32.mrb[39].mxu0  ;;  %7175 = vmatprep.subr.bf16.mxu1 %v7704_v58 }
 0x5af   : > { %v1816_v29 = vmul.f32 0.17677669, %v1767_v47 }
 0x5b0   : > { %v2154_v19 = vpack.c.bf16 %v1818_v27, %v1817_v18  ;;  %v7710_v18 = vld [vmem:[%s10452_s3 + $0xb8] sm:$0xff]  }
 0x5b1   : > { %v2153_v20 = vpack.c.bf16 %v1816_v29, %v1815_v6  ;;  %7176 = vmatpush3.bf16.msra.mxu1 %v7704_v58 }
 0x5b2   : > { %7177 = vmatprep.subr.bf16.mxu1 %v7705_v63 }
 0x5b3   : > { %v6999_v39 = vpop.f32.mrb[40].mxu0  ;;  %7089 = vmatprep.mubr.msk.bf16.mxu1 %vm1234_vm0, %v2153_v20 }
 0x5b4   : > { %v1780_v11 = vpop.f32.mrb[41].mxu0  ;;  %7090 = vmatmul.mubr.msk.bf16.gmra.mrb[68].mxu1 %vm1234_vm0, %v2154_v19  ;;  %v1821_v25 = vmul.f32 0.17677669, %v6999_v39  ;;  %v7711_v19 = vld [vmem:[%s10453_s4 + $0x80] sm:$0xff]  }
 0x5b5   : > { %v7000_v54 = vpop.f32.mrb[42].mxu0  ;;  %7178 = vmatpush3.bf16.msra.mxu1 %v7705_v63  ;;  %v1819_v26 = vmul.f32 0.17677669, %v1780_v11 }
 0x5b6   : > { %v1822_v22 = vmul.f32 0.17677669, %v7000_v54  ;;  %v1783_v28 = vpop.f32.mrb[43].mxu0  ;;  %7179 = vmatprep.subr.bf16.mxu1 %v7706_v2 }
 0x5b7   : > { %v1820_v15 = vmul.f32 0.17677669, %v1783_v28  ;;  %v7713_v28 = vld [vmem:[%s10453_s4 + $0x90] sm:$0xff]  }
 0x5b8   : > { %v2156_v24 = vpack.c.bf16 %v1822_v22, %v1821_v25 }
 0x5b9   : > { %v2155_v61 = vpack.c.bf16 %v1820_v15, %v1819_v26  ;;  %7180 = vmatpush3.bf16.msra.mxu1 %v7706_v2  ;;  %v7712_v2 = vld [vmem:[%s10453_s4 + $0x88] sm:$0xff]   ;;  %v7714_v26 = vld [vmem:[%s10453_s4 + $0x98] sm:$0xff]  }
 0x5ba   : > { %7181 = vmatprep.subr.bf16.mxu1 %v7707_v36 }
 0x5bb   : > { %v7003_v60 = vpop.f32.mrb[44].mxu0  ;;  %7093 = vmatprep.mubr.msk.bf16.mxu1 %vm1234_vm0, %v2155_v61 }
 0x5bc   : > { %v1796_v53 = vpop.f32.mrb[45].mxu0  ;;  %7094 = vmatmul.mubr.msk.bf16.gmra.mrb[72].mxu1 %vm1234_vm0, %v2156_v24  ;;  %v1825_v46 = vmul.f32 0.17677669, %v7003_v60 }
 0x5bd   : > { %v7004_v62 = vpop.f32.mrb[46].mxu0  ;;  %7182 = vmatpush3.bf16.msra.mxu1 %v7707_v36  ;;  %v1823_v58 = vmul.f32 0.17677669, %v1796_v53  ;;  %v7715_v53 = vld [vmem:[%s10453_s4 + $0xa0] sm:$0xff]  }
 0x5be   : > { %v1826_v4 = vmul.f32 0.17677669, %v7004_v62  ;;  %v1799_v5 = vpop.f32.mrb[47].mxu0  ;;  %7183 = vmatprep.subr.bf16.mxu1 %v7708_v31 }
 0x5bf   : > { %v1824_v3 = vmul.f32 0.17677669, %v1799_v5 }
 0x5c0   : > { %v2158_v10 = vpack.c.bf16 %v1826_v4, %v1825_v46  ;;  %v7716_v46 = vld [vmem:[%s10453_s4 + $0xa8] sm:$0xff]  }
 0x5c1   : > { %v2157_v16 = vpack.c.bf16 %v1824_v3, %v1823_v58  ;;  %7184 = vmatpush3.bf16.msra.mxu1 %v7708_v31 }
 0x5c2   : > { %7185 = vmatprep.subr.bf16.mxu1 %v7709_v7 }
 0x5c3   : > { %v7055_v27 = vpop.f32.mrb[48].mxu0  ;;  %7097 = vmatprep.mubr.msk.bf16.mxu1 %vm1234_vm0, %v2157_v16 }
 0x5c4   : > { %v2088_v47 = vpop.f32.mrb[49].mxu0  ;;  %7098 = vmatmul.mubr.msk.bf16.gmra.mrb[76].mxu1 %vm1234_vm0, %v2158_v10  ;;  %v7717_v10 = vld [vmem:[%s10453_s4 + $0xb0] sm:$0xff]  }
 0x5c5   : > { %v7056_v63 = vpop.f32.mrb[50].mxu0  ;;  %7186 = vmatpush3.bf16.msra.mxu1 %v7709_v7  ;;  %7189 = vmatprep.mubr.bf16.mxu1 %v8583_v42 }
 0x5c6   : > { %v2465_v6 = vpack.c.bf16 %v7056_v63, %v7055_v27  ;;  %v2091_v29 = vpop.f32.mrb[51].mxu0  ;;  %7187 = vmatprep.subr.bf16.mxu1 %v7710_v18 }
 0x5c7   : > { %v2464_v20 = vpack.c.bf16 %v2091_v29, %v2088_v47 }
 0x5c9   : > { %7101 = vmatprep.subr.bf16.mxu0 %v2464_v20  ;;  %7188 = vmatpush3.bf16.msra.mxu1 %v7710_v18  ;;  %v7718_v18 = vld [vmem:[%s10453_s4 + $0xb8] sm:$0xff]  }
 0x5ca   : > { %7102 = vmatpush3.bf16.msra.mxu0 %v2464_v20  ;;  %7205 = vmatprep.subr.bf16.mxu1 %v7711_v19 }
 0x5cb   : > { %v7059_v39 = vpop.f32.mrb[52].mxu0  ;;  %7103 = vmatprep.subr.bf16.mxu0 %v2465_v6 }
 0x5cc   : > { %v2104_v11 = vpop.f32.mrb[53].mxu0  ;;  %7190 = vmatmul.mubr.bf16.vlgmr.msra.gmra.mrb[80].mxu1 %v8593_v59 }
 0x5cd   : > { %v7060_v54 = vpop.f32.mrb[54].mxu0  ;;  %7193 = vmatprep.mubr.bf16.mxu1 %v8607_v17  ;;  %7206 = vmatpush3.bf16.msra.mxu1 %v7711_v19 }
 0x5ce   : > { %v2467_v25 = vpack.c.bf16 %v7060_v54, %v7059_v39  ;;  %v2107_v22 = vpop.f32.mrb[55].mxu0  ;;  %7104 = vmatpush3.bf16.msra.mxu0 %v2465_v6  ;;  %7207 = vmatprep.subr.bf16.mxu1 %v7712_v2 }
 0x5cf   : > { %v2466_v36 = vpack.c.bf16 %v2107_v22, %v2104_v11 }
 0x5d1   : > { %7105 = vmatprep.subr.bf16.mxu0 %v2466_v36  ;;  %7208 = vmatpush3.bf16.msra.mxu1 %v7712_v2 }
 0x5d2   : > { %7106 = vmatpush3.bf16.msra.mxu0 %v2466_v36  ;;  %7209 = vmatprep.subr.bf16.mxu1 %v7713_v28 }
 0x5d3   : > { %v7063_v15 = vpop.f32.mrb[56].mxu0  ;;  %7107 = vmatprep.subr.bf16.mxu0 %v2467_v25 }
 0x5d4   : > { %v2120_v24 = vpop.f32.mrb[57].mxu0  ;;  %7194 = vmatmul.mubr.bf16.gmra.mrb[84].mxu1 %v8620_v14 }
 0x5d5   : > { %v7064_v61 = vpop.f32.mrb[58].mxu0  ;;  %7197 = vmatprep.mubr.bf16.mxu1 %v8633_v34  ;;  %7210 = vmatpush3.bf16.msra.mxu1 %v7713_v28 }
 0x5d6   : > { %v2469_v31 = vpack.c.bf16 %v7064_v61, %v7063_v15  ;;  %v2123_v60 = vpop.f32.mrb[59].mxu0  ;;  %7108 = vmatpush3.bf16.msra.mxu0 %v2467_v25  ;;  %7211 = vmatprep.subr.bf16.mxu1 %v7714_v26 }
 0x5d7   : > { %v2468_v62 = vpack.c.bf16 %v2123_v60, %v2120_v24 }
 0x5d9   : > { %7109 = vmatprep.subr.bf16.mxu0 %v2468_v62  ;;  %7212 = vmatpush3.bf16.msra.mxu1 %v7714_v26 }
 0x5da   : > { %7110 = vmatpush3.bf16.msra.mxu0 %v2468_v62  ;;  %7213 = vmatprep.subr.bf16.mxu1 %v7715_v53 }
 0x5db   : > { %v7067_v4 = vpop.f32.mrb[60].mxu0  ;;  %7111 = vmatprep.subr.bf16.mxu0 %v2469_v31 }
 0x5dc   : > { %v2136_v5 = vpop.f32.mrb[61].mxu0  ;;  %7198 = vmatmul.mubr.bf16.gmra.mrb[88].mxu1 %v8646_v45 }
 0x5dd   : > { %v7068_v7 = vpop.f32.mrb[62].mxu0  ;;  %7201 = vmatprep.mubr.bf16.mxu1 %v8658_v13  ;;  %7214 = vmatpush3.bf16.msra.mxu1 %v7715_v53 }
 0x5de   : > { %v2471_v58 = vpack.c.bf16 %v7068_v7, %v7067_v4  ;;  %v2139_v3 = vpop.f32.mrb[63].mxu0  ;;  %7112 = vmatpush3.bf16.msra.mxu0 %v2469_v31  ;;  %7215 = vmatprep.subr.bf16.mxu1 %v7716_v46 }
 0x5df   : > { %v2470_v16 = vpack.c.bf16 %v2139_v3, %v2136_v5 }
 0x5e1   : > { %7113 = vmatprep.subr.bf16.mxu0 %v2470_v16  ;;  %7216 = vmatpush3.bf16.msra.mxu1 %v7716_v46 }
 0x5e2   : > { %7114 = vmatpush3.bf16.msra.mxu0 %v2470_v16  ;;  %7217 = vmatprep.subr.bf16.mxu1 %v7717_v10 }
 0x5e3   : > { %7115 = vmatprep.subr.bf16.mxu0 %v2471_v58 }
 0x5e4   : > { %7202 = vmatmul.mubr.bf16.gmra.mrb[92].mxu1 %v8668_v21 }
 0x5e5   : > { %7218 = vmatpush3.bf16.msra.mxu1 %v7717_v10  ;;  %7221 = vmatprep.mubr.bf16.mxu1 %v8583_v42 }
 0x5e6   : > { %7116 = vmatpush3.bf16.msra.mxu0 %v2471_v58  ;;  %7219 = vmatprep.subr.bf16.mxu1 %v7718_v18 }
 0x5e9   : > { %7220 = vmatpush3.bf16.msra.mxu1 %v7718_v18 }
 0x5ec   : > { %7222 = vmatmul.mubr.bf16.vlgmr.msra.gmra.mrb[96].mxu1 %v8593_v59 }
 0x5ed   : > { %7225 = vmatprep.mubr.bf16.mxu1 %v8607_v17 }
 0x5f4   : > { %7226 = vmatmul.mubr.bf16.gmra.mrb[100].mxu1 %v8620_v14 }
 0x5f5   : > { %7229 = vmatprep.mubr.bf16.mxu1 %v8633_v34 }
 0x5fc   : > { %7230 = vmatmul.mubr.bf16.gmra.mrb[104].mxu1 %v8646_v45 }
 0x5fd   : > { %7233 = vmatprep.mubr.bf16.mxu1 %v8658_v13 }
 0x604   : > { %7234 = vmatmul.mubr.bf16.gmra.mrb[108].mxu1 %v8668_v21 }
 0x67f   : > { %v9130_v27 = vpop.f32.mrb[64].mxu1 }
 0x680   : > { %v9132_v47 = vpop.f32.mrb[65].mxu1 }
 0x681   : > { %2312 = vmax.xlane.f32.xlu0 %v9132_v47  ;;  %v9135_v63 = vpop.f32.mrb[66].mxu1 }
 0x682   : > { %v9137_v6 = vpop.f32.mrb[67].mxu1 }
 0x683   : > { %2314 = vmax.xlane.f32.xlu1 %v9137_v6 }
 0x685   : > { %2316 = vmax.xlane.f32.xlu0 %v9130_v27 }
 0x687   : > { %2318 = vmax.xlane.f32.xlu1 %v9135_v63  ;;  %v9142_v29 = vpop.f32.mrb[68].mxu1 }
 0x688   : > { %v9144_v19 = vpop.f32.mrb[69].mxu1 }
 0x689   : > { %2320 = vmax.xlane.f32.xlu0 %v9144_v19  ;;  %v9147_v20 = vpop.f32.mrb[70].mxu1 }
 0x68a   : > { %v9149_v2 = vpop.f32.mrb[71].mxu1 }
 0x68b   : > { %2322 = vmax.xlane.f32.xlu1 %v9149_v2 }
 0x68d   : > { %2324 = vmax.xlane.f32.xlu0 %v9142_v29 }
 0x68f   : > { %2326 = vmax.xlane.f32.xlu1 %v9147_v20  ;;  %v9154_v39 = vpop.f32.mrb[72].mxu1 }
 0x690   : > { %v9156_v11 = vpop.f32.mrb[73].mxu1 }
 0x691   : > { %2328 = vmax.xlane.f32.xlu0 %v9156_v11  ;;  %v9159_v54 = vpop.f32.mrb[74].mxu1 }
 0x692   : > { %v9161_v25 = vpop.f32.mrb[75].mxu1 }
 0x693   : > { %2330 = vmax.xlane.f32.xlu1 %v9161_v25 }
 0x695   : > { %2332 = vmax.xlane.f32.xlu0 %v9154_v39 }
 0x697   : > { %2334 = vmax.xlane.f32.xlu1 %v9159_v54  ;;  %v9166_v22 = vpop.f32.mrb[76].mxu1 }
 0x698   : > { %v9168_v28 = vpop.f32.mrb[77].mxu1 }
 0x699   : > { %2336 = vmax.xlane.f32.xlu0 %v9168_v28  ;;  %v9171_v36 = vpop.f32.mrb[78].mxu1 }
 0x69a   : > { %v9173_v26 = vpop.f32.mrb[79].mxu1 }
 0x69b   : > { %2338 = vmax.xlane.f32.xlu1 %v9173_v26 }
 0x69d   : > { %2340 = vmax.xlane.f32.xlu0 %v9166_v22 }
 0x69f   : > { %2342 = vmax.xlane.f32.xlu1 %v9171_v36  ;;  %v7191_v15 = vpop.f32.mrb[80].mxu1 }
 0x6a0   : > { %v2947_v24 = vpop.f32.mrb[81].mxu1  ;;  %v9178_v31 = vmul.f32 0.17677669, %v7191_v15 }
 0x6a1   : > { %v7192_v61 = vpop.f32.mrb[82].mxu1  ;;  %v3010_v62 = vmul.f32 0.17677669, %v2947_v24 }
 0x6a2   : > { %v9180_v60 = vmul.f32 0.17677669, %v7192_v61  ;;  %v2950_v53 = vpop.f32.mrb[83].mxu1 }
 0x6a3   : > { %v3011_v46 = vmul.f32 0.17677669, %v2950_v53 }
 0x6a5   : > { %v3350_v5 = vpack.c.bf16 %v3011_v46, %v3010_v62 }
 0x6a7   : > { %v7195_v7 = vpop.f32.mrb[84].mxu1  ;;  %7285 = vmatprep.mubr.msk.bf16.mxu1 %vm1234_vm0, %v3350_v5 }
 0x6a8   : > { %v2963_v58 = vpop.f32.mrb[85].mxu1  ;;  %v9185_v10 = vmul.f32 0.17677669, %v7195_v7 }
 0x6a9   : > { %v7196_v3 = vpop.f32.mrb[86].mxu1  ;;  %v9189_v15 = vmul.f32 0.17677669, %v2963_v58 }
 0x6aa   : > { %v9187_v16 = vmul.f32 0.17677669, %v7196_v3  ;;  %v2966_v18 = vpop.f32.mrb[87].mxu1 }
 0x6ab   : > { %v9191_v61 = vmul.f32 0.17677669, %v2966_v18 }
 0x6af   : > { %v7199_v62 = vpop.f32.mrb[88].mxu1 }
 0x6b0   : > { %v2979_v46 = vpop.f32.mrb[89].mxu1  ;;  %v9197_v38 = vmul.f32 0.17677669, %v7199_v62 }
 0x6b1   : > { %v7200_v5 = vpop.f32.mrb[90].mxu1  ;;  %v9201_v56 = vmul.f32 0.17677669, %v2979_v46 }
 0x6b2   : > { %v9199_v7 = vmul.f32 0.17677669, %v7200_v5  ;;  %v2982_v3 = vpop.f32.mrb[91].mxu1 }
 0x6b3   : > { %v9203_v58 = vmul.f32 0.17677669, %v2982_v3 }
 0x6b7   : > { %v7203_v48 = vpop.f32.mrb[92].mxu1 }
 0x6b8   : > { %v2995_v23 = vpop.f32.mrb[93].mxu1  ;;  %v9209_v0 = vmul.f32 0.17677669, %v7203_v48 }
 0x6b9   : > { %v7204_v41 = vpop.f32.mrb[94].mxu1  ;;  %v9213_v35 = vmul.f32 0.17677669, %v2995_v23 }
 0x6ba   : > { %v9211_v62 = vmul.f32 0.17677669, %v7204_v41  ;;  %v2998_v5 = vpop.f32.mrb[95].mxu1 }
 0x6bb   : > { %v9215_v46 = vmul.f32 0.17677669, %v2998_v5 }
 0x6bf   : > { %v7223_v24 = vpop.f32.mrb[96].mxu1 }
 0x6c0   : > { %v3125_v49 = vpop.f32.mrb[97].mxu1 }
 0x6c1   : > { %v7224_v53 = vpop.f32.mrb[98].mxu1 }
 0x6c2   : > { %v3359_v4 = vpack.c.bf16 %v7224_v53, %v7223_v24  ;;  %v3128_v50 = vpop.f32.mrb[99].mxu1 }
 0x6c3   : > { %v3358_v48 = vpack.c.bf16 %v3128_v50, %v3125_v49 }
 0x6c4   : > { %v3394_v18 = vsel %vm1234_vm0, %v3359_v4, 0 }
 0x6c5   : > { %v3391_v41 = vsel %vm1234_vm0, %v3358_v48, 0  ;;  %7597 = vmatprep.subr.msk.bf16.mxu1 %vm1234_vm0, %v3358_v48 }
 0x6c6   : > { %7270 = vmatpush3.bf16.xpose.msra.mxu1 %v3391_v41 }
 0x6c7   : > { %v7227_v23 = vpop.f32.mrb[100].mxu1  ;;  %7598 = vmatprep.subr.msk.bf16.mxu1 %vm1234_vm0, %v3359_v4 }
 0x6c8   : > { %v3141_v5 = vpop.f32.mrb[101].mxu1 }
 0x6c9   : > { %v7228_v8 = vpop.f32.mrb[102].mxu1 }
 0x6ca   : > { %v3361_v3 = vpack.c.bf16 %v7228_v8, %v7227_v23  ;;  %v3144_v52 = vpop.f32.mrb[103].mxu1 }
 0x6cb   : > { %v3360_v51 = vpack.c.bf16 %v3144_v52, %v3141_v5 }
 0x6cd   : > { %v3397_v41 = vsel %vm1234_vm0, %v3360_v51, 0 }
 0x6ce   : > { %7272 = vmatpush3.bf16.xpose.msra.mxu1 %v3394_v18  ;;  %v3400_v18 = vsel %vm1234_vm0, %v3361_v3, 0 }
 0x6cf   : > { %v7231_v1 = vpop.f32.mrb[104].mxu1  ;;  %7599 = vmatprep.subr.msk.bf16.mxu1 %vm1234_vm0, %v3360_v51 }
 0x6d0   : > { %v3157_v49 = vpop.f32.mrb[105].mxu1 }
 0x6d1   : > { %v7232_v50 = vpop.f32.mrb[106].mxu1 }
 0x6d2   : > { %v3363_v24 = vpack.c.bf16 %v7232_v50, %v7231_v1  ;;  %v3160_v53 = vpop.f32.mrb[107].mxu1  ;;  %v7720_v50 = vld [vmem:[%s10452_s3 + $0xc8] sm:$0xff]  }
 0x6d3   : > { %v3362_v48 = vpack.c.bf16 %v3160_v53, %v3157_v49  ;;  %v10487_v53 = vpack.c.bf16 %v9191_v61, %v9189_v15  ;;  %v10489_v15 = vpack.c.bf16 %v9203_v58, %v9201_v56 }
 0x6d4   : > { %v3406_v51 = vsel %vm1234_vm0, %v3363_v24, 0 }
 0x6d5   : > { %v3403_v1 = vsel %vm1234_vm0, %v3362_v48, 0 }
 0x6d6   : > { %7274 = vmatpush3.bf16.xpose.msra.mxu1 %v3397_v41  ;;  %v7722_v41 = vld [vmem:[%s10452_s3 + $0xd8] sm:$0xff]  }
 0x6d7   : > { %v7235_v57 = vpop.f32.mrb[108].mxu1  ;;  %7600 = vmatprep.subr.msk.bf16.mxu1 %vm1234_vm0, %v3361_v3 }
 0x6d8   : > { %v3173_v8 = vpop.f32.mrb[109].mxu1 }
 0x6d9   : > { %v7236_v23 = vpop.f32.mrb[110].mxu1 }
 0x6da   : > { %v3365_v52 = vpack.c.bf16 %v7236_v23, %v7235_v57  ;;  %v3176_v5 = vpop.f32.mrb[111].mxu1  ;;  %v7719_v57 = vld [vmem:[%s10452_s3 + $0xc0] sm:$0xff]  }
 0x6db   : > { %v3364_v4 = vpack.c.bf16 %v3176_v5, %v3173_v8  ;;  %v7723_v8 = vld [vmem:[%s10452_s3 + $0xe0] sm:$0xff]  }
 0x6dc   : > { %v3412_v3 = vsel %vm1234_vm0, %v3365_v52, 0 }
 0x6dd   : > { %v3409_v49 = vsel %vm1234_vm0, %v3364_v4, 0 }
 0x6de   : > { %7276 = vmatpush3.bf16.xpose.msra.mxu1 %v3400_v18 }
 0x6df   : > { %7601 = vmatprep.subr.msk.bf16.mxu1 %vm1234_vm0, %v3362_v48  ;;  %v7721_v48 = vld [vmem:[%s10452_s3 + $0xd0] sm:$0xff]  }
 0x6e6   : > { %7278 = vmatpush3.bf16.xpose.msra.mxu1 %v3403_v1  ;;  %v10490_v1 = vpack.c.bf16 %v9199_v7, %v9197_v38 }
 0x6e7   : > { %7602 = vmatprep.subr.msk.bf16.mxu1 %vm1234_vm0, %v3363_v24  ;;  %v10486_v24 = vpack.c.bf16 %v9180_v60, %v9178_v31  ;;  %v10488_v31 = vpack.c.bf16 %v9187_v16, %v9185_v10 }
 0x6ee   : > { %7280 = vmatpush3.bf16.xpose.msra.mxu1 %v3406_v51  ;;  %v10491_v51 = vpack.c.bf16 %v9215_v46, %v9213_v35 }
 0x6ef   : > { %7603 = vmatprep.subr.msk.bf16.mxu1 %vm1234_vm0, %v3364_v4 }
 0x6f6   : > { %7282 = vmatpush3.bf16.xpose.msra.mxu1 %v3409_v49 }
 0x6f7   : > { %7604 = vmatprep.subr.msk.bf16.mxu1 %vm1234_vm0, %v3365_v52 }
 0x6fe   : > { %7284 = vmatpush3.bf16.xpose.msra.mxu1 %v3412_v3 }
 0x6ff   : > { %7353 = vmatprep.subr.bf16.mxu1 %v7719_v57 }
 0x705   : > { %7286 = vmatmul.mubr.msk.bf16.vlgmr.msra.gmra.mrb[112].mxu1 %vm1234_vm0, %v10486_v24 }
 0x706   : > { %7289 = vmatprep.mubr.msk.bf16.mxu1 %vm1234_vm0, %v10487_v53  ;;  %7354 = vmatpush3.bf16.msra.mxu1 %v7719_v57 }
 0x707   : > { %7355 = vmatprep.subr.bf16.mxu1 %v7720_v50 }
 0x70a   : > { %7356 = vmatpush3.bf16.msra.mxu1 %v7720_v50 }
 0x70b   : > { %7357 = vmatprep.subr.bf16.mxu1 %v7721_v48 }
 0x70d   : > { %7290 = vmatmul.mubr.msk.bf16.gmra.mrb[116].mxu1 %vm1234_vm0, %v10488_v31 }
 0x70e   : > { %v2313_v60 = vpop.xlane.xlu0 %2312  ;;  %7293 = vmatprep.mubr.msk.bf16.mxu1 %vm1234_vm0, %v10489_v15  ;;  %7358 = vmatpush3.bf16.msra.mxu1 %v7721_v48 }
 0x70f   : > { %v2344_v61 = vsub.f32 %v9132_v47, %v2313_v60  ;;  %7359 = vmatprep.subr.bf16.mxu1 %v7722_v41  ;;  %v7724_v47 = vld [vmem:[%s10452_s3 + $0xe8] sm:$0xff]  }
 0x710   : > { %v2315_v23 = vpop.xlane.xlu1 %2314 }
 0x711   : > { %v2360_v52 = vmul.f32 1.442695, %v2344_v61  ;;  %v2345_v10 = vsub.f32 %v9137_v6, %v2315_v23 }
 0x712   : > { %v2317_v16 = vpop.xlane.xlu0 %2316  ;;  %7360 = vmatpush3.bf16.msra.mxu1 %v7722_v41 }
 0x713   : > { %7895 = vpow2.f32 %v2360_v52  ;;  %v2362_v5 = vmul.f32 1.442695, %v2345_v10  ;;  %v2346_v56 = vsub.f32 %v9130_v27, %v2317_v16  ;;  %7361 = vmatprep.subr.bf16.mxu1 %v7723_v8  ;;  %v7728_v16 = vld [vmem:[%s10454_s5 + $0xc8] sm:$0xff]  }
 0x714   : > { %v2319_v58 = vpop.xlane.xlu1 %2318 }
 0x715   : > { %7897 = vpow2.f32 %v2362_v5  ;;  %v2364_v4 = vmul.f32 1.442695, %v2346_v56  ;;  %v2347_v18 = vsub.f32 %v9135_v63, %v2319_v58  ;;  %7294 = vmatmul.mubr.msk.bf16.gmra.mrb[120].mxu1 %vm1234_vm0, %v10490_v1  ;;  %v7725_v63 = vld [vmem:[%s10452_s3 + $0xf0] sm:$0xff]  }
 0x716   : > { %v2321_v6 = vpop.xlane.xlu0 %2320  ;;  %7297 = vmatprep.mubr.msk.bf16.mxu1 %vm1234_vm0, %v10491_v51  ;;  %7362 = vmatpush3.bf16.msra.mxu1 %v7723_v8 }
 0x717   : > { %7899 = vpow2.f32 %v2364_v4  ;;  %v2366_v27 = vmul.f32 1.442695, %v2347_v18  ;;  %v2348_v49 = vsub.f32 %v9144_v19, %v2321_v6  ;;  %7363 = vmatprep.subr.bf16.mxu1 %v7724_v47  ;;  %v7726_v19 = vld [vmem:[%s10452_s3 + $0xf8] sm:$0xff]  }
 0x718   : > { %v2323_v57 = vpop.xlane.xlu1 %2322 }
 0x719   : > { %7901 = vpow2.f32 %v2366_v27  ;;  %v2368_v38 = vmul.f32 1.442695, %v2348_v49  ;;  %v2349_v7 = vsub.f32 %v9149_v2, %v2323_v57  ;;  %v10492_v2 = vpack.c.bf16 %v9211_v62, %v9209_v0 }
 0x71a   : > { %v2325_v3 = vpop.xlane.xlu0 %2324  ;;  %7364 = vmatpush3.bf16.msra.mxu1 %v7724_v47 }
 0x71b   : > { %7903 = vpow2.f32 %v2368_v38  ;;  %v2370_v35 = vmul.f32 1.442695, %v2349_v7  ;;  %v2350_v46 = vsub.f32 %v9142_v29, %v2325_v3  ;;  %7365 = vmatprep.subr.bf16.mxu1 %v7725_v63  ;;  %v7730_v38 = vld [vmem:[%s10454_s5 + $0xd8] sm:$0xff]  }
 0x71c   : > { %v2327_v50 = vpop.xlane.xlu1 %2326 }
 0x71d   : > { %v9292_v24 = vpop.eup %7895  ;;  %7905 = vpow2.f32 %v2370_v35  ;;  %v2372_v53 = vmul.f32 1.442695, %v2350_v46  ;;  %v2351_v48 = vsub.f32 %v9147_v20, %v2327_v50  ;;  %7298 = vmatmul.mubr.msk.bf16.gmra.mrb[124].mxu1 %vm1234_vm0, %v10492_v2  ;;  %v7727_v20 = vld [vmem:[%s10454_s5 + $0xc0] sm:$0xff]   ;;  %v7732_v50 = vld [vmem:[%s10454_s5 + $0xe8] sm:$0xff]   ;;  %v7733_v2 = vld [vmem:[%s10454_s5 + $0xf0] sm:$0xff]  }
 0x71e   : > { %v2329_v41 = vpop.xlane.xlu0 %2328  ;;  %2392 = vadd.xlane.f32.xlu0 %v9292_v24  ;;  %7366 = vmatpush3.bf16.msra.mxu1 %v7725_v63  ;;  %v7731_v46 = vld [vmem:[%s10454_s5 + $0xe0] sm:$0xff]  }
 0x71f   : > { %v9300_v29 = vpop.eup %7897  ;;  %7907 = vpow2.f32 %v2372_v53  ;;  %v2374_v31 = vmul.f32 1.442695, %v2351_v48  ;;  %v2352_v60 = vsub.f32 %v9156_v11, %v2329_v41  ;;  %7369 = vmatprep.mubr.bf16.mxu1 %v8583_v42  ;;  %7367 = vmatprep.subr.bf16.mxu1 %v7726_v19 }
 0x720   : > { %v2331_v0 = vpop.xlane.xlu1 %2330  ;;  %2394 = vadd.xlane.f32.xlu1 %v9300_v29 }
 0x721   : > { %v9308_v62 = vpop.eup %7899  ;;  %7909 = vpow2.f32 %v2374_v31  ;;  %v2376_v15 = vmul.f32 1.442695, %v2352_v60  ;;  %v2353_v61 = vsub.f32 %v9161_v25, %v2331_v0  ;;  %v7734_v60 = vld [vmem:[%s10454_s5 + $0xf8] sm:$0xff]  }
 0x722   : > { %v2333_v8 = vpop.xlane.xlu0 %2332  ;;  %2396 = vadd.xlane.f32.xlu0 %v9308_v62  ;;  %7368 = vmatpush3.bf16.msra.mxu1 %v7726_v19 }
 0x723   : > { %v9312_v11 = vpop.eup %7901  ;;  %7911 = vpow2.f32 %v2376_v15  ;;  %v2378_v23 = vmul.f32 1.442695, %v2353_v61  ;;  %v2354_v52 = vsub.f32 %v9154_v39, %v2333_v8  ;;  %7417 = vmatprep.subr.bf16.mxu1 %v7727_v20 }
 0x724   : > { %v2335_v10 = vpop.xlane.xlu1 %2334  ;;  %2398 = vadd.xlane.f32.xlu1 %v9312_v11 }
 0x725   : > { %v9319_v5 = vpop.eup %7903  ;;  %7913 = vpow2.f32 %v2378_v23  ;;  %v2380_v25 = vmul.f32 1.442695, %v2354_v52  ;;  %v2355_v56 = vsub.f32 %v9159_v54, %v2335_v10  ;;  %7370 = vmatmul.mubr.bf16.vlgmr.msra.gmra.mrb[128].mxu1 %v8593_v59  ;;  %v7729_v54 = vld [vmem:[%s10454_s5 + $0xd0] sm:$0xff]  }
 0x726   : > { %2400 = vadd.xlane.f32.xlu0 %v9319_v5  ;;  %v2337_v47 = vpop.xlane.xlu0 %2336  ;;  %7373 = vmatprep.mubr.bf16.mxu1 %v8607_v17 }
 0x727   : > { %v9325_v39 = vpop.eup %7905  ;;  %7915 = vpow2.f32 %v2380_v25  ;;  %v2382_v58 = vmul.f32 1.442695, %v2355_v56  ;;  %v2356_v4 = vsub.f32 %v9168_v28, %v2337_v47  ;;  %7418 = vmatpush3.bf16.msra.mxu1 %v7727_v20 }
 0x728   : > { %2402 = vadd.xlane.f32.xlu1 %v9325_v39  ;;  %v2339_v18 = vpop.xlane.xlu1 %2338  ;;  %7419 = vmatprep.subr.bf16.mxu1 %v7728_v16 }
 0x729   : > { %v9332_v1 = vpop.eup %7907  ;;  %7917 = vpow2.f32 %v2382_v58  ;;  %v2384_v6 = vmul.f32 1.442695, %v2356_v4  ;;  %v2357_v51 = vsub.f32 %v9173_v26, %v2339_v18 }
 0x72a   : > { %2404 = vadd.xlane.f32.xlu0 %v9332_v1  ;;  %v2341_v27 = vpop.xlane.xlu0 %2340 }
 0x72b   : > { %v9336_v49 = vpop.eup %7909  ;;  %7919 = vpow2.f32 %v2384_v6  ;;  %v2386_v28 = vmul.f32 1.442695, %v2357_v51  ;;  %v2358_v63 = vsub.f32 %v9166_v22, %v2341_v27  ;;  %7420 = vmatpush3.bf16.msra.mxu1 %v7728_v16 }
 0x72c   : > { %2406 = vadd.xlane.f32.xlu1 %v9336_v49  ;;  %v2343_v57 = vpop.xlane.xlu1 %2342  ;;  %7421 = vmatprep.subr.bf16.mxu1 %v7729_v54 }
 0x72d   : > { %v9343_v7 = vpop.eup %7911  ;;  %7921 = vpow2.f32 %v2386_v28  ;;  %v2388_v26 = vmul.f32 1.442695, %v2358_v63  ;;  %v2359_v3 = vsub.f32 %v9171_v36, %v2343_v57  ;;  %7374 = vmatmul.mubr.bf16.gmra.mrb[132].mxu1 %v8620_v14 }
 0x72e   : > { %2408 = vadd.xlane.f32.xlu0 %v9343_v7  ;;  %7377 = vmatprep.mubr.bf16.mxu1 %v8633_v34 }
 0x72f   : > { %v9349_v22 = vpop.eup %7913  ;;  %7923 = vpow2.f32 %v2388_v26  ;;  %v2390_v35 = vmul.f32 1.442695, %v2359_v3  ;;  %7422 = vmatpush3.bf16.msra.mxu1 %v7729_v54 }
 0x730   : > { %2410 = vadd.xlane.f32.xlu1 %v9349_v22  ;;  %7423 = vmatprep.subr.bf16.mxu1 %v7730_v38 }
 0x731   : > { %v9355_v19 = vpop.eup %7915  ;;  %7925 = vpow2.f32 %v2390_v35 }
 0x732   : > { %2412 = vadd.xlane.f32.xlu0 %v9355_v19 }
 0x733   : > { %v9358_v36 = vpop.eup %7917  ;;  %7424 = vmatpush3.bf16.msra.mxu1 %v7730_v38 }
 0x734   : > { %2414 = vadd.xlane.f32.xlu1 %v9358_v36  ;;  %7425 = vmatprep.subr.bf16.mxu1 %v7731_v46 }
 0x735   : > { %v9364_v53 = vpop.eup %7919  ;;  %7378 = vmatmul.mubr.bf16.gmra.mrb[136].mxu1 %v8646_v45 }
 0x736   : > { %2416 = vadd.xlane.f32.xlu0 %v9364_v53  ;;  %7381 = vmatprep.mubr.bf16.mxu1 %v8658_v13 }
 0x737   : > { %v9369_v48 = vpop.eup %7921  ;;  %7426 = vmatpush3.bf16.msra.mxu1 %v7731_v46 }
 0x738   : > { %2418 = vadd.xlane.f32.xlu1 %v9369_v48  ;;  %7427 = vmatprep.subr.bf16.mxu1 %v7732_v50 }
 0x739   : > { %v9375_v41 = vpop.eup %7923 }
 0x73a   : > { %2420 = vadd.xlane.f32.xlu0 %v9375_v41 }
 0x73b   : > { %v9378_v31 = vpop.eup %7925  ;;  %7428 = vmatpush3.bf16.msra.mxu1 %v7732_v50 }
 0x73c   : > { %2422 = vadd.xlane.f32.xlu1 %v9378_v31  ;;  %7429 = vmatprep.subr.bf16.mxu1 %v7733_v2 }
 0x73d   : > { %7382 = vmatmul.mubr.bf16.gmra.mrb[140].mxu1 %v8668_v21 }
 0x73e   : > { %7433 = vmatprep.mubr.bf16.mxu1 %v8583_v42 }
 0x73f   : > { %7430 = vmatpush3.bf16.msra.mxu1 %v7733_v2 }
 0x740   : > { %7431 = vmatprep.subr.bf16.mxu1 %v7734_v60 }
 0x743   : > { %7432 = vmatpush3.bf16.msra.mxu1 %v7734_v60 }
 0x746   : > { %7434 = vmatmul.mubr.bf16.vlgmr.msra.gmra.mrb[144].mxu1 %v8593_v59 }
 0x747   : > { %7437 = vmatprep.mubr.bf16.mxu1 %v8607_v17 }
 0x74e   : > { %7438 = vmatmul.mubr.bf16.gmra.mrb[148].mxu1 %v8620_v14 }
 0x74f   : > { %7441 = vmatprep.mubr.bf16.mxu1 %v8633_v34 }
 0x756   : > { %7442 = vmatmul.mubr.bf16.gmra.mrb[152].mxu1 %v8646_v45 }
 0x757   : > { %7445 = vmatprep.mubr.bf16.mxu1 %v8658_v13 }
 0x75e   : > { %7446 = vmatmul.mubr.bf16.gmra.mrb[156].mxu1 %v8668_v21 }
 0x7ab   : > { %v2393_v20 = vpop.xlane.xlu0 %2392 }
 0x7ac   : > { %7927 = vrcp.f32 %v2393_v20 }
 0x7ad   : > { %v2395_v0 = vpop.xlane.xlu1 %2394 }
 0x7ae   : > { %7929 = vrcp.f32 %v2395_v0 }
 0x7af   : > { %v2397_v15 = vpop.xlane.xlu0 %2396 }
 0x7b0   : > { %7931 = vrcp.f32 %v2397_v15 }
 0x7b1   : > { %v2399_v61 = vpop.xlane.xlu1 %2398 }
 0x7b2   : > { %7933 = vrcp.f32 %v2399_v61 }
 0x7b3   : > { %v2401_v8 = vpop.xlane.xlu0 %2400 }
 0x7b4   : > { %7935 = vrcp.f32 %v2401_v8 }
 0x7b5   : > { %v2403_v23 = vpop.xlane.xlu1 %2402 }
 0x7b6   : > { %v7928_v52 = vpop.eup %7927  ;;  %7937 = vrcp.f32 %v2403_v23 }
 0x7b7   : > { %v2405_v10 = vpop.xlane.xlu0 %2404  ;;  %v2440_v56 = vmul.f32 %v7928_v52, %v9292_v24 }
 0x7b8   : > { %v7930_v16 = vpop.eup %7929  ;;  %7939 = vrcp.f32 %v2405_v10 }
 0x7b9   : > { %v2407_v25 = vpop.xlane.xlu1 %2406  ;;  %v2441_v47 = vmul.f32 %v7930_v16, %v9300_v29 }
 0x7ba   : > { %v7932_v58 = vpop.eup %7931  ;;  %7941 = vrcp.f32 %v2407_v25 }
 0x7bb   : > { %v2409_v4 = vpop.xlane.xlu0 %2408  ;;  %v2456_v18 = vpack.c.bf16 %v2441_v47, %v2440_v56  ;;  %v2442_v6 = vmul.f32 %v7932_v58, %v9308_v62 }
 0x7bc   : > { %v7934_v54 = vpop.eup %7933  ;;  %7943 = vrcp.f32 %v2409_v4 }
 0x7bd   : > { %v2443_v51 = vmul.f32 %v7934_v54, %v9312_v11  ;;  %7117 = vmatprep.mubr.bf16.mxu0 %v2456_v18  ;;  %v2411_v27 = vpop.xlane.xlu1 %2410 }
 0x7be   : > { %v7936_v28 = vpop.eup %7935  ;;  %7945 = vrcp.f32 %v2411_v27 }
 0x7bf   : > { %v2413_v63 = vpop.xlane.xlu0 %2412  ;;  %v2457_v57 = vpack.c.bf16 %v2443_v51, %v2442_v6  ;;  %v2444_v29 = vmul.f32 %v7936_v28, %v9319_v5 }
 0x7c0   : > { %v7938_v38 = vpop.eup %7937  ;;  %7947 = vrcp.f32 %v2413_v63 }
 0x7c1   : > { %7118 = vmatmul.mubr.bf16.vlgmr.msra.gmra.mrb[64].mxu0 %v2457_v57  ;;  %v2415_v24 = vpop.xlane.xlu1 %2414  ;;  %v2445_v26 = vmul.f32 %v7938_v38, %v9325_v39 }
 0x7c2   : > { %v7940_v3 = vpop.eup %7939  ;;  %7949 = vrcp.f32 %v2415_v24 }
 0x7c3   : > { %v2417_v35 = vpop.xlane.xlu0 %2416  ;;  %v2458_v62 = vpack.c.bf16 %v2445_v26, %v2444_v29  ;;  %v2446_v50 = vmul.f32 %v7940_v3, %v9332_v1 }
 0x7c4   : > { %v7942_v46 = vpop.eup %7941  ;;  %7951 = vrcp.f32 %v2417_v35 }
 0x7c5   : > { %7121 = vmatprep.mubr.bf16.mxu0 %v2458_v62  ;;  %v2419_v11 = vpop.xlane.xlu1 %2418  ;;  %v2447_v2 = vmul.f32 %v7942_v46, %v9336_v49 }
 0x7c6   : > { %v7944_v60 = vpop.eup %7943  ;;  %7953 = vrcp.f32 %v2419_v11 }
 0x7c7   : > { %v2421_v20 = vpop.xlane.xlu0 %2420  ;;  %v2459_v0 = vpack.c.bf16 %v2447_v2, %v2446_v50  ;;  %v2448_v39 = vmul.f32 %v7944_v60, %v9343_v7 }
 0x7c8   : > { %v7946_v15 = vpop.eup %7945  ;;  %7955 = vrcp.f32 %v2421_v20 }
 0x7c9   : > { %7122 = vmatmul.mubr.bf16.gmra.mrb[68].mxu0 %v2459_v0  ;;  %v2423_v5 = vpop.xlane.xlu1 %2422  ;;  %v2449_v61 = vmul.f32 %v7946_v15, %v9349_v22  ;;  %v7735_v15 = vld [vmem:[%s10455_s6 + $0x10] sm:$0xff]  }
 0x7ca   : > { %v7948_v8 = vpop.eup %7947  ;;  %7957 = vrcp.f32 %v2423_v5  ;;  %7133 = vmatprep.subr.bf16.mxu0 %v7735_v15 }
 0x7cb   : > { %v2460_v23 = vpack.c.bf16 %v2449_v61, %v2448_v39  ;;  %v2450_v1 = vmul.f32 %v7948_v8, %v9355_v19  ;;  %7134 = vmatpush3.bf16.msra.mxu0 %v7735_v15 }
 0x7cc   : > { %v7950_v52 = vpop.eup %7949 }
 0x7cd   : > { %7125 = vmatprep.mubr.bf16.mxu0 %v2460_v23  ;;  %v2451_v49 = vmul.f32 %v7950_v52, %v9358_v36 }
 0x7ce   : > { %v7952_v10 = vpop.eup %7951 }
 0x7cf   : > { %v2461_v16 = vpack.c.bf16 %v2451_v49, %v2450_v1  ;;  %v2452_v56 = vmul.f32 %v7952_v10, %v9364_v53 }
 0x7d0   : > { %v7954_v25 = vpop.eup %7953 }
 0x7d1   : > { %7126 = vmatmul.mubr.bf16.gmra.mrb[72].mxu0 %v2461_v16  ;;  %v2453_v47 = vmul.f32 %v7954_v25, %v9369_v48 }
 0x7d2   : > { %v7956_v7 = vpop.eup %7955 }
 0x7d3   : > { %v2462_v58 = vpack.c.bf16 %v2453_v47, %v2452_v56  ;;  %v2454_v4 = vmul.f32 %v7956_v7, %v9375_v41  ;;  %v7736_v7 = vld [vmem:[%s10455_s6 + $0x18] sm:$0xff]  }
 0x7d4   : > { %v7958_v22 = vpop.eup %7957  ;;  %7135 = vmatprep.subr.bf16.mxu0 %v7736_v7 }
 0x7d5   : > { %7129 = vmatprep.mubr.bf16.mxu0 %v2462_v58  ;;  %v2455_v18 = vmul.f32 %v7958_v22, %v9378_v31  ;;  %7136 = vmatpush3.bf16.msra.mxu0 %v7736_v7 }
 0x7d7   : > { %v2463_v54 = vpack.c.bf16 %v2455_v18, %v2454_v4 }
 0x7d8   : > { %v9409_v19 = vpop.f32.mrb[112].mxu1 }
 0x7d9   : > { %7130 = vmatmul.mubr.bf16.gmra.mrb[76].mxu0 %v2463_v54  ;;  %v9411_v36 = vpop.f32.mrb[113].mxu1 }
 0x7da   : > { %3511 = vmax.xlane.f32.xlu0 %v9411_v36  ;;  %v9414_v6 = vpop.f32.mrb[114].mxu1 }
 0x7db   : > { %v9416_v53 = vpop.f32.mrb[115].mxu1 }
 0x7dc   : > { %3513 = vmax.xlane.f32.xlu1 %v9416_v53 }
 0x7de   : > { %3515 = vmax.xlane.f32.xlu0 %v9409_v19 }
 0x7e0   : > { %3517 = vmax.xlane.f32.xlu1 %v9414_v6  ;;  %v9421_v48 = vpop.f32.mrb[116].mxu1 }
 0x7e1   : > { %v9423_v41 = vpop.f32.mrb[117].mxu1 }
 0x7e2   : > { %3519 = vmax.xlane.f32.xlu0 %v9423_v41  ;;  %v9426_v31 = vpop.f32.mrb[118].mxu1 }
 0x7e3   : > { %v9428_v51 = vpop.f32.mrb[119].mxu1 }
 0x7e4   : > { %3521 = vmax.xlane.f32.xlu1 %v9428_v51 }
 0x7e6   : > { %3523 = vmax.xlane.f32.xlu0 %v9421_v48 }
 0x7e8   : > { %3525 = vmax.xlane.f32.xlu1 %v9426_v31  ;;  %v9433_v27 = vpop.f32.mrb[120].mxu1 }
 0x7e9   : > { %v9435_v28 = vpop.f32.mrb[121].mxu1 }
 0x7ea   : > { %3527 = vmax.xlane.f32.xlu0 %v9435_v28  ;;  %v9438_v63 = vpop.f32.mrb[122].mxu1 }
 0x7eb   : > { %v9440_v57 = vpop.f32.mrb[123].mxu1 }
 0x7ec   : > { %3529 = vmax.xlane.f32.xlu1 %v9440_v57 }
 0x7ee   : > { %3531 = vmax.xlane.f32.xlu0 %v9433_v27 }
 0x7f0   : > { %3533 = vmax.xlane.f32.xlu1 %v9438_v63  ;;  %v9445_v38 = vpop.f32.mrb[124].mxu1 }
 0x7f1   : > { %v9447_v24 = vpop.f32.mrb[125].mxu1 }
 0x7f2   : > { %3535 = vmax.xlane.f32.xlu0 %v9447_v24  ;;  %v9450_v29 = vpop.f32.mrb[126].mxu1 }
 0x7f3   : > { %v9452_v26 = vpop.f32.mrb[127].mxu1 }
 0x7f4   : > { %3537 = vmax.xlane.f32.xlu1 %v9452_v26 }
 0x7f6   : > { %3539 = vmax.xlane.f32.xlu0 %v9445_v38 }
 0x7f8   : > { %3541 = vmax.xlane.f32.xlu1 %v9450_v29  ;;  %v7371_v3 = vpop.f32.mrb[128].mxu1 }
 0x7f9   : > { %v4029_v35 = vpop.f32.mrb[129].mxu1  ;;  %v9457_v46 = vmul.f32 0.17677669, %v7371_v3 }
 0x7fa   : > { %v7372_v62 = vpop.f32.mrb[130].mxu1  ;;  %v9461_v2 = vmul.f32 0.17677669, %v4029_v35 }
 0x7fb   : > { %v9459_v11 = vmul.f32 0.17677669, %v7372_v62  ;;  %v4032_v50 = vpop.f32.mrb[131].mxu1 }
 0x7fc   : > { %v9463_v60 = vmul.f32 0.17677669, %v4032_v50 }
 0x800   : > { %v7375_v5 = vpop.f32.mrb[132].mxu1 }
 0x801   : > { %v4045_v39 = vpop.f32.mrb[133].mxu1  ;;  %v9472_v8 = vmul.f32 0.17677669, %v7375_v5 }
 0x802   : > { %v7376_v61 = vpop.f32.mrb[134].mxu1  ;;  %v9476_v1 = vmul.f32 0.17677669, %v4045_v39 }
 0x803   : > { %v9474_v23 = vmul.f32 0.17677669, %v7376_v61  ;;  %v4048_v52 = vpop.f32.mrb[135].mxu1 }
 0x804   : > { %v9478_v49 = vmul.f32 0.17677669, %v4048_v52 }
 0x808   : > { %v7379_v25 = vpop.f32.mrb[136].mxu1 }
 0x809   : > { %v4061_v56 = vpop.f32.mrb[137].mxu1  ;;  %v9487_v58 = vmul.f32 0.17677669, %v7379_v25 }
 0x80a   : > { %v7380_v47 = vpop.f32.mrb[138].mxu1  ;;  %v9491_v18 = vmul.f32 0.17677669, %v4061_v56 }
 0x80b   : > { %v9489_v22 = vmul.f32 0.17677669, %v7380_v47  ;;  %v4064_v4 = vpop.f32.mrb[139].mxu1 }
 0x80c   : > { %v9493_v54 = vmul.f32 0.17677669, %v4064_v4 }
 0x810   : > { %v7383_v62 = vpop.f32.mrb[140].mxu1 }
 0x811   : > { %v4077_v50 = vpop.f32.mrb[141].mxu1  ;;  %v9499_v5 = vmul.f32 0.17677669, %v7383_v62  ;;  %v9514_v62 = vld [vmem:[%s10455_s6] sm:$0xff]  }
 0x812   : > { %v7384_v15 = vpop.f32.mrb[142].mxu1  ;;  %v9503_v52 = vmul.f32 0.17677669, %v4077_v50  ;;  %7153 = vmatprep.subr.bf16.mxu0 %v9514_v62 }
 0x813   : > { %10493 = vst [vmem:[#allocation12_spill] sm:$0xff] %v9499_v5  ;;  %v9501_v39 = vmul.f32 0.17677669, %v7384_v15  ;;  %v4080_v61 = vpop.f32.mrb[143].mxu1 }
 0x814   : > { %10495 = vst [vmem:[#allocation14_spill] sm:$0xff] %v9503_v52  ;;  %v9505_v25 = vmul.f32 0.17677669, %v4080_v61 }
 0x815   : > { %10494 = vst [vmem:[#allocation13_spill] sm:$0xff] %v9501_v39 }
 0x819   : > { %v7435_v7 = vpop.f32.mrb[144].mxu1 }
 0x81a   : > { %v4369_v4 = vpop.f32.mrb[145].mxu1 }
 0x81b   : > { %v7436_v3 = vpop.f32.mrb[146].mxu1 }
 0x81c   : > { %v4746_v15 = vpack.c.bf16 %v7436_v3, %v7435_v7  ;;  %v4372_v35 = vpop.f32.mrb[147].mxu1 }
 0x81d   : > { %v4745_v50 = vpack.c.bf16 %v4372_v35, %v4369_v4 }
 0x81f   : > { %7481 = vmatprep.subr.bf16.mxu1 %v4745_v50 }
 0x820   : > { %7482 = vmatpush3.bf16.msra.mxu1 %v4745_v50 }
 0x821   : > { %v7439_v61 = vpop.f32.mrb[148].mxu1  ;;  %7483 = vmatprep.subr.bf16.mxu1 %v4746_v15 }
 0x822   : > { %v4385_v56 = vpop.f32.mrb[149].mxu1 }
 0x823   : > { %v7440_v10 = vpop.f32.mrb[150].mxu1 }
 0x824   : > { %v4748_v47 = vpack.c.bf16 %v7440_v10, %v7439_v61  ;;  %v4388_v16 = vpop.f32.mrb[151].mxu1  ;;  %7484 = vmatpush3.bf16.msra.mxu1 %v4746_v15 }
 0x825   : > { %v4747_v20 = vpack.c.bf16 %v4388_v16, %v4385_v56 }
 0x827   : > { %7485 = vmatprep.subr.bf16.mxu1 %v4747_v20 }
 0x828   : > { %7486 = vmatpush3.bf16.msra.mxu1 %v4747_v20 }
 0x829   : > { %v7443_v0 = vpop.f32.mrb[152].mxu1  ;;  %7487 = vmatprep.subr.bf16.mxu1 %v4748_v47 }
 0x82a   : > { %v4401_v5 = vpop.f32.mrb[153].mxu1 }
 0x82b   : > { %v7444_v3 = vpop.f32.mrb[154].mxu1 }
 0x82c   : > { %v4750_v7 = vpack.c.bf16 %v7444_v3, %v7443_v0  ;;  %v4404_v35 = vpop.f32.mrb[155].mxu1  ;;  %7488 = vmatpush3.bf16.msra.mxu1 %v4748_v47 }
 0x82d   : > { %v4749_v4 = vpack.c.bf16 %v4404_v35, %v4401_v5 }
 0x82f   : > { %7489 = vmatprep.subr.bf16.mxu1 %v4749_v4 }
 0x830   : > { %7490 = vmatpush3.bf16.msra.mxu1 %v4749_v4 }
 0x831   : > { %v7447_v50 = vpop.f32.mrb[156].mxu1  ;;  %7491 = vmatprep.subr.bf16.mxu1 %v4750_v7 }
 0x832   : > { %v4417_v39 = vpop.f32.mrb[157].mxu1 }
 0x833   : > { %v7448_v52 = vpop.f32.mrb[158].mxu1 }
 0x834   : > { %v4752_v10 = vpack.c.bf16 %v7448_v52, %v7447_v50  ;;  %v4420_v61 = vpop.f32.mrb[159].mxu1  ;;  %7492 = vmatpush3.bf16.msra.mxu1 %v4750_v7 }
 0x835   : > { %v4751_v16 = vpack.c.bf16 %v4420_v61, %v4417_v39 }
 0x837   : > { %7493 = vmatprep.subr.bf16.mxu1 %v4751_v16 }
 0x838   : > { %7494 = vmatpush3.bf16.msra.mxu1 %v4751_v16 }
 0x839   : > { %7495 = vmatprep.subr.bf16.mxu1 %v4752_v10 }
 0x83c   : > { %7496 = vmatpush3.bf16.msra.mxu1 %v4752_v10 }
 0x867   : > { %v3512_v20 = vpop.xlane.xlu0 %3511 }
 0x868   : > { %v3543_v0 = vsub.f32 %v9411_v36, %v3512_v20 }
 0x869   : > { %v3514_v56 = vpop.xlane.xlu1 %3513 }
 0x86a   : > { %v3559_v47 = vmul.f32 1.442695, %v3543_v0  ;;  %v3544_v5 = vsub.f32 %v9416_v53, %v3514_v56 }
 0x86b   : > { %v3516_v15 = vpop.xlane.xlu0 %3515 }
 0x86c   : > { %7959 = vpow2.f32 %v3559_v47  ;;  %v3561_v3 = vmul.f32 1.442695, %v3544_v5  ;;  %v3545_v35 = vsub.f32 %v9409_v19, %v3516_v15 }
 0x86d   : > { %v3518_v52 = vpop.xlane.xlu1 %3517 }
 0x86e   : > { %7961 = vpow2.f32 %v3561_v3  ;;  %v3563_v7 = vmul.f32 1.442695, %v3545_v35  ;;  %v3546_v39 = vsub.f32 %v9414_v6, %v3518_v52 }
 0x86f   : > { %v3520_v4 = vpop.xlane.xlu0 %3519 }
 0x870   : > { %7963 = vpow2.f32 %v3563_v7  ;;  %v3565_v50 = vmul.f32 1.442695, %v3546_v39  ;;  %v3547_v10 = vsub.f32 %v9423_v41, %v3520_v4 }
 0x871   : > { %v3522_v36 = vpop.xlane.xlu1 %3521 }
 0x872   : > { %7965 = vpow2.f32 %v3565_v50  ;;  %v3567_v61 = vmul.f32 1.442695, %v3547_v10  ;;  %v3548_v53 = vsub.f32 %v9428_v51, %v3522_v36 }
 0x873   : > { %v3524_v16 = vpop.xlane.xlu0 %3523 }
 0x874   : > { %7967 = vpow2.f32 %v3567_v61  ;;  %v3569_v20 = vmul.f32 1.442695, %v3548_v53  ;;  %v3549_v19 = vsub.f32 %v9421_v48, %v3524_v16 }
 0x875   : > { %v3526_v0 = vpop.xlane.xlu1 %3525 }
 0x876   : > { %v9524_v56 = vpop.eup %7959  ;;  %7969 = vpow2.f32 %v3569_v20  ;;  %v3571_v6 = vmul.f32 1.442695, %v3549_v19  ;;  %v3550_v47 = vsub.f32 %v9426_v31, %v3526_v0 }
 0x877   : > { %v3528_v5 = vpop.xlane.xlu0 %3527  ;;  %3591 = vadd.xlane.f32.xlu0 %v9524_v56 }
 0x878   : > { %v9528_v41 = vpop.eup %7961  ;;  %7971 = vpow2.f32 %v3571_v6  ;;  %v3573_v15 = vmul.f32 1.442695, %v3550_v47  ;;  %v3551_v51 = vsub.f32 %v9435_v28, %v3528_v5 }
 0x879   : > { %v3530_v3 = vpop.xlane.xlu1 %3529  ;;  %3593 = vadd.xlane.f32.xlu1 %v9528_v41 }
 0x87a   : > { %v9532_v48 = vpop.eup %7963  ;;  %7973 = vpow2.f32 %v3573_v15  ;;  %v3575_v35 = vmul.f32 1.442695, %v3551_v51  ;;  %v3552_v52 = vsub.f32 %v9440_v57, %v3530_v3 }
 0x87b   : > { %v3532_v7 = vpop.xlane.xlu0 %3531  ;;  %3595 = vadd.xlane.f32.xlu0 %v9532_v48 }
 0x87c   : > { %v9536_v31 = vpop.eup %7965  ;;  %7975 = vpow2.f32 %v3575_v35  ;;  %v3577_v39 = vmul.f32 1.442695, %v3552_v52  ;;  %v3553_v4 = vsub.f32 %v9433_v27, %v3532_v7 }
 0x87d   : > { %v3534_v50 = vpop.xlane.xlu1 %3533  ;;  %3597 = vadd.xlane.f32.xlu1 %v9536_v31 }
 0x87e   : > { %v9540_v28 = vpop.eup %7967  ;;  %7977 = vpow2.f32 %v3577_v39  ;;  %v3579_v10 = vmul.f32 1.442695, %v3553_v4  ;;  %v3554_v36 = vsub.f32 %v9438_v63, %v3534_v50 }
 0x87f   : > { %3599 = vadd.xlane.f32.xlu0 %v9540_v28  ;;  %v3536_v57 = vpop.xlane.xlu0 %3535 }
 0x880   : > { %v9544_v61 = vpop.eup %7969  ;;  %7979 = vpow2.f32 %v3579_v10  ;;  %v3581_v53 = vmul.f32 1.442695, %v3554_v36  ;;  %v3555_v16 = vsub.f32 %v9447_v24, %v3536_v57 }
 0x881   : > { %3601 = vadd.xlane.f32.xlu1 %v9544_v61  ;;  %v3538_v27 = vpop.xlane.xlu1 %3537 }
 0x882   : > { %v9548_v20 = vpop.eup %7971  ;;  %7981 = vpow2.f32 %v3581_v53  ;;  %v3583_v19 = vmul.f32 1.442695, %v3555_v16  ;;  %v3556_v0 = vsub.f32 %v9452_v26, %v3538_v27  ;;  %v7738_v27 = vld [vmem:[%s10455_s6 + $0x8] sm:$0xff]  }
 0x883   : > { %3603 = vadd.xlane.f32.xlu0 %v9548_v20  ;;  %v3540_v63 = vpop.xlane.xlu0 %3539 }
 0x884   : > { %v9552_v6 = vpop.eup %7973  ;;  %7983 = vpow2.f32 %v3583_v19  ;;  %v3585_v47 = vmul.f32 1.442695, %v3556_v0  ;;  %v3557_v5 = vsub.f32 %v9445_v38, %v3540_v63  ;;  %v7739_v63 = vld [vmem:[%s10454_s5 + $0x80] sm:$0xff]  }
 0x885   : > { %3605 = vadd.xlane.f32.xlu1 %v9552_v6  ;;  %v3542_v24 = vpop.xlane.xlu1 %3541 }
 0x886   : > { %v9556_v15 = vpop.eup %7975  ;;  %7985 = vpow2.f32 %v3585_v47  ;;  %v3587_v51 = vmul.f32 1.442695, %v3557_v5  ;;  %v3558_v3 = vsub.f32 %v9450_v29, %v3542_v24 }
 0x887   : > { %3607 = vadd.xlane.f32.xlu0 %v9556_v15 }
 0x888   : > { %v9560_v26 = vpop.eup %7977  ;;  %7987 = vpow2.f32 %v3587_v51  ;;  %v3589_v35 = vmul.f32 1.442695, %v3558_v3 }
 0x889   : > { %3609 = vadd.xlane.f32.xlu1 %v9560_v26 }
 0x88a   : > { %v9563_v52 = vpop.eup %7979  ;;  %7989 = vpow2.f32 %v3589_v35 }
 0x88b   : > { %3611 = vadd.xlane.f32.xlu0 %v9563_v52 }
 0x88c   : > { %v9566_v38 = vpop.eup %7981 }
 0x88d   : > { %3613 = vadd.xlane.f32.xlu1 %v9566_v38 }
 0x88e   : > { %v9569_v7 = vpop.eup %7983 }
 0x88f   : > { %3615 = vadd.xlane.f32.xlu0 %v9569_v7 }
 0x890   : > { %v9572_v29 = vpop.eup %7985 }
 0x891   : > { %3617 = vadd.xlane.f32.xlu1 %v9572_v29 }
 0x892   : > { %v9575_v39 = vpop.eup %7987 }
 0x893   : > { %3619 = vadd.xlane.f32.xlu0 %v9575_v39 }
 0x894   : > { %v9578_v4 = vpop.eup %7989  ;;  %v7119_v50 = vpop.f32.mrb[64].mxu0 }
 0x895   : > { %v2506_v10 = vpop.f32.mrb[65].mxu0  ;;  %3621 = vadd.xlane.f32.xlu1 %v9578_v4 }
 0x896   : > { %v7120_v36 = vpop.f32.mrb[66].mxu0 }
 0x897   : > { %v2570_v57 = vpack.c.bf16 %v7120_v36, %v7119_v50  ;;  %v2509_v53 = vpop.f32.mrb[67].mxu0 }
 0x898   : > { %v2569_v16 = vpack.c.bf16 %v2509_v53, %v2506_v10 }
 0x89a   : > { %7137 = vmatprep.mubr.msk.bf16.mxu0 %vm1234_vm0, %v2569_v16 }
 0x89b   : > { %7138 = vmatmul.mubr.msk.bf16.vlgmr.msra.gmra.mrb[80].mxu0 %vm1234_vm0, %v2570_v57 }
 0x89c   : > { %v7123_v19 = vpop.f32.mrb[68].mxu0  ;;  %7154 = vmatpush3.bf16.msra.mxu0 %v9514_v62 }
 0x89d   : > { %v2522_v0 = vpop.f32.mrb[69].mxu0  ;;  %7155 = vmatprep.subr.bf16.mxu0 %v7738_v27 }
 0x89e   : > { %v7124_v47 = vpop.f32.mrb[70].mxu0 }
 0x89f   : > { %v2572_v5 = vpack.c.bf16 %v7124_v47, %v7123_v19  ;;  %v2525_v24 = vpop.f32.mrb[71].mxu0  ;;  %v10496_v47 = vpack.c.bf16 %v9021_v33, %v9015_v55  ;;  %v7741_v55 = vld [vmem:[%s10454_s5 + $0x90] sm:$0xff]   ;;  %v7742_v33 = vld [vmem:[%s10454_s5 + $0x98] sm:$0xff]  }
 0x8a0   : > { %v2571_v51 = vpack.c.bf16 %v2525_v24, %v2522_v0  ;;  %7156 = vmatpush3.bf16.msra.mxu0 %v7738_v27  ;;  %v10497_v24 = vpack.c.bf16 %v9017_v30, %v9013_v44  ;;  %v10499_v44 = vpack.c.bf16 %v9029_v37, %v9025_v12  ;;  %v10500_v30 = vpack.c.bf16 %v9045_v9, %v9039_v43  ;;  %v10501_v12 = vld [vmem:[#allocation7_spill] sm:$0xff]  ;;  %v10502_v37 = vld [vmem:[#allocation6_spill] sm:$0xff]  ;;  %v10505_v9 = vld [vmem:[#allocation9_spill] sm:$0xff] }
 0x8a1   : > { %7237 = vmatprep.subr.bf16.mxu0 %v7739_v63  ;;  %v10504_v43 = vld [vmem:[#allocation11_spill] sm:$0xff] }
 0x8a2   : > { %7141 = vmatprep.mubr.msk.bf16.mxu0 %vm1234_vm0, %v2571_v51  ;;  %v10498_v51 = vpack.c.bf16 %v9033_v32, %v9027_v40  ;;  %v7743_v40 = vld [vmem:[%s10454_s5 + $0xa0] sm:$0xff]   ;;  %v7744_v32 = vld [vmem:[%s10454_s5 + $0xa8] sm:$0xff]  }
 0x8a3   : > { %7142 = vmatmul.mubr.msk.bf16.gmra.mrb[84].mxu0 %vm1234_vm0, %v2572_v5  ;;  %v7740_v5 = vld [vmem:[%s10454_s5 + $0x88] sm:$0xff]  }
 0x8a4   : > { %v7127_v3 = vpop.f32.mrb[72].mxu0 }
 0x8a5   : > { %v2538_v35 = vpop.f32.mrb[73].mxu0 }
 0x8a6   : > { %v7128_v50 = vpop.f32.mrb[74].mxu0 }
 0x8a7   : > { %v2574_v62 = vpack.c.bf16 %v7128_v50, %v7127_v3  ;;  %v2541_v10 = vpop.f32.mrb[75].mxu0  ;;  %v10506_v3 = vpack.c.bf16 %v10504_v43, %v10505_v9  ;;  %v7746_v50 = vld [vmem:[%s10454_s5 + $0xb8] sm:$0xff]  }
 0x8a8   : > { %v2573_v36 = vpack.c.bf16 %v2541_v10, %v2538_v35  ;;  %v7745_v35 = vld [vmem:[%s10454_s5 + $0xb0] sm:$0xff]  }
 0x8a9   : > { %v10508_v10 = vld [vmem:[#allocation8_spill] sm:$0xff] }
 0x8aa   : > { %7145 = vmatprep.mubr.msk.bf16.mxu0 %vm1234_vm0, %v2573_v36 }
 0x8ab   : > { %7146 = vmatmul.mubr.msk.bf16.gmra.mrb[88].mxu0 %vm1234_vm0, %v2574_v62  ;;  %v10507_v62 = vld [vmem:[#allocation10_spill] sm:$0xff] }
 0x8ac   : > { %v7131_v57 = vpop.f32.mrb[76].mxu0  ;;  %v10509_v36 = vpack.c.bf16 %v10507_v62, %v10508_v10 }
 0x8ad   : > { %v2554_v53 = vpop.f32.mrb[77].mxu0 }
 0x8ae   : > { %v7132_v16 = vpop.f32.mrb[78].mxu0 }
 0x8af   : > { %v2576_v19 = vpack.c.bf16 %v7132_v16, %v7131_v57  ;;  %v2557_v27 = vpop.f32.mrb[79].mxu0 }
 0x8b0   : > { %v2575_v0 = vpack.c.bf16 %v2557_v27, %v2554_v53 }
 0x8b2   : > { %7149 = vmatprep.mubr.msk.bf16.mxu0 %vm1234_vm0, %v2575_v0 }
 0x8b3   : > { %7150 = vmatmul.mubr.msk.bf16.gmra.mrb[92].mxu0 %vm1234_vm0, %v2576_v19 }
 0x8b4   : > { %7157 = vmatprep.mubr.msk.bf16.mxu0 %vm1234_vm0, %v10496_v47 }
 0x8bb   : > { %7158 = vmatmul.mubr.msk.bf16.vlgmr.msra.gmra.mrb[80].mxu0 %vm1234_vm0, %v10497_v24 }
 0x8bc   : > { %7161 = vmatprep.mubr.msk.bf16.mxu0 %vm1234_vm0, %v10498_v51  ;;  %7238 = vmatpush3.bf16.msra.mxu0 %v7739_v63  ;;  %v10503_v63 = vpack.c.bf16 %v10501_v12, %v10502_v37 }
 0x8bd   : > { %7239 = vmatprep.subr.bf16.mxu0 %v7740_v5 }
 0x8c0   : > { %7240 = vmatpush3.bf16.msra.mxu0 %v7740_v5 }
 0x8c1   : > { %7241 = vmatprep.subr.bf16.mxu0 %v7741_v55 }
 0x8c3   : > { %7162 = vmatmul.mubr.msk.bf16.gmra.mrb[84].mxu0 %vm1234_vm0, %v10499_v44 }
 0x8c4   : > { %7165 = vmatprep.mubr.msk.bf16.mxu0 %vm1234_vm0, %v10500_v30  ;;  %7242 = vmatpush3.bf16.msra.mxu0 %v7741_v55 }
 0x8c5   : > { %7243 = vmatprep.subr.bf16.mxu0 %v7742_v33 }
 0x8c8   : > { %7244 = vmatpush3.bf16.msra.mxu0 %v7742_v33 }
 0x8c9   : > { %7245 = vmatprep.subr.bf16.mxu0 %v7743_v40 }
 0x8cb   : > { %7166 = vmatmul.mubr.msk.bf16.gmra.mrb[88].mxu0 %vm1234_vm0, %v10503_v63 }
 0x8cc   : > { %7169 = vmatprep.mubr.msk.bf16.mxu0 %vm1234_vm0, %v10506_v3  ;;  %7246 = vmatpush3.bf16.msra.mxu0 %v7743_v40 }
 0x8cd   : > { %7247 = vmatprep.subr.bf16.mxu0 %v7744_v32 }
 0x8d0   : > { %7248 = vmatpush3.bf16.msra.mxu0 %v7744_v32 }
 0x8d1   : > { %7249 = vmatprep.subr.bf16.mxu0 %v7745_v35 }
 0x8d3   : > { %7170 = vmatmul.mubr.msk.bf16.gmra.mrb[92].mxu0 %vm1234_vm0, %v10509_v36 }
 0x8d4   : > { %7250 = vmatpush3.bf16.msra.mxu0 %v7745_v35  ;;  %7253 = vmatprep.mubr.bf16.mxu0 %v8583_v42 }
 0x8d5   : > { %7251 = vmatprep.subr.bf16.mxu0 %v7746_v50 }
 0x8d8   : > { %7252 = vmatpush3.bf16.msra.mxu0 %v7746_v50 }
 0x8db   : > { %7254 = vmatmul.mubr.bf16.vlgmr.msra.gmra.mrb[96].mxu0 %v8593_v59 }
 0x8dc   : > { %7257 = vmatprep.mubr.bf16.mxu0 %v8607_v17 }
 0x8e3   : > { %7258 = vmatmul.mubr.bf16.gmra.mrb[100].mxu0 %v8620_v14 }
 0x8e4   : > { %7261 = vmatprep.mubr.bf16.mxu0 %v8633_v34 }
 0x8eb   : > { %7262 = vmatmul.mubr.bf16.gmra.mrb[104].mxu0 %v8646_v45 }
 0x8ec   : > { %7265 = vmatprep.mubr.bf16.mxu0 %v8658_v13 }
 0x8f3   : > { %7266 = vmatmul.mubr.bf16.gmra.mrb[108].mxu0 %v8668_v21 }
 0x904   : > { %v3592_v57 = vpop.xlane.xlu0 %3591 }
 0x905   : > { %7991 = vrcp.f32 %v3592_v57 }
 0x906   : > { %v3594_v53 = vpop.xlane.xlu1 %3593 }
 0x907   : > { %7993 = vrcp.f32 %v3594_v53 }
 0x908   : > { %v3596_v40 = vpop.xlane.xlu0 %3595 }
 0x90a   : > { %v3598_v55 = vpop.xlane.xlu1 %3597 }
 0x90b   : > { %7995 = vrcp.f32 %v3598_v55 }
 0x90e   : > { %v3602_v12 = vpop.xlane.xlu1 %3601 }
 0x90f   : > { %v7992_v16 = vpop.eup %7991  ;;  %7997 = vrcp.f32 %v3602_v12 }
 0x910   : > { %v3639_v27 = vmul.f32 %v7992_v16, %v9524_v56  ;;  %v3600_v56 = vpop.xlane.xlu0 %3599  ;;  %7999 = vrcp.f32 %v3596_v40 }
 0x911   : > { %v7994_v19 = vpop.eup %7993  ;;  %8001 = vrcp.f32 %v3600_v56 }
 0x912   : > { %v3640_v0 = vmul.f32 %v7994_v19, %v9528_v41  ;;  %v3606_v3 = vpop.xlane.xlu1 %3605 }
 0x913   : > { %8003 = vrcp.f32 %v3606_v3 }
 0x914   : > { %v3655_v47 = vpack.c.bf16 %v3640_v0, %v3639_v27  ;;  %v3604_v50 = vpop.xlane.xlu0 %3603 }
 0x916   : > { %7317 = vmatprep.mubr.bf16.mxu0 %v3655_v47  ;;  %v3610_v16 = vpop.xlane.xlu1 %3609 }
 0x917   : > { %8005 = vrcp.f32 %v3610_v16 }
 0x918   : > { %v3608_v19 = vpop.xlane.xlu0 %3607  ;;  %8007 = vrcp.f32 %v3604_v50 }
 0x919   : > { %8009 = vrcp.f32 %v3608_v19 }
 0x9ae   : > { %v7255_v5 = vpop.f32.mrb[96].mxu0 }
 0x9af   : > { %v3287_v24 = vpop.f32.mrb[97].mxu0 }
 0x9b0   : > { %v7256_v51 = vpop.f32.mrb[98].mxu0 }
 0x9b1   : > { %v3664_v33 = vpack.c.bf16 %v7256_v51, %v7255_v5  ;;  %v3290_v44 = vpop.f32.mrb[99].mxu0  ;;  %v3614_v5 = vpop.xlane.xlu1 %3613 }
 0x9b2   : > { %v3663_v30 = vpack.c.bf16 %v3290_v44, %v3287_v24  ;;  %v3612_v44 = vpop.xlane.xlu0 %3611  ;;  %8011 = vrcp.f32 %v3614_v5 }
 0x9b4   : > { %7301 = vmatprep.subr.bf16.mxu0 %v3663_v30 }
 0x9b5   : > { %7302 = vmatpush3.bf16.msra.mxu0 %v3663_v30 }
 0x9b6   : > { %v7259_v32 = vpop.f32.mrb[100].mxu0  ;;  %7303 = vmatprep.subr.bf16.mxu0 %v3664_v33 }
 0x9b7   : > { %v3303_v37 = vpop.f32.mrb[101].mxu0 }
 0x9b8   : > { %v7260_v63 = vpop.f32.mrb[102].mxu0 }
 0x9b9   : > { %v3666_v43 = vpack.c.bf16 %v7260_v63, %v7259_v32  ;;  %v3306_v41 = vpop.f32.mrb[103].mxu0  ;;  %7304 = vmatpush3.bf16.msra.mxu0 %v3664_v33  ;;  %v7996_v33 = vpop.eup %7995 }
 0x9ba   : > { %v3665_v9 = vpack.c.bf16 %v3306_v41, %v3303_v37  ;;  %v7998_v30 = vpop.eup %7997  ;;  %v3642_v12 = vmul.f32 %v7996_v33, %v9536_v31  ;;  %v7747_v37 = vld [vmem:[%s10455_s6 + $0x20] sm:$0xff]   ;;  %v3618_v63 = vpop.xlane.xlu1 %3617  ;;  %v7748_v31 = vld [vmem:[%s10455_s6 + $0x28] sm:$0xff]  }
 0x9bb   : > { %v8000_v40 = vpop.eup %7999  ;;  %v3644_v56 = vmul.f32 %v7998_v30, %v9544_v61  ;;  %v3616_v41 = vpop.xlane.xlu0 %3615  ;;  %8013 = vrcp.f32 %v3618_v63 }
 0x9bc   : > { %7305 = vmatprep.subr.bf16.mxu0 %v3665_v9  ;;  %v8002_v32 = vpop.eup %8001  ;;  %8015 = vrcp.f32 %v3612_v44 }
 0x9bd   : > { %7306 = vmatpush3.bf16.msra.mxu0 %v3665_v9  ;;  %v3643_v9 = vmul.f32 %v8002_v32, %v9540_v28  ;;  %8017 = vrcp.f32 %v3616_v41 }
 0x9be   : > { %v7263_v35 = vpop.f32.mrb[104].mxu0  ;;  %7307 = vmatprep.subr.bf16.mxu0 %v3666_v43 }
 0x9bf   : > { %v3319_v62 = vpop.f32.mrb[105].mxu0  ;;  %v3657_v50 = vpack.c.bf16 %v3644_v56, %v3643_v9  ;;  %v7750_v56 = vld [vmem:[%s10453_s4 + $0xc8] sm:$0xff]  }
 0x9c0   : > { %v7264_v10 = vpop.f32.mrb[106].mxu0 }
 0x9c1   : > { %v3668_v36 = vpack.c.bf16 %v7264_v10, %v7263_v35  ;;  %v3322_v57 = vpop.f32.mrb[107].mxu0  ;;  %7308 = vmatpush3.bf16.msra.mxu0 %v3666_v43  ;;  %v3641_v43 = vmul.f32 %v8000_v40, %v9532_v48  ;;  %v8004_v35 = vpop.eup %8003 }
 0x9c2   : > { %v3667_v53 = vpack.c.bf16 %v3322_v57, %v3319_v62  ;;  %v8006_v62 = vpop.eup %8005  ;;  %v3622_v10 = vpop.xlane.xlu1 %3621  ;;  %v3646_v28 = vmul.f32 %v8004_v35, %v9552_v6  ;;  %v7752_v35 = vld [vmem:[%s10453_s4 + $0xd8] sm:$0xff]  }
 0x9c3   : > { %v3656_v3 = vpack.c.bf16 %v3642_v12, %v3641_v43  ;;  %v8008_v61 = vpop.eup %8007  ;;  %v3620_v57 = vpop.xlane.xlu0 %3619  ;;  %8019 = vrcp.f32 %v3622_v10  ;;  %v7751_v43 = vld [vmem:[%s10453_s4 + $0xd0] sm:$0xff]  }
 0x9c4   : > { %7309 = vmatprep.subr.bf16.mxu0 %v3667_v53  ;;  %v8010_v48 = vpop.eup %8009  ;;  %8021 = vrcp.f32 %v3620_v57  ;;  %v7754_v57 = vld [vmem:[%s10453_s4 + $0xe8] sm:$0xff]  }
 0x9c5   : > { %7310 = vmatpush3.bf16.msra.mxu0 %v3667_v53  ;;  %v3645_v53 = vmul.f32 %v8008_v61, %v9548_v20  ;;  %v3647_v16 = vmul.f32 %v8010_v48, %v9556_v15  ;;  %v7753_v61 = vld [vmem:[%s10453_s4 + $0xe0] sm:$0xff]  }
 0x9c6   : > { %v7267_v27 = vpop.f32.mrb[108].mxu0  ;;  %7311 = vmatprep.subr.bf16.mxu0 %v3668_v36 }
 0x9c7   : > { %v3335_v0 = vpop.f32.mrb[109].mxu0  ;;  %v3658_v19 = vpack.c.bf16 %v3646_v28, %v3645_v53 }
 0x9c8   : > { %v7268_v47 = vpop.f32.mrb[110].mxu0 }
 0x9c9   : > { %v3670_v24 = vpack.c.bf16 %v7268_v47, %v7267_v27  ;;  %v3338_v51 = vpop.f32.mrb[111].mxu0  ;;  %7312 = vmatpush3.bf16.msra.mxu0 %v3668_v36  ;;  %v3648_v36 = vmul.f32 %v8006_v62, %v9560_v26  ;;  %v8012_v27 = vpop.eup %8011 }
 0x9ca   : > { %v3669_v55 = vpack.c.bf16 %v3338_v51, %v3335_v0  ;;  %v8014_v47 = vpop.eup %8013  ;;  %v3650_v6 = vmul.f32 %v8012_v27, %v9566_v38  ;;  %v7749_v38 = vld [vmem:[%s10453_s4 + $0xc0] sm:$0xff]  }
 0x9cb   : > { %v3659_v0 = vpack.c.bf16 %v3648_v36, %v3647_v16  ;;  %v8016_v5 = vpop.eup %8015  ;;  %v3652_v26 = vmul.f32 %v8014_v47, %v9572_v29 }
 0x9cc   : > { %7313 = vmatprep.subr.bf16.mxu0 %v3669_v55  ;;  %v3649_v51 = vmul.f32 %v8016_v5, %v9563_v52 }
 0x9cd   : > { %7314 = vmatpush3.bf16.msra.mxu0 %v3669_v55 }
 0x9ce   : > { %7315 = vmatprep.subr.bf16.mxu0 %v3670_v24  ;;  %v3660_v55 = vpack.c.bf16 %v3650_v6, %v3649_v51  ;;  %v10510_v6 = vpack.c.bf16 %v9463_v60, %v9461_v2 }
 0x9d1   : > { %7316 = vmatpush3.bf16.msra.mxu0 %v3670_v24  ;;  %v8018_v24 = vpop.eup %8017 }
 0x9d2   : > { %7333 = vmatprep.subr.bf16.mxu0 %v7747_v37  ;;  %v3651_v20 = vmul.f32 %v8018_v24, %v9569_v7  ;;  %v8020_v15 = vpop.eup %8019  ;;  %v7756_v24 = vld [vmem:[%s10453_s4 + $0xf8] sm:$0xff]  }
 0x9d3   : > { %v8022_v44 = vpop.eup %8021  ;;  %v3654_v30 = vmul.f32 %v8020_v15, %v9578_v4 }
 0x9d4   : > { %7318 = vmatmul.mubr.bf16.vlgmr.msra.gmra.mrb[112].mxu0 %v3656_v3  ;;  %v3661_v33 = vpack.c.bf16 %v3652_v26, %v3651_v20  ;;  %v3653_v40 = vmul.f32 %v8022_v44, %v9575_v39 }
 0x9d5   : > { %7321 = vmatprep.mubr.bf16.mxu0 %v3657_v50  ;;  %7334 = vmatpush3.bf16.msra.mxu0 %v7747_v37 }
 0x9d6   : > { %7335 = vmatprep.subr.bf16.mxu0 %v7748_v31  ;;  %v3662_v32 = vpack.c.bf16 %v3654_v30, %v3653_v40 }
 0x9d9   : > { %7336 = vmatpush3.bf16.msra.mxu0 %v7748_v31 }
 0x9da   : > { %7385 = vmatprep.subr.bf16.mxu0 %v7749_v38 }
 0x9dc   : > { %7322 = vmatmul.mubr.bf16.gmra.mrb[116].mxu0 %v3658_v19  ;;  %v7755_v19 = vld [vmem:[%s10453_s4 + $0xf0] sm:$0xff]  }
 0x9dd   : > { %7325 = vmatprep.mubr.bf16.mxu0 %v3659_v0 }
 0x9e4   : > { %7326 = vmatmul.mubr.bf16.gmra.mrb[120].mxu0 %v3660_v55 }
 0x9e5   : > { %7329 = vmatprep.mubr.bf16.mxu0 %v3661_v33 }
 0x9ec   : > { %7330 = vmatmul.mubr.bf16.gmra.mrb[124].mxu0 %v3662_v32 }
 0xaa7   : > { %v7319_v52 = vpop.f32.mrb[112].mxu0 }
 0xaa8   : > { %v3705_v29 = vpop.f32.mrb[113].mxu0 }
 0xaa9   : > { %v7320_v7 = vpop.f32.mrb[114].mxu0 }
 0xaaa   : > { %v3769_v12 = vpack.c.bf16 %v7320_v7, %v7319_v52  ;;  %v3708_v37 = vpop.f32.mrb[115].mxu0 }
 0xaab   : > { %v3768_v63 = vpack.c.bf16 %v3708_v37, %v3705_v29 }
 0xaad   : > { %7337 = vmatprep.mubr.msk.bf16.mxu0 %vm1234_vm0, %v3768_v63 }
 0xaae   : > { %7338 = vmatmul.mubr.msk.bf16.vlgmr.msra.gmra.mrb[80].mxu0 %vm1234_vm0, %v3769_v12 }
 0xaaf   : > { %v7323_v39 = vpop.f32.mrb[116].mxu0  ;;  %7386 = vmatpush3.bf16.msra.mxu0 %v7749_v38 }
 0xab0   : > { %v3721_v4 = vpop.f32.mrb[117].mxu0  ;;  %7387 = vmatprep.subr.bf16.mxu0 %v7750_v56 }
 0xab1   : > { %v7324_v41 = vpop.f32.mrb[118].mxu0 }
 0xab2   : > { %v3771_v9 = vpack.c.bf16 %v7324_v41, %v7323_v39  ;;  %v3724_v3 = vpop.f32.mrb[119].mxu0 }
 0xab3   : > { %v3770_v31 = vpack.c.bf16 %v3724_v3, %v3721_v4  ;;  %7388 = vmatpush3.bf16.msra.mxu0 %v7750_v56  ;;  %v10512_v3 = vpack.c.bf16 %v9478_v49, %v9476_v1  ;;  %v10518_v49 = vld [vmem:[#allocation13_spill] sm:$0xff] }
 0xab4   : > { %7389 = vmatprep.subr.bf16.mxu0 %v7751_v43 }
 0xab5   : > { %7341 = vmatprep.mubr.msk.bf16.mxu0 %vm1234_vm0, %v3770_v31  ;;  %v10513_v31 = vpack.c.bf16 %v9474_v23, %v9472_v8 }
 0xab6   : > { %7342 = vmatmul.mubr.msk.bf16.gmra.mrb[84].mxu0 %vm1234_vm0, %v3771_v9  ;;  %v10511_v9 = vpack.c.bf16 %v9459_v11, %v9457_v46  ;;  %v10515_v46 = vpack.c.bf16 %v9489_v22, %v9487_v58  ;;  %v10516_v11 = vld [vmem:[#allocation14_spill] sm:$0xff] }
 0xab7   : > { %v7327_v50 = vpop.f32.mrb[120].mxu0  ;;  %7390 = vmatpush3.bf16.msra.mxu0 %v7751_v43  ;;  %v10517_v1 = vpack.c.bf16 %v9505_v25, %v10516_v11 }
 0xab8   : > { %v3737_v62 = vpop.f32.mrb[121].mxu0  ;;  %7391 = vmatprep.subr.bf16.mxu0 %v7752_v35 }
 0xab9   : > { %v7328_v48 = vpop.f32.mrb[122].mxu0 }
 0xaba   : > { %v3773_v10 = vpack.c.bf16 %v7328_v48, %v7327_v50  ;;  %v3740_v28 = vpop.f32.mrb[123].mxu0  ;;  %v10519_v50 = vld [vmem:[#allocation12_spill] sm:$0xff] }
 0xabb   : > { %v3772_v36 = vpack.c.bf16 %v3740_v28, %v3737_v62  ;;  %7392 = vmatpush3.bf16.msra.mxu0 %v7752_v35  ;;  %v10514_v35 = vpack.c.bf16 %v9493_v54, %v9491_v18  ;;  %v10520_v8 = vpack.c.bf16 %v10518_v49, %v10519_v50 }
 0xabc   : > { %7393 = vmatprep.subr.bf16.mxu0 %v7753_v61 }
 0xabd   : > { %7345 = vmatprep.mubr.msk.bf16.mxu0 %vm1234_vm0, %v3772_v36 }
 0xabe   : > { %7346 = vmatmul.mubr.msk.bf16.gmra.mrb[88].mxu0 %vm1234_vm0, %v3773_v10 }
 0xabf   : > { %v7331_v53 = vpop.f32.mrb[124].mxu0  ;;  %7394 = vmatpush3.bf16.msra.mxu0 %v7753_v61 }
 0xac0   : > { %v3753_v16 = vpop.f32.mrb[125].mxu0  ;;  %7395 = vmatprep.subr.bf16.mxu0 %v7754_v57 }
 0xac1   : > { %v7332_v27 = vpop.f32.mrb[126].mxu0 }
 0xac2   : > { %v3775_v0 = vpack.c.bf16 %v7332_v27, %v7331_v53  ;;  %v3756_v47 = vpop.f32.mrb[127].mxu0 }
 0xac3   : > { %v3774_v5 = vpack.c.bf16 %v3756_v47, %v3753_v16  ;;  %7396 = vmatpush3.bf16.msra.mxu0 %v7754_v57 }
 0xac4   : > { %7397 = vmatprep.subr.bf16.mxu0 %v7755_v19 }
 0xac5   : > { %7349 = vmatprep.mubr.msk.bf16.mxu0 %vm1234_vm0, %v3774_v5 }
 0xac6   : > { %7350 = vmatmul.mubr.msk.bf16.gmra.mrb[92].mxu0 %vm1234_vm0, %v3775_v0 }
 0xac7   : > { %7398 = vmatpush3.bf16.msra.mxu0 %v7755_v19  ;;  %7401 = vmatprep.mubr.bf16.mxu0 %v8583_v42 }
 0xac8   : > { %7399 = vmatprep.subr.bf16.mxu0 %v7756_v24 }
 0xacb   : > { %7400 = vmatpush3.bf16.msra.mxu0 %v7756_v24 }
 0xace   : > { %7402 = vmatmul.mubr.bf16.vlgmr.msra.gmra.mrb[128].mxu0 %v8593_v59 }
 0xacf   : > { %7405 = vmatprep.mubr.bf16.mxu0 %v8607_v17 }
 0xad6   : > { %7406 = vmatmul.mubr.bf16.gmra.mrb[132].mxu0 %v8620_v14 }
 0xad7   : > { %7409 = vmatprep.mubr.bf16.mxu0 %v8633_v34 }
 0xade   : > { %7410 = vmatmul.mubr.bf16.gmra.mrb[136].mxu0 %v8646_v45 }
 0xadf   : > { %7413 = vmatprep.mubr.bf16.mxu0 %v8658_v13 }
 0xae6   : > { %7414 = vmatmul.mubr.bf16.gmra.mrb[140].mxu0 %v8668_v21 }
 0xae7   : > { %7465 = vmatprep.mubr.msk.bf16.mxu0 %vm1234_vm0, %v10510_v6 }
 0xba1   : > { %v7403_v42 = vpop.f32.mrb[128].mxu0 }
 0xba2   : > { %v4207_v26 = vpop.f32.mrb[129].mxu0 }
 0xba3   : > { %v7404_v59 = vpop.f32.mrb[130].mxu0 }
 0xba4   : > { %v4441_v51 = vpack.c.bf16 %v7404_v59, %v7403_v42  ;;  %v4210_v17 = vpop.f32.mrb[131].mxu0 }
 0xba5   : > { %v4440_v20 = vpack.c.bf16 %v4210_v17, %v4207_v26 }
 0xba6   : > { %v4476_v55 = vsel %vm1234_vm0, %v4441_v51, 0 }
 0xba7   : > { %v4473_v14 = vsel %vm1234_vm0, %v4440_v20, 0  ;;  %7605 = vmatprep.subr.msk.bf16.mxu0 %vm1234_vm0, %v4440_v20 }
 0xba8   : > { %7450 = vmatpush3.bf16.xpose.msra.mxu0 %v4473_v14 }
 0xba9   : > { %v7407_v34 = vpop.f32.mrb[132].mxu0  ;;  %7606 = vmatprep.subr.msk.bf16.mxu0 %vm1234_vm0, %v4441_v51 }
 0xbaa   : > { %v4223_v45 = vpop.f32.mrb[133].mxu0 }
 0xbab   : > { %v7408_v13 = vpop.f32.mrb[134].mxu0 }
 0xbac   : > { %v4443_v21 = vpack.c.bf16 %v7408_v13, %v7407_v34  ;;  %v4226_v2 = vpop.f32.mrb[135].mxu0 }
 0xbad   : > { %v4442_v60 = vpack.c.bf16 %v4226_v2, %v4223_v45 }
 0xbae   : > { %v4482_v56 = vsel %vm1234_vm0, %v4443_v21, 0 }
 0xbaf   : > { %v4479_v38 = vsel %vm1234_vm0, %v4442_v60, 0 }
 0xbb0   : > { %7452 = vmatpush3.bf16.xpose.msra.mxu0 %v4476_v55 }
 0xbb1   : > { %v7411_v15 = vpop.f32.mrb[136].mxu0  ;;  %7607 = vmatprep.subr.msk.bf16.mxu0 %vm1234_vm0, %v4442_v60 }
 0xbb2   : > { %v4239_v33 = vpop.f32.mrb[137].mxu0 }
 0xbb3   : > { %v7412_v44 = vpop.f32.mrb[138].mxu0 }
 0xbb4   : > { %v4445_v30 = vpack.c.bf16 %v7412_v44, %v7411_v15  ;;  %v4242_v40 = vpop.f32.mrb[139].mxu0 }
 0xbb5   : > { %v4444_v32 = vpack.c.bf16 %v4242_v40, %v4239_v33 }
 0xbb6   : > { %v4488_v4 = vsel %vm1234_vm0, %v4445_v30, 0 }
 0xbb7   : > { %v4485_v39 = vsel %vm1234_vm0, %v4444_v32, 0 }
 0xbb8   : > { %7454 = vmatpush3.bf16.xpose.msra.mxu0 %v4479_v38 }
 0xbb9   : > { %v7415_v52 = vpop.f32.mrb[140].mxu0  ;;  %7608 = vmatprep.subr.msk.bf16.mxu0 %vm1234_vm0, %v4443_v21 }
 0xbba   : > { %v4255_v29 = vpop.f32.mrb[141].mxu0 }
 0xbbb   : > { %v7416_v7 = vpop.f32.mrb[142].mxu0 }
 0xbbc   : > { %v4447_v12 = vpack.c.bf16 %v7416_v7, %v7415_v52  ;;  %v4258_v37 = vpop.f32.mrb[143].mxu0 }
 0xbbd   : > { %v4446_v63 = vpack.c.bf16 %v4258_v37, %v4255_v29 }
 0xbbe   : > { %v4494_v41 = vsel %vm1234_vm0, %v4447_v12, 0 }
 0xbbf   : > { %v4491_v43 = vsel %vm1234_vm0, %v4446_v63, 0 }
 0xbc0   : > { %7456 = vmatpush3.bf16.xpose.msra.mxu0 %v4482_v56 }
 0xbc1   : > { %7609 = vmatprep.subr.msk.bf16.mxu0 %vm1234_vm0, %v4444_v32 }
 0xbc8   : > { %7458 = vmatpush3.bf16.xpose.msra.mxu0 %v4485_v39 }
 0xbc9   : > { %7610 = vmatprep.subr.msk.bf16.mxu0 %vm1234_vm0, %v4445_v30 }
 0xbd0   : > { %7460 = vmatpush3.bf16.xpose.msra.mxu0 %v4488_v4 }
 0xbd1   : > { %7611 = vmatprep.subr.msk.bf16.mxu0 %vm1234_vm0, %v4446_v63 }
 0xbd8   : > { %7462 = vmatpush3.bf16.xpose.msra.mxu0 %v4491_v43 }
 0xbd9   : > { %7612 = vmatprep.subr.msk.bf16.mxu0 %vm1234_vm0, %v4447_v12 }
 0xbe0   : > { %7464 = vmatpush3.bf16.xpose.msra.mxu0 %v4494_v41 }
 0xbe7   : > { %7466 = vmatmul.mubr.msk.bf16.vlgmr.msra.gmra.mrb[144].mxu0 %vm1234_vm0, %v10511_v9 }
 0xbe8   : > { %7469 = vmatprep.mubr.msk.bf16.mxu0 %vm1234_vm0, %v10512_v3 }
 0xbef   : > { %7470 = vmatmul.mubr.msk.bf16.gmra.mrb[148].mxu0 %vm1234_vm0, %v10513_v31 }
 0xbf0   : > { %7473 = vmatprep.mubr.msk.bf16.mxu0 %vm1234_vm0, %v10514_v35 }
 0xbf7   : > { %7474 = vmatmul.mubr.msk.bf16.gmra.mrb[152].mxu0 %vm1234_vm0, %v10515_v46 }
 0xbf8   : > { %7477 = vmatprep.mubr.msk.bf16.mxu0 %vm1234_vm0, %v10517_v1 }
 0xbff   : > { %7478 = vmatmul.mubr.msk.bf16.gmra.mrb[156].mxu0 %vm1234_vm0, %v10520_v8 }
 0xcba   : > { %v7467_v23 = vpop.f32.mrb[144].mxu0 }
 0xcbb   : > { %v4530_v62 = vpop.f32.mrb[145].mxu0 }
 0xcbc   : > { %4593 = vmax.xlane.f32.xlu0 %v4530_v62  ;;  %v7468_v18 = vpop.f32.mrb[146].mxu0 }
 0xcbd   : > { %v4533_v54 = vpop.f32.mrb[147].mxu0 }
 0xcbe   : > { %4595 = vmax.xlane.f32.xlu1 %v4533_v54 }
 0xcc0   : > { %4597 = vmax.xlane.f32.xlu0 %v7467_v23 }
 0xcc2   : > { %4599 = vmax.xlane.f32.xlu1 %v7468_v18  ;;  %v7471_v58 = vpop.f32.mrb[148].mxu0 }
 0xcc3   : > { %v4546_v22 = vpop.f32.mrb[149].mxu0 }
 0xcc4   : > { %4601 = vmax.xlane.f32.xlu0 %v4546_v22  ;;  %v7472_v61 = vpop.f32.mrb[150].mxu0 }
 0xcc5   : > { %v4549_v25 = vpop.f32.mrb[151].mxu0 }
 0xcc6   : > { %4603 = vmax.xlane.f32.xlu1 %v4549_v25 }
 0xcc8   : > { %4605 = vmax.xlane.f32.xlu0 %v7471_v58 }
 0xcca   : > { %4607 = vmax.xlane.f32.xlu1 %v7472_v61  ;;  %v9767_v48 = vpop.f32.mrb[152].mxu0 }
 0xccb   : > { %v4562_v10 = vpop.f32.mrb[153].mxu0 }
 0xccc   : > { %4609 = vmax.xlane.f32.xlu0 %v4562_v10  ;;  %v9769_v28 = vpop.f32.mrb[154].mxu0 }
 0xccd   : > { %v4565_v36 = vpop.f32.mrb[155].mxu0 }
 0xcce   : > { %4611 = vmax.xlane.f32.xlu1 %v4565_v36 }
 0xcd0   : > { %4613 = vmax.xlane.f32.xlu0 %v9767_v48 }
 0xcd2   : > { %4615 = vmax.xlane.f32.xlu1 %v9769_v28  ;;  %v9773_v57 = vpop.f32.mrb[156].mxu0 }
 0xcd3   : > { %v9775_v53 = vpop.f32.mrb[157].mxu0 }
 0xcd4   : > { %4617 = vmax.xlane.f32.xlu0 %v9775_v53  ;;  %v9778_v16 = vpop.f32.mrb[158].mxu0 }
 0xcd5   : > { %v9780_v19 = vpop.f32.mrb[159].mxu0 }
 0xcd6   : > { %4619 = vmax.xlane.f32.xlu1 %v9780_v19 }
 0xcd8   : > { %4621 = vmax.xlane.f32.xlu0 %v9773_v57 }
 0xcda   : > { %4623 = vmax.xlane.f32.xlu1 %v9778_v16 }
 0xd49   : > { %v4594_v27 = vpop.xlane.xlu0 %4593 }
 0xd4a   : > { %v4625_v0 = vsub.f32 %v4530_v62, %v4594_v27  ;;  %v7757_v27 = vld [vmem:[%s10455_s6 + $0x30] sm:$0xff]  }
 0xd4b   : > { %v4596_v47 = vpop.xlane.xlu1 %4595  ;;  %7513 = vmatprep.subr.bf16.mxu0 %v7757_v27 }
 0xd4c   : > { %v4641_v5 = vmul.f32 1.442695, %v4625_v0  ;;  %v4626_v24 = vsub.f32 %v4533_v54, %v4596_v47  ;;  %v7758_v0 = vld [vmem:[%s10455_s6 + $0x38] sm:$0xff]   ;;  %7514 = vmatpush3.bf16.msra.mxu0 %v7757_v27 }
 0xd4d   : > { %v4598_v6 = vpop.xlane.xlu0 %4597  ;;  %7515 = vmatprep.subr.bf16.mxu0 %v7758_v0 }
 0xd4e   : > { %8023 = vpow2.f32 %v4641_v5  ;;  %v4643_v42 = vmul.f32 1.442695, %v4626_v24  ;;  %v4627_v26 = vsub.f32 %v7467_v23, %v4598_v6 }
 0xd4f   : > { %v4600_v59 = vpop.xlane.xlu1 %4599 }
 0xd50   : > { %8025 = vpow2.f32 %v4643_v42  ;;  %v4645_v51 = vmul.f32 1.442695, %v4627_v26  ;;  %v4628_v17 = vsub.f32 %v7468_v18, %v4600_v59  ;;  %7516 = vmatpush3.bf16.msra.mxu0 %v7758_v0 }
 0xd51   : > { %v4602_v20 = vpop.xlane.xlu0 %4601 }
 0xd52   : > { %8027 = vpow2.f32 %v4645_v51  ;;  %v4647_v14 = vmul.f32 1.442695, %v4628_v17  ;;  %v4629_v34 = vsub.f32 %v4546_v22, %v4602_v20 }
 0xd53   : > { %v4604_v45 = vpop.xlane.xlu1 %4603 }
 0xd54   : > { %8029 = vpow2.f32 %v4647_v14  ;;  %v4649_v13 = vmul.f32 1.442695, %v4629_v34  ;;  %v4630_v21 = vsub.f32 %v4549_v25, %v4604_v45 }
 0xd55   : > { %v4606_v2 = vpop.xlane.xlu0 %4605 }
 0xd56   : > { %8031 = vpow2.f32 %v4649_v13  ;;  %v4651_v60 = vmul.f32 1.442695, %v4630_v21  ;;  %v4631_v55 = vsub.f32 %v7471_v58, %v4606_v2 }
 0xd57   : > { %v4608_v15 = vpop.xlane.xlu1 %4607 }
 0xd58   : > { %v9785_v33 = vpop.eup %8023  ;;  %8033 = vpow2.f32 %v4651_v60  ;;  %v4653_v44 = vmul.f32 1.442695, %v4631_v55  ;;  %v4632_v30 = vsub.f32 %v7472_v61, %v4608_v15 }
 0xd59   : > { %v4610_v40 = vpop.xlane.xlu0 %4609  ;;  %4673 = vadd.xlane.f32.xlu0 %v9785_v33 }
 0xd5a   : > { %v9788_v32 = vpop.eup %8025  ;;  %8035 = vpow2.f32 %v4653_v44  ;;  %v4655_v38 = vmul.f32 1.442695, %v4632_v30  ;;  %v4633_v52 = vsub.f32 %v4562_v10, %v4610_v40 }
 0xd5b   : > { %v4612_v29 = vpop.xlane.xlu1 %4611  ;;  %4675 = vadd.xlane.f32.xlu1 %v9788_v32 }
 0xd5c   : > { %v9791_v7 = vpop.eup %8027  ;;  %8037 = vpow2.f32 %v4655_v38  ;;  %v4657_v12 = vmul.f32 1.442695, %v4633_v52  ;;  %v4634_v37 = vsub.f32 %v4565_v36, %v4612_v29 }
 0xd5d   : > { %v4614_v63 = vpop.xlane.xlu0 %4613  ;;  %4677 = vadd.xlane.f32.xlu0 %v9791_v7 }
 0xd5e   : > { %v9794_v56 = vpop.eup %8029  ;;  %8039 = vpow2.f32 %v4657_v12  ;;  %v4659_v39 = vmul.f32 1.442695, %v4634_v37  ;;  %v4635_v4 = vsub.f32 %v9767_v48, %v4614_v63 }
 0xd5f   : > { %v4616_v43 = vpop.xlane.xlu1 %4615  ;;  %4679 = vadd.xlane.f32.xlu1 %v9794_v56 }
 0xd60   : > { %v9798_v41 = vpop.eup %8031  ;;  %8041 = vpow2.f32 %v4659_v39  ;;  %v4661_v9 = vmul.f32 1.442695, %v4635_v4  ;;  %v4636_v3 = vsub.f32 %v9769_v28, %v4616_v43 }
 0xd61   : > { %4681 = vadd.xlane.f32.xlu0 %v9798_v41  ;;  %v4618_v31 = vpop.xlane.xlu0 %4617 }
 0xd62   : > { %v9802_v35 = vpop.eup %8033  ;;  %8043 = vpow2.f32 %v4661_v9  ;;  %v4663_v46 = vmul.f32 1.442695, %v4636_v3  ;;  %v4637_v11 = vsub.f32 %v9775_v53, %v4618_v31 }
 0xd63   : > { %4683 = vadd.xlane.f32.xlu1 %v9802_v35  ;;  %v4620_v1 = vpop.xlane.xlu1 %4619 }
 0xd64   : > { %v9806_v49 = vpop.eup %8035  ;;  %8045 = vpow2.f32 %v4663_v46  ;;  %v4665_v50 = vmul.f32 1.442695, %v4637_v11  ;;  %v4638_v8 = vsub.f32 %v9780_v19, %v4620_v1 }
 0xd65   : > { %4685 = vadd.xlane.f32.xlu0 %v9806_v49  ;;  %v4622_v23 = vpop.xlane.xlu0 %4621 }
 0xd66   : > { %v9810_v62 = vpop.eup %8037  ;;  %8047 = vpow2.f32 %v4665_v50  ;;  %v4667_v18 = vmul.f32 1.442695, %v4638_v8  ;;  %v4639_v54 = vsub.f32 %v9773_v57, %v4622_v23 }
 0xd67   : > { %4687 = vadd.xlane.f32.xlu1 %v9810_v62  ;;  %v4624_v58 = vpop.xlane.xlu1 %4623 }
 0xd68   : > { %v9814_v22 = vpop.eup %8039  ;;  %8049 = vpow2.f32 %v4667_v18  ;;  %v4669_v61 = vmul.f32 1.442695, %v4639_v54  ;;  %v4640_v25 = vsub.f32 %v9778_v16, %v4624_v58 }
 0xd69   : > { %4689 = vadd.xlane.f32.xlu0 %v9814_v22 }
 0xd6a   : > { %v9818_v48 = vpop.eup %8041  ;;  %8051 = vpow2.f32 %v4669_v61  ;;  %v4671_v10 = vmul.f32 1.442695, %v4640_v25 }
 0xd6b   : > { %4691 = vadd.xlane.f32.xlu1 %v9818_v48 }
 0xd6c   : > { %v9821_v28 = vpop.eup %8043  ;;  %8053 = vpow2.f32 %v4671_v10 }
 0xd6d   : > { %4693 = vadd.xlane.f32.xlu0 %v9821_v28 }
 0xd6e   : > { %v9824_v36 = vpop.eup %8045 }
 0xd6f   : > { %4695 = vadd.xlane.f32.xlu1 %v9824_v36 }
 0xd70   : > { %v9827_v57 = vpop.eup %8047 }
 0xd71   : > { %4697 = vadd.xlane.f32.xlu0 %v9827_v57 }
 0xd72   : > { %v9830_v53 = vpop.eup %8049 }
 0xd73   : > { %4699 = vadd.xlane.f32.xlu1 %v9830_v53 }
 0xd74   : > { %v9833_v16 = vpop.eup %8051 }
 0xd75   : > { %4701 = vadd.xlane.f32.xlu0 %v9833_v16 }
 0xd76   : > { %v9836_v19 = vpop.eup %8053 }
 0xd77   : > { %4703 = vadd.xlane.f32.xlu1 %v9836_v19 }
 0xde6   : > { %v4674_v47 = vpop.xlane.xlu0 %4673 }
 0xde7   : > { %8055 = vrcp.f32 %v4674_v47 }
 0xde8   : > { %v4676_v5 = vpop.xlane.xlu1 %4675 }
 0xde9   : > { %8057 = vrcp.f32 %v4676_v5 }
 0xdea   : > { %v4678_v24 = vpop.xlane.xlu0 %4677 }
 0xdeb   : > { %8059 = vrcp.f32 %v4678_v24 }
 0xdec   : > { %v4680_v6 = vpop.xlane.xlu1 %4679 }
 0xded   : > { %8061 = vrcp.f32 %v4680_v6 }
 0xdee   : > { %v4682_v42 = vpop.xlane.xlu0 %4681 }
 0xdef   : > { %8063 = vrcp.f32 %v4682_v42 }
 0xdf0   : > { %v4684_v26 = vpop.xlane.xlu1 %4683 }
 0xdf1   : > { %v8056_v59 = vpop.eup %8055  ;;  %8065 = vrcp.f32 %v4684_v26 }
 0xdf2   : > { %v4686_v51 = vpop.xlane.xlu0 %4685  ;;  %v4721_v14 = vmul.f32 %v8056_v59, %v9785_v33 }
 0xdf3   : > { %v8058_v17 = vpop.eup %8057  ;;  %8067 = vrcp.f32 %v4686_v51 }
 0xdf4   : > { %v4688_v20 = vpop.xlane.xlu1 %4687  ;;  %v4722_v34 = vmul.f32 %v8058_v17, %v9788_v32 }
 0xdf5   : > { %v8060_v45 = vpop.eup %8059  ;;  %8069 = vrcp.f32 %v4688_v20 }
 0xdf6   : > { %v4690_v13 = vpop.xlane.xlu0 %4689  ;;  %v4737_v21 = vpack.c.bf16 %v4722_v34, %v4721_v14  ;;  %v4723_v60 = vmul.f32 %v8060_v45, %v9791_v7 }
 0xdf7   : > { %v8062_v2 = vpop.eup %8061  ;;  %8071 = vrcp.f32 %v4690_v13 }
 0xdf8   : > { %v4724_v55 = vmul.f32 %v8062_v2, %v9794_v56  ;;  %7497 = vmatprep.mubr.bf16.mxu1 %v4737_v21  ;;  %v4692_v15 = vpop.xlane.xlu1 %4691 }
 0xdf9   : > { %v8064_v44 = vpop.eup %8063  ;;  %8073 = vrcp.f32 %v4692_v15 }
 0xdfa   : > { %v4694_v30 = vpop.xlane.xlu0 %4693  ;;  %v4738_v40 = vpack.c.bf16 %v4724_v55, %v4723_v60  ;;  %v4725_v32 = vmul.f32 %v8064_v44, %v9798_v41  ;;  %v9872_v60 = vld [vmem:[%s10456_s7] ss:$0 sm:$0xff] }
 0xdfb   : > { %v8066_v38 = vpop.eup %8065  ;;  %8075 = vrcp.f32 %v4694_v30 }
 0xdfc   : > { %7498 = vmatmul.mubr.bf16.vlgmr.msra.gmra.mrb[160].mxu1 %v4738_v40  ;;  %v4696_v33 = vpop.xlane.xlu1 %4695  ;;  %v4726_v52 = vmul.f32 %v8066_v38, %v9802_v35 }
 0xdfd   : > { %v8068_v29 = vpop.eup %8067  ;;  %8077 = vrcp.f32 %v4696_v33  ;;  %v8183_v33 = vld [vmem:[%s8395_s18] sm:$0xff] }
 0xdfe   : > { %v4698_v12 = vpop.xlane.xlu0 %4697  ;;  %v4739_v7 = vpack.c.bf16 %v4726_v52, %v4725_v32  ;;  %v4727_v56 = vmul.f32 %v8068_v29, %v9806_v49 }
 0xdff   : > { %v8070_v37 = vpop.eup %8069  ;;  %8079 = vrcp.f32 %v4698_v12  ;;  %v8184_v12 = vld [vmem:[%s8395_s18 + $0x8] sm:$0xff] }
 0xe00   : > { %7501 = vmatprep.mubr.bf16.mxu1 %v4739_v7  ;;  %v4700_v63 = vpop.xlane.xlu1 %4699  ;;  %v4728_v39 = vmul.f32 %v8070_v37, %v9810_v62  ;;  %v8185_v37 = vld [vmem:[%s8395_s18 + $0x10] sm:$0xff] }
 0xe01   : > { %v8072_v4 = vpop.eup %8071  ;;  %8081 = vrcp.f32 %v4700_v63 }
 0xe02   : > { %v4702_v43 = vpop.xlane.xlu0 %4701  ;;  %v4740_v9 = vpack.c.bf16 %v4728_v39, %v4727_v56  ;;  %v4729_v31 = vmul.f32 %v8072_v4, %v9814_v22  ;;  %v8186_v4 = vld [vmem:[%s8395_s18 + $0x18] sm:$0xff] }
 0xe03   : > { %v8074_v3 = vpop.eup %8073  ;;  %8083 = vrcp.f32 %v4702_v43 }
 0xe04   : > { %7502 = vmatmul.mubr.bf16.gmra.mrb[164].mxu1 %v4740_v9  ;;  %v4704_v41 = vpop.xlane.xlu1 %4703  ;;  %v4730_v35 = vmul.f32 %v8074_v3, %v9818_v48 }
 0xe05   : > { %v8076_v46 = vpop.eup %8075  ;;  %8085 = vrcp.f32 %v4704_v41 }
 0xe06   : > { %v4741_v11 = vpack.c.bf16 %v4730_v35, %v4729_v31  ;;  %v4731_v49 = vmul.f32 %v8076_v46, %v9821_v28  ;;  %v8187_v35 = vld [vmem:[%s8395_s18 + $0x20] sm:$0xff] }
 0xe07   : > { %v8078_v1 = vpop.eup %8077 }
 0xe08   : > { %7505 = vmatprep.mubr.bf16.mxu1 %v4741_v11  ;;  %v4732_v50 = vmul.f32 %v8078_v1, %v9824_v36 }
 0xe09   : > { %v8080_v8 = vpop.eup %8079 }
 0xe0a   : > { %v4742_v23 = vpack.c.bf16 %v4732_v50, %v4731_v49  ;;  %v4733_v18 = vmul.f32 %v8080_v8, %v9827_v57  ;;  %v8188_v49 = vld [vmem:[%s8395_s18 + $0x28] sm:$0xff]  ;;  %v8189_v8 = vld [vmem:[%s8395_s18 + $0x30] sm:$0xff] }
 0xe0b   : > { %v8082_v62 = vpop.eup %8081 }
 0xe0c   : > { %7506 = vmatmul.mubr.bf16.gmra.mrb[168].mxu1 %v4742_v23  ;;  %v4734_v54 = vmul.f32 %v8082_v62, %v9830_v53 }
 0xe0d   : > { %v8084_v58 = vpop.eup %8083 }
 0xe0e   : > { %v4743_v22 = vpack.c.bf16 %v4734_v54, %v4733_v18  ;;  %v4735_v25 = vmul.f32 %v8084_v58, %v9833_v16  ;;  %v8190_v54 = vld [vmem:[%s8395_s18 + $0x38] sm:$0xff] }
 0xe0f   : > { %v8086_v61 = vpop.eup %8085 }
 0xe10   : > { %7509 = vmatprep.mubr.bf16.mxu1 %v4743_v22  ;;  %v4736_v48 = vmul.f32 %v8086_v61, %v9836_v19 }
 0xe12   : > { %v4744_v10 = vpack.c.bf16 %v4736_v48, %v4735_v25 }
 0xe14   : > { %7510 = vmatmul.mubr.bf16.gmra.mrb[172].mxu1 %v4744_v10  ;;  %v8191_v10 = vld [vmem:[%s8395_s18 + $0x40] sm:$0xff] }
 0xecf   : > { %v7499_v28 = vpop.f32.mrb[160].mxu1 }
 0xed0   : > { %v4787_v36 = vpop.f32.mrb[161].mxu1 }
 0xed1   : > { %v7500_v27 = vpop.f32.mrb[162].mxu1 }
 0xed2   : > { %v4851_v0 = vpack.c.bf16 %v7500_v27, %v7499_v28  ;;  %v4790_v47 = vpop.f32.mrb[163].mxu1 }
 0xed3   : > { %v4850_v5 = vpack.c.bf16 %v4790_v47, %v4787_v36 }
 0xed5   : > { %7517 = vmatprep.mubr.msk.bf16.mxu0 %vm1234_vm0, %v4850_v5  ;;  %v8193_v5 = vld [vmem:[%s8395_s18 + $0x50] sm:$0xff] }
 0xed6   : > { %7518 = vmatmul.mubr.msk.bf16.vlgmr.msra.gmra.mrb[80].mxu0 %vm1234_vm0, %v4851_v0  ;;  %v8192_v0 = vld [vmem:[%s8395_s18 + $0x48] sm:$0xff] }
 0xed7   : > { %v7503_v57 = vpop.f32.mrb[164].mxu1 }
 0xed8   : > { %v4803_v53 = vpop.f32.mrb[165].mxu1 }
 0xed9   : > { %v7504_v24 = vpop.f32.mrb[166].mxu1 }
 0xeda   : > { %v4853_v6 = vpack.c.bf16 %v7504_v24, %v7503_v57  ;;  %v4806_v42 = vpop.f32.mrb[167].mxu1 }
 0xedb   : > { %v4852_v16 = vpack.c.bf16 %v4806_v42, %v4803_v53 }
 0xedd   : > { %7521 = vmatprep.mubr.msk.bf16.mxu0 %vm1234_vm0, %v4852_v16 }
 0xede   : > { %7522 = vmatmul.mubr.msk.bf16.gmra.mrb[84].mxu0 %vm1234_vm0, %v4853_v6  ;;  %v8194_v6 = vld [vmem:[%s8395_s18 + $0x58] sm:$0xff] }
 0xedf   : > { %v7507_v19 = vpop.f32.mrb[168].mxu1 }
 0xee0   : > { %v4819_v26 = vpop.f32.mrb[169].mxu1 }
 0xee1   : > { %v7508_v59 = vpop.f32.mrb[170].mxu1 }
 0xee2   : > { %v4855_v51 = vpack.c.bf16 %v7508_v59, %v7507_v19  ;;  %v4822_v17 = vpop.f32.mrb[171].mxu1 }
 0xee3   : > { %v4854_v20 = vpack.c.bf16 %v4822_v17, %v4819_v26 }
 0xee5   : > { %7525 = vmatprep.mubr.msk.bf16.mxu0 %vm1234_vm0, %v4854_v20 }
 0xee6   : > { %7526 = vmatmul.mubr.msk.bf16.gmra.mrb[88].mxu0 %vm1234_vm0, %v4855_v51  ;;  %v8195_v51 = vld [vmem:[%s8395_s18 + $0x60] sm:$0xff] }
 0xee7   : > { %v7511_v14 = vpop.f32.mrb[172].mxu1 }
 0xee8   : > { %v4835_v34 = vpop.f32.mrb[173].mxu1 }
 0xee9   : > { %v7512_v45 = vpop.f32.mrb[174].mxu1 }
 0xeea   : > { %v4857_v13 = vpack.c.bf16 %v7512_v45, %v7511_v14  ;;  %v4838_v21 = vpop.f32.mrb[175].mxu1 }
 0xeeb   : > { %v4856_v2 = vpack.c.bf16 %v4838_v21, %v4835_v34  ;;  %v8196_v34 = vld [vmem:[%s8395_s18 + $0x68] sm:$0xff] }
 0xeed   : > { %7529 = vmatprep.mubr.msk.bf16.mxu0 %vm1234_vm0, %v4856_v2  ;;  %v8198_v2 = vld [vmem:[%s8395_s18 + $0x78] sm:$0xff] }
 0xeee   : > { %7530 = vmatmul.mubr.msk.bf16.gmra.mrb[92].mxu0 %vm1234_vm0, %v4857_v13  ;;  %v8197_v13 = vld [vmem:[%s8395_s18 + $0x70] sm:$0xff]  ;;  %s8199_s18 = scalar_lea.vmem %s10401_s22, 2048 }
 0xeef   : > { %p8200_p11 = scmp.ne.s32.totalorder %s10401_s22, %s8199_s18  ;;  %p8207_p1 = scmp.lt.s32.totalorder %s8205_s0, %s8199_s18 }
 0xef1   : > { %p8201_p12 = pnand %p8200_p11, %p8380_p5  ;;  %p8208_p2 = por %p8207_p1, %p8206_p0 }
 0xef3   : > { %p8202_p13 = pneg %p8201_p12 }
 0xef5   : > { %p8209_p3 = pnand %p8208_p2, %p8202_p13 }
 0xfa9   : > { %v7519_v55 = vpop.f32.mrb[80].mxu0 }
 0xfaa   : > { %v4933_v15 = vpop.f32.mrb[81].mxu0  ;;  %v5020_v38 = vadd.f32 %v7519_v55, %v9872_v60 }
 0xfab   : > { %v5018_v44 = vadd.f32 %v9872_v60, %v4933_v15  ;;  %v7520_v30 = vpop.f32.mrb[82].mxu0  ;;  %v7761_v15 = vld [vmem:[%s10459_s10 + $0x4] ss:$8 sps:$4 sm:$0xff]  }
 0xfac   : > { %v4936_v40 = vpop.f32.mrb[83].mxu0  ;;  %v5021_v29 = vadd.f32 %v7520_v30, %v9872_v60  ;;  %v9886_v63 = vadd.f32 %v8185_v37, %v5020_v38  ;;  %5385 = vmatprep.subr.bf16.mxu1 %v7761_v15  ;;  %v7762_v30 = vld [vmem:[%s10459_s10 + $0x10] ss:$8 sps:$4 sm:$0xff]  }
 0xfad   : > { %v9877_v32 = vadd.f32 %v8183_v33, %v5018_v44  ;;  %v5019_v52 = vadd.f32 %v9872_v60, %v4936_v40  ;;  %v7764_v44 = vld [vmem:[%s10459_s10 + $0x14] ss:$8 sps:$4 sm:$0xff]  }
 0xfae   : > { %v9890_v43 = vadd.f32 %v8186_v4, %v5021_v29 }
 0xfaf   : > { %v9882_v7 = vadd.f32 %v8184_v12, %v5019_v52  ;;  %5050 = vadd.xlane.f32.xlu0 %v9877_v32 }
 0xfb1   : > { %5052 = vadd.xlane.f32.xlu1 %v9882_v7  ;;  %v7523_v56 = vpop.f32.mrb[84].mxu0 }
 0xfb2   : > { %v4949_v39 = vpop.f32.mrb[85].mxu0  ;;  %v5024_v31 = vadd.f32 %v7523_v56, %v9872_v60 }
 0xfb3   : > { %v5022_v9 = vadd.f32 %v9872_v60, %v4949_v39  ;;  %5054 = vadd.xlane.f32.xlu0 %v9886_v63  ;;  %v7524_v3 = vpop.f32.mrb[86].mxu0 }
 0xfb4   : > { %v4952_v41 = vpop.f32.mrb[87].mxu0  ;;  %v5025_v1 = vadd.f32 %v7524_v3, %v9872_v60  ;;  %v9906_v23 = vadd.f32 %v8189_v8, %v5024_v31 }
 0xfb5   : > { %v9896_v46 = vadd.f32 %v8187_v35, %v5022_v9  ;;  %v5023_v11 = vadd.f32 %v9872_v60, %v4952_v41  ;;  %5056 = vadd.xlane.f32.xlu1 %v9890_v43 }
 0xfb6   : > { %v9910_v58 = vadd.f32 %v8190_v54, %v5025_v1 }
 0xfb7   : > { %v9902_v50 = vadd.f32 %v8188_v49, %v5023_v11  ;;  %5058 = vadd.xlane.f32.xlu0 %v9896_v46 }
 0xfb9   : > { %5060 = vadd.xlane.f32.xlu1 %v9902_v50  ;;  %v7527_v62 = vpop.f32.mrb[88].mxu0 }
 0xfba   : > { %v4965_v18 = vpop.f32.mrb[89].mxu0  ;;  %v5028_v48 = vadd.f32 %v7527_v62, %v9872_v60 }
 0xfbb   : > { %v5026_v22 = vadd.f32 %v9872_v60, %v4965_v18  ;;  %5062 = vadd.xlane.f32.xlu0 %v9906_v23  ;;  %v7528_v61 = vpop.f32.mrb[90].mxu0 }
 0xfbc   : > { %v4968_v25 = vpop.f32.mrb[91].mxu0  ;;  %v5029_v27 = vadd.f32 %v7528_v61, %v9872_v60  ;;  %v9926_v57 = vadd.f32 %v8193_v5, %v5028_v48 }
 0xfbd   : > { %v9916_v28 = vadd.f32 %v8191_v10, %v5026_v22  ;;  %v5027_v36 = vadd.f32 %v9872_v60, %v4968_v25  ;;  %5064 = vadd.xlane.f32.xlu1 %v9910_v58 }
 0xfbe   : > { %v9930_v42 = vadd.f32 %v8194_v6, %v5029_v27  ;;  %v7767_v6 = vld [vmem:[%s10459_s10 + $0x24] ss:$8 sps:$4 sm:$0xff]  }
 0xfbf   : > { %v9922_v47 = vadd.f32 %v8192_v0, %v5027_v36  ;;  %5066 = vadd.xlane.f32.xlu0 %v9916_v28 }
 0xfc1   : > { %5068 = vadd.xlane.f32.xlu1 %v9922_v47  ;;  %v7531_v53 = vpop.f32.mrb[92].mxu0 }
 0xfc2   : > { %v4981_v24 = vpop.f32.mrb[93].mxu0  ;;  %v5032_v59 = vadd.f32 %v7531_v53, %v9872_v60 }
 0xfc3   : > { %v5030_v16 = vadd.f32 %v9872_v60, %v4981_v24  ;;  %5070 = vadd.xlane.f32.xlu0 %v9926_v57  ;;  %v7532_v19 = vpop.f32.mrb[94].mxu0 }
 0xfc4   : > { %v4984_v26 = vpop.f32.mrb[95].mxu0  ;;  %v5033_v14 = vadd.f32 %v7532_v19, %v9872_v60  ;;  %v9946_v21 = vadd.f32 %v8197_v13, %v5032_v59  ;;  %v7768_v13 = vld [vmem:[%s10459_s10 + $0x30] ss:$8 sps:$4 sm:$0xff]  }
 0xfc5   : > { %v9936_v17 = vadd.f32 %v8195_v51, %v5030_v16  ;;  %v5031_v20 = vadd.f32 %v9872_v60, %v4984_v26  ;;  %5072 = vadd.xlane.f32.xlu1 %v9930_v42  ;;  %v7759_v60 = vld [vmem:[%s10459_s10] ss:$8 sps:$4 sm:$0xff]  }
 0xfc6   : > { %v9950_v55 = vadd.f32 %v8198_v2, %v5033_v14  ;;  %5386 = vmatpush1.bf16.msra.mxu1 %v7759_v60  ;;  %v7765_v16 = vld [vmem:[%s10459_s10 + $0x20] ss:$8 sps:$4 sm:$0xff]  }
 0xfc7   : > { %v9942_v45 = vadd.f32 %v8196_v34, %v5031_v20  ;;  %5074 = vadd.xlane.f32.xlu0 %v9936_v17  ;;  %5387 = vmatprep.subr.bf16.mxu1 %v7764_v44 }
 0xfc9   : > { %5076 = vadd.xlane.f32.xlu1 %v9942_v45 }
 0xfca   : > { %5388 = vmatpush1.bf16.msra.mxu1 %v7762_v30 }
 0xfcb   : > { %5078 = vadd.xlane.f32.xlu0 %v9946_v21  ;;  %5389 = vmatprep.subr.bf16.mxu1 %v7767_v6 }
 0xfcd   : > { %5080 = vadd.xlane.f32.xlu1 %v9950_v55 }
 0xfce   : > { %5390 = vmatpush1.bf16.msra.mxu1 %v7765_v16 }
0x103c   : > { %v5051_v40 = vpop.xlane.xlu0 %5050 }
0x103d   : > { %v5082_v38 = vmul.f32 0.0078125, %v5051_v40 }
0x103e   : > { %v5053_v33 = vpop.xlane.xlu1 %5052 }
0x103f   : > { %v9967_v52 = vsub.f32 %v9877_v32, %v5082_v38  ;;  %v5083_v29 = vmul.f32 0.0078125, %v5053_v33  ;;  %v7771_v33 = vld [vmem:[%s10459_s10 + $0x40] ss:$8 sps:$4 sm:$0xff]  }
0x1040   : > { %v5055_v12 = vpop.xlane.xlu0 %5054 }
0x1041   : > { %v9970_v37 = vsub.f32 %v9882_v7, %v5083_v29  ;;  %v5084_v56 = vmul.f32 0.0078125, %v5055_v12  ;;  %v5114_v39 = vmul.f32 %v9967_v52, %v9967_v52 }
0x1042   : > { %v5057_v4 = vpop.xlane.xlu1 %5056 }
0x1043   : > { %v9975_v9 = vsub.f32 %v9886_v63, %v5084_v56  ;;  %v5085_v3 = vmul.f32 0.0078125, %v5057_v4  ;;  %5130 = vadd.xlane.f32.xlu0 %v5114_v39  ;;  %v5115_v41 = vmul.f32 %v9970_v37, %v9970_v37  ;;  %v7776_v4 = vld [vmem:[%s10459_s10 + $0x54] ss:$8 sps:$4 sm:$0xff]  }
0x1044   : > { %v5059_v32 = vpop.xlane.xlu0 %5058 }
0x1045   : > { %v9980_v31 = vsub.f32 %v9890_v43, %v5085_v3  ;;  %v5086_v35 = vmul.f32 0.0078125, %v5059_v32  ;;  %5132 = vadd.xlane.f32.xlu1 %v5115_v41  ;;  %v5116_v7 = vmul.f32 %v9975_v9, %v9975_v9  ;;  %v7777_v41 = vld [vmem:[%s10459_s10 + $0x60] ss:$8 sps:$4 sm:$0xff]   ;;  %v7782_v32 = vld [vmem:[%s10459_s10 + $0x74] ss:$8 sps:$4 sm:$0xff]  }
0x1046   : > { %v5061_v11 = vpop.xlane.xlu1 %5060 }
0x1047   : > { %v9985_v1 = vsub.f32 %v9896_v46, %v5086_v35  ;;  %v5087_v63 = vmul.f32 0.0078125, %v5061_v11  ;;  %5134 = vadd.xlane.f32.xlu0 %v5116_v7  ;;  %v5117_v49 = vmul.f32 %v9980_v31, %v9980_v31  ;;  %v7780_v35 = vld [vmem:[%s10459_s10 + $0x70] ss:$8 sps:$4 sm:$0xff]   ;;  %v8263_v7 = vmov 0   ;;  %v7783_v11 = vld [vmem:[%s10461_s12 + $0x40] sm:$0xff]  }
0x1048   : > { %v5063_v8 = vpop.xlane.xlu0 %5062  ;;  %5417 = vmatprep.mubr.bf16.mxu1 %v8263_v7  ;;  %6749 = vmatprep.subr.bf16.mxu0 %v7783_v11 }
0x1049   : > { %v9990_v62 = vsub.f32 %v9902_v50, %v5087_v63  ;;  %v5088_v43 = vmul.f32 0.0078125, %v5063_v8  ;;  %5136 = vadd.xlane.f32.xlu1 %v5117_v49  ;;  %v5118_v18 = vmul.f32 %v9985_v1, %v9985_v1  ;;  %v7784_v63 = vld [vmem:[%s10461_s12] sm:$0xff]   ;;  %v7785_v49 = vld [vmem:[%s10461_s12 + $0x48] sm:$0xff]  }
0x104a   : > { %v5065_v54 = vpop.xlane.xlu1 %5064  ;;  %6750 = vmatpush3.bf16.msra.mxu0 %v7784_v63  ;;  %v7786_v8 = vld [vmem:[%s10461_s12 + $0x8] sm:$0xff]  }
0x104b   : > { %v9995_v22 = vsub.f32 %v9906_v23, %v5088_v43  ;;  %v5089_v46 = vmul.f32 0.0078125, %v5065_v54  ;;  %5138 = vadd.xlane.f32.xlu0 %v5118_v18  ;;  %v5119_v61 = vmul.f32 %v9990_v62, %v9990_v62  ;;  %6751 = vmatprep.subr.bf16.mxu0 %v7785_v49 }
0x104c   : > { %v5067_v25 = vpop.xlane.xlu0 %5066 }
0x104d   : > { %v10000_v48 = vsub.f32 %v9910_v58, %v5089_v46  ;;  %v5090_v50 = vmul.f32 0.0078125, %v5067_v25  ;;  %5140 = vadd.xlane.f32.xlu1 %v5119_v61  ;;  %v5120_v10 = vmul.f32 %v9995_v22, %v9995_v22 }
0x104e   : > { %v5069_v36 = vpop.xlane.xlu1 %5068  ;;  %6752 = vmatpush3.bf16.msra.mxu0 %v7786_v8 }
0x104f   : > { %v10005_v27 = vsub.f32 %v9916_v28, %v5090_v50  ;;  %v5091_v23 = vmul.f32 0.0078125, %v5069_v36  ;;  %5142 = vadd.xlane.f32.xlu0 %v5120_v10  ;;  %v5121_v0 = vmul.f32 %v10000_v48, %v10000_v48 }
0x1050   : > { %v5071_v5 = vpop.xlane.xlu0 %5070 }
0x1051   : > { %v10010_v53 = vsub.f32 %v9922_v47, %v5091_v23  ;;  %v5092_v58 = vmul.f32 0.0078125, %v5071_v5  ;;  %5144 = vadd.xlane.f32.xlu1 %v5121_v0  ;;  %v5122_v24 = vmul.f32 %v10005_v27, %v10005_v27 }
0x1052   : > { %v5073_v28 = vpop.xlane.xlu1 %5072 }
0x1053   : > { %v10021_v19 = vsub.f32 %v9926_v57, %v5092_v58  ;;  %v5093_v26 = vmul.f32 0.0078125, %v5073_v28  ;;  %5146 = vadd.xlane.f32.xlu0 %v5122_v24  ;;  %v5123_v47 = vmul.f32 %v10010_v53, %v10010_v53  ;;  %v7770_v57 = vld [vmem:[%s10459_s10 + $0x34] ss:$8 sps:$4 sm:$0xff]  }
0x1054   : > { %v5075_v59 = vpop.xlane.xlu0 %5074  ;;  %5391 = vmatprep.subr.bf16.mxu1 %v7770_v57 }
0x1055   : > { %v10026_v51 = vsub.f32 %v9930_v42, %v5093_v26  ;;  %v5094_v20 = vmul.f32 0.0078125, %v5075_v59  ;;  %5148 = vadd.xlane.f32.xlu1 %v5123_v47  ;;  %v5124_v14 = vmul.f32 %v10021_v19, %v10021_v19  ;;  %5392 = vmatpush1.bf16.msra.mxu1 %v7768_v13 }
0x1056   : > { %v5077_v34 = vpop.xlane.xlu1 %5076 }
0x1057   : > { %v10037_v2 = vsub.f32 %v9936_v17, %v5094_v20  ;;  %v5095_v60 = vmul.f32 0.0078125, %v5077_v34  ;;  %5150 = vadd.xlane.f32.xlu0 %v5124_v14  ;;  %v5125_v42 = vmul.f32 %v10026_v51, %v10026_v51  ;;  %v7773_v17 = vld [vmem:[%s10459_s10 + $0x44] ss:$8 sps:$4 sm:$0xff]   ;;  %v10098_v14 = vld [vmem:[%s10457_s8] ss:$0 sm:$0xff] }
0x1058   : > { %v5079_v15 = vpop.xlane.xlu0 %5078  ;;  %5393 = vmatprep.subr.bf16.mxu1 %v7773_v17  ;;  %v10106_v17 = vld [vmem:[%s10458_s9] ss:$0 sm:$0xff] }
0x1059   : > { %v10042_v44 = vsub.f32 %v9942_v45, %v5095_v60  ;;  %v5096_v30 = vmul.f32 0.0078125, %v5079_v15  ;;  %5152 = vadd.xlane.f32.xlu1 %v5125_v42  ;;  %v5126_v40 = vmul.f32 %v10037_v2, %v10037_v2  ;;  %5394 = vmatpush1.bf16.msra.mxu1 %v7771_v33 }
0x105a   : > { %v5081_v38 = vpop.xlane.xlu1 %5080  ;;  %5395 = vmatprep.subr.bf16.mxu1 %v7776_v4 }
0x105b   : > { %v10053_v29 = vsub.f32 %v9946_v21, %v5096_v30  ;;  %v5097_v12 = vmul.f32 0.0078125, %v5081_v38  ;;  %5154 = vadd.xlane.f32.xlu0 %v5126_v40  ;;  %v5127_v45 = vmul.f32 %v10042_v44, %v10042_v44  ;;  %v7774_v21 = vld [vmem:[%s10459_s10 + $0x50] ss:$8 sps:$4 sm:$0xff]  }
0x105d   : > { %v10058_v56 = vsub.f32 %v9950_v55, %v5097_v12  ;;  %5156 = vadd.xlane.f32.xlu1 %v5127_v45  ;;  %v5128_v39 = vmul.f32 %v10053_v29, %v10053_v29  ;;  %5396 = vmatpush1.bf16.msra.mxu1 %v7774_v21  ;;  %v7779_v55 = vld [vmem:[%s10459_s10 + $0x64] ss:$8 sps:$4 sm:$0xff]  }
0x105e   : > { %5397 = vmatprep.subr.bf16.mxu1 %v7779_v55 }
0x105f   : > { %5158 = vadd.xlane.f32.xlu0 %v5128_v39  ;;  %v5129_v3 = vmul.f32 %v10058_v56, %v10058_v56 }
0x1061   : > { %5160 = vadd.xlane.f32.xlu1 %v5129_v3  ;;  %5398 = vmatpush1.bf16.msra.mxu1 %v7777_v41 }
0x1062   : > { %5399 = vmatprep.subr.bf16.mxu1 %v7782_v32 }
0x1065   : > { %5400 = vmatpush1.bf16.msra.mxu1 %v7780_v35 }
0x10d0   : > { %v5131_v43 = vpop.xlane.xlu0 %5130 }
0x10d1   : > { %v5162_v18 = vmul.f32 0.0078125, %v5131_v43 }
0x10d2   : > { %v5133_v54 = vpop.xlane.xlu1 %5132 }
0x10d3   : > { %v5178_v46 = vadd.f32 1e-05, %v5162_v18  ;;  %v5163_v61 = vmul.f32 0.0078125, %v5133_v54 }
0x10d4   : > { %v5135_v25 = vpop.xlane.xlu0 %5134 }
0x10d5   : > { %8087 = vrsqrt.f32 %v5178_v46  ;;  %v5179_v50 = vadd.f32 1e-05, %v5163_v61  ;;  %v5164_v10 = vmul.f32 0.0078125, %v5135_v25 }
0x10d6   : > { %v5137_v36 = vpop.xlane.xlu1 %5136 }
0x10d7   : > { %8089 = vrsqrt.f32 %v5179_v50  ;;  %v5180_v23 = vadd.f32 1e-05, %v5164_v10  ;;  %v5165_v0 = vmul.f32 0.0078125, %v5137_v36 }
0x10d8   : > { %v5139_v5 = vpop.xlane.xlu0 %5138 }
0x10d9   : > { %8091 = vrsqrt.f32 %v5180_v23  ;;  %v5181_v58 = vadd.f32 1e-05, %v5165_v0  ;;  %v5166_v24 = vmul.f32 0.0078125, %v5139_v5 }
0x10da   : > { %v5141_v6 = vpop.xlane.xlu1 %5140 }
0x10db   : > { %8093 = vrsqrt.f32 %v5181_v58  ;;  %v5167_v28 = vmul.f32 0.0078125, %v5141_v6  ;;  %v5182_v16 = vadd.f32 1e-05, %v5166_v24 }
0x10dc   : > { %v5143_v47 = vpop.xlane.xlu0 %5142 }
0x10dd   : > { %v5183_v26 = vadd.f32 1e-05, %v5167_v28  ;;  %v5168_v60 = vmul.f32 0.0078125, %v5143_v47 }
0x10de   : > { %v5145_v59 = vpop.xlane.xlu1 %5144 }
0x10df   : > { %v8088_v20 = vpop.eup %8087  ;;  %8095 = vrsqrt.f32 %v5183_v26  ;;  %v5169_v57 = vmul.f32 0.0078125, %v5145_v59  ;;  %v5184_v45 = vadd.f32 1e-05, %v5168_v60 }
0x10e0   : > { %v5210_v34 = vmul.f32 %v8088_v20, %v9967_v52  ;;  %8097 = vrsqrt.f32 %v5182_v16  ;;  %v5147_v52 = vpop.xlane.xlu0 %5146 }
0x10e1   : > { %v8090_v13 = vpop.eup %8089  ;;  %v5185_v40 = vadd.f32 1e-05, %v5169_v57  ;;  %v5170_v35 = vmul.f32 0.0078125, %v5147_v52 }
0x10e2   : > { %v5232_v42 = vmul.f32 %v10098_v14, %v5210_v34  ;;  %v5211_v15 = vmul.f32 %v8090_v13, %v9970_v37  ;;  %v5149_v33 = vpop.xlane.xlu1 %5148 }
0x10e3   : > { %v8092_v30 = vpop.eup %8091  ;;  %8099 = vrsqrt.f32 %v5185_v40  ;;  %v5171_v3 = vmul.f32 0.0078125, %v5149_v33  ;;  %v5186_v43 = vadd.f32 1e-05, %v5170_v35 }
0x10e4   : > { %v5233_v38 = vmul.f32 %v10098_v14, %v5211_v15  ;;  %v10110_v39 = vadd.f32 %v10106_v17, %v5232_v42  ;;  %v5212_v37 = vmul.f32 %v8092_v30, %v9975_v9  ;;  %8101 = vrsqrt.f32 %v5184_v45  ;;  %v5151_v18 = vpop.xlane.xlu0 %5150 }
0x10e5   : > { %v8094_v12 = vpop.eup %8093  ;;  %v5187_v49 = vadd.f32 1e-05, %v5171_v3  ;;  %v5172_v36 = vmul.f32 0.0078125, %v5151_v18 }
0x10e6   : > { %v10113_v4 = vadd.f32 %v10106_v17, %v5233_v38  ;;  %v5213_v21 = vmul.f32 %v8094_v12, %v9980_v31  ;;  %v5234_v11 = vmul.f32 %v10098_v14, %v5212_v37  ;;  %v5153_v9 = vpop.xlane.xlu1 %5152 }
0x10e7   : > { %8103 = vrsqrt.f32 %v5187_v49  ;;  %v5173_v61 = vmul.f32 0.0078125, %v5153_v9  ;;  %v5188_v24 = vadd.f32 1e-05, %v5172_v36 }
0x10e8   : > { %v5270_v55 = vpack.c.bf16 %v10113_v4, %v10110_v39  ;;  %v5235_v41 = vmul.f32 %v10098_v14, %v5213_v21  ;;  %v10127_v54 = vadd.f32 %v10106_v17, %v5234_v11  ;;  %8105 = vrsqrt.f32 %v5186_v43  ;;  %v5155_v6 = vpop.xlane.xlu0 %5154 }
0x10e9   : > { %v8096_v32 = vpop.eup %8095  ;;  %v5189_v0 = vadd.f32 1e-05, %v5173_v61  ;;  %v5174_v57 = vmul.f32 0.0078125, %v5155_v6  ;;  %v7791_v6 = vld [vmem:[%s10461_s12 + $0x60] sm:$0xff]  }
0x10ea   : > { %5418 = vmatmul.mubr.bf16.vlgmr.msra.gmra.mrb[176].mxu1 %v5270_v55  ;;  %v8098_v63 = vpop.eup %8097  ;;  %v10123_v31 = vadd.f32 %v10106_v17, %v5235_v41  ;;  %v5215_v8 = vmul.f32 %v8096_v32, %v9990_v62  ;;  %v5157_v5 = vpop.xlane.xlu1 %5156 }
0x10eb   : > { %5427 = vmatprep.mubr.bf16.mxu1 %v8263_v7  ;;  %v5214_v46 = vmul.f32 %v8098_v63, %v9985_v1  ;;  %8107 = vrsqrt.f32 %v5189_v0  ;;  %v5175_v26 = vmul.f32 0.0078125, %v5157_v5  ;;  %v5190_v15 = vadd.f32 1e-05, %v5174_v57  ;;  %v7797_v57 = vld [vmem:[%s10461_s12 + $0x78] sm:$0xff]  }
0x10ec   : > { %v5271_v25 = vpack.c.bf16 %v10123_v31, %v10127_v54  ;;  %v5237_v50 = vmul.f32 %v10098_v14, %v5215_v8  ;;  %8109 = vrsqrt.f32 %v5188_v24  ;;  %v5159_v30 = vpop.xlane.xlu0 %5158 }
0x10ed   : > { %v8100_v10 = vpop.eup %8099  ;;  %v5236_v62 = vmul.f32 %v10098_v14, %v5214_v46  ;;  %v5191_v13 = vadd.f32 1e-05, %v5175_v26  ;;  %v5176_v37 = vmul.f32 0.0078125, %v5159_v30  ;;  %v7793_v26 = vld [vmem:[%s10461_s12 + $0x68] sm:$0xff]  }
0x10ee   : > { %v8102_v23 = vpop.eup %8101  ;;  %v10136_v1 = vadd.f32 %v10106_v17, %v5237_v50  ;;  %v5217_v58 = vmul.f32 %v8100_v10, %v10000_v48  ;;  %v5161_v60 = vpop.xlane.xlu1 %5160 }
0x10ef   : > { %v10140_v28 = vadd.f32 %v10106_v17, %v5236_v62  ;;  %v5216_v16 = vmul.f32 %v8102_v23, %v9995_v22  ;;  %8111 = vrsqrt.f32 %v5191_v13  ;;  %v5177_v33 = vmul.f32 0.0078125, %v5161_v60 }
0x10f0   : > { %v5239_v59 = vmul.f32 %v10098_v14, %v5217_v58  ;;  %8113 = vrsqrt.f32 %v5190_v15  ;;  %v5192_v41 = vadd.f32 1e-05, %v5176_v37 }
0x10f1   : > { %v5272_v47 = vpack.c.bf16 %v10136_v1, %v10140_v28  ;;  %v8104_v20 = vpop.eup %8103  ;;  %v5238_v48 = vmul.f32 %v10098_v14, %v5216_v16  ;;  %v5193_v3 = vadd.f32 1e-05, %v5177_v33  ;;  %v7792_v16 = vld [vmem:[%s10461_s12 + $0x20] sm:$0xff]  }
0x10f2   : > { %5428 = vmatmul.mubr.bf16.gmra.mrb[180].mxu1 %v5271_v25  ;;  %v8106_v34 = vpop.eup %8105  ;;  %v10149_v22 = vadd.f32 %v10106_v17, %v5239_v59  ;;  %v5219_v42 = vmul.f32 %v8104_v20, %v10010_v53  ;;  %v7795_v59 = vld [vmem:[%s10461_s12 + $0x70] sm:$0xff]  }
0x10f3   : > { %5437 = vmatprep.mubr.bf16.mxu1 %v8263_v7  ;;  %v10153_v40 = vadd.f32 %v10106_v17, %v5238_v48  ;;  %v5218_v38 = vmul.f32 %v8106_v34, %v10005_v27  ;;  %8115 = vrsqrt.f32 %v5193_v3  ;;  %v7796_v20 = vld [vmem:[%s10461_s12 + $0x30] sm:$0xff]   ;;  %v7798_v48 = vld [vmem:[%s10461_s12 + $0x38] sm:$0xff]   ;;  %v5295_v34 = vlaneseq }
0x10f4   : > { %v5241_v45 = vmul.f32 %v10098_v14, %v5219_v42  ;;  %8117 = vrsqrt.f32 %v5192_v41  ;;  %v488_v42 = vld [vmem:[%s10460_s11] sm:$0x3] }
0x10f5   : > { %v5273_v12 = vpack.c.bf16 %v10149_v22, %v10153_v40  ;;  %v8108_v52 = vpop.eup %8107  ;;  %v5240_v53 = vmul.f32 %v10098_v14, %v5218_v38  ;;  %v5296_v13 = vshrl.u32 %v5295_v34, 7 }
0x10f6   : > { %v8110_v21 = vpop.eup %8109  ;;  %v10162_v55 = vadd.f32 %v10106_v17, %v5241_v45  ;;  %v5221_v27 = vmul.f32 %v8108_v52, %v10026_v51 }
0x10f7   : > { %v10166_v32 = vadd.f32 %v10106_v17, %v5240_v53  ;;  %v5220_v35 = vmul.f32 %v8110_v21, %v10021_v19  ;;  %v5297_v60 = vsub.s32 0, %v5296_v13  ;;  %v5301_v15 = vsub.s32 1, %v5296_v13 }
0x10f8   : > { %v5243_v63 = vmul.f32 %v10098_v14, %v5221_v27 }
0x10f9   : > { %v5274_v11 = vpack.c.bf16 %v10162_v55, %v10166_v32  ;;  %v8112_v49 = vpop.eup %8111  ;;  %v5242_v9 = vmul.f32 %v10098_v14, %v5220_v35  ;;  %v10247_v30 = vrot.slane %v488_v42, %v5297_v60  ;;  %v10249_v38 = vrot.slane %v488_v42, %v5301_v15 }
0x10fa   : > { %5438 = vmatmul.mubr.bf16.gmra.mrb[184].mxu1 %v5272_v47  ;;  %v8114_v8 = vpop.eup %8113  ;;  %v10175_v51 = vadd.f32 %v10106_v17, %v5243_v63  ;;  %v5223_v43 = vmul.f32 %v8112_v49, %v10042_v44  ;;  %v7794_v47 = vld [vmem:[%s10461_s12 + $0x28] sm:$0xff]  }
0x10fb   : > { %5447 = vmatprep.mubr.bf16.mxu1 %v8263_v7  ;;  %v10179_v19 = vadd.f32 %v10106_v17, %v5242_v9  ;;  %v5222_v18 = vmul.f32 %v8114_v8, %v10037_v2 }
0x10fc   : > { %v5245_v61 = vmul.f32 %v10098_v14, %v5223_v43 }
0x10fd   : > { %v5275_v46 = vpack.c.bf16 %v10175_v51, %v10179_v19  ;;  %v8116_v25 = vpop.eup %8115  ;;  %v5244_v50 = vmul.f32 %v10098_v14, %v5222_v18 }
0x10fe   : > { %v8118_v10 = vpop.eup %8117  ;;  %v10188_v36 = vadd.f32 %v10106_v17, %v5245_v61  ;;  %v5225_v44 = vmul.f32 %v8116_v25, %v10058_v56 }
0x10ff   : > { %v10192_v62 = vadd.f32 %v10106_v17, %v5244_v50  ;;  %v5224_v2 = vmul.f32 %v8118_v10, %v10053_v29  ;;  %v7787_v29 = vld [vmem:[%s10461_s12 + $0x50] sm:$0xff]  }
0x1100   : > { %v5247_v0 = vmul.f32 %v10098_v14, %v5225_v44  ;;  %6753 = vmatprep.subr.bf16.mxu0 %v7787_v29 }
0x1101   : > { %v5276_v23 = vpack.c.bf16 %v10188_v36, %v10192_v62  ;;  %v5246_v5 = vmul.f32 %v10098_v14, %v5224_v2  ;;  %v7788_v14 = vld [vmem:[%s10461_s12 + $0x10] sm:$0xff]  }
0x1102   : > { %5448 = vmatmul.mubr.bf16.gmra.mrb[188].mxu1 %v5273_v12  ;;  %v10201_v58 = vadd.f32 %v10106_v17, %v5247_v0  ;;  %6754 = vmatpush3.bf16.msra.mxu0 %v7788_v14 }
0x1103   : > { %5457 = vmatprep.mubr.bf16.mxu1 %v8263_v7  ;;  %v10204_v56 = vadd.f32 %v10106_v17, %v5246_v5  ;;  %v7790_v17 = vld [vmem:[%s10461_s12 + $0x18] sm:$0xff]  }
0x1105   : > { %v5277_v24 = vpack.c.bf16 %v10201_v58, %v10204_v56 }
0x110a   : > { %5458 = vmatmul.mubr.bf16.gmra.mrb[192].mxu1 %v5274_v11 }
0x110b   : > { %5467 = vmatprep.mubr.bf16.mxu1 %v8263_v7 }
0x1112   : > { %5468 = vmatmul.mubr.bf16.gmra.mrb[196].mxu1 %v5275_v46 }
0x1113   : > { %5477 = vmatprep.mubr.bf16.mxu1 %v8263_v7 }
0x111a   : > { %5478 = vmatmul.mubr.bf16.gmra.mrb[200].mxu1 %v5276_v23 }
0x111b   : > { %5487 = vmatprep.mubr.bf16.mxu1 %v8263_v7  ;;  %v7789_v7 = vld [vmem:[%s10461_s12 + $0x58] sm:$0xff]  }
0x111c   : > { %6755 = vmatprep.subr.bf16.mxu0 %v7789_v7 }
0x111d   : > { %6756 = vmatpush3.bf16.msra.mxu0 %v7790_v17 }
0x111e   : > { %6757 = vmatprep.subr.bf16.mxu0 %v7791_v6 }
0x1121   : > { %6758 = vmatpush3.bf16.msra.mxu0 %v7792_v16 }
0x1122   : > { %5488 = vmatmul.mubr.bf16.gmra.mrb[204].mxu1 %v5277_v24  ;;  %6759 = vmatprep.subr.bf16.mxu0 %v7793_v26 }
0x1125   : > { %6760 = vmatpush3.bf16.msra.mxu0 %v7794_v47 }
0x1126   : > { %6761 = vmatprep.subr.bf16.mxu0 %v7795_v59 }
0x1129   : > { %6762 = vmatpush3.bf16.msra.mxu0 %v7796_v20 }
0x112a   : > { %6763 = vmatprep.subr.bf16.mxu0 %v7797_v57 }
0x112d   : > { %6764 = vmatpush3.bf16.msra.mxu0 %v7798_v48 }
0x11bd   : > { %v5419_v33 = vpop.f32.mrb[176].mxu1 }
0x11be   : > { %v5420_v12 = vadd.f32 %v5419_v33, %v10247_v30  ;;  %v5421_v45 = vpop.f32.mrb[177].mxu1 }
0x11bf   : > { %v5422_v52 = vadd.f32 %v5421_v45, %v10249_v38  ;;  %v5423_v37 = vpop.f32.mrb[178].mxu1 }
0x11c0   : > { %v5530_v53 = vmul.f32 0.70710677, %v5420_v12  ;;  %v5424_v21 = vadd.f32 %v5423_v37, %v10247_v30  ;;  %v5425_v3 = vpop.f32.mrb[179].mxu1  ;;  %v5498_v6 = vmul.f32 0.5, %v5420_v12 }
0x11c1   : > { %v5531_v27 = vmul.f32 0.70710677, %v5422_v52  ;;  %v5426_v41 = vadd.f32 %v5425_v3, %v10249_v38  ;;  %v5499_v20 = vmul.f32 0.5, %v5422_v52 }
0x11c2   : > { %8119 = verf.f32 %v5530_v53  ;;  %v5532_v35 = vmul.f32 0.70710677, %v5424_v21  ;;  %v5500_v16 = vmul.f32 0.5, %v5424_v21 }
0x11c3   : > { %8121 = verf.f32 %v5531_v27  ;;  %v5533_v11 = vmul.f32 0.70710677, %v5426_v41  ;;  %v5501_v57 = vmul.f32 0.5, %v5426_v41 }
0x11c4   : > { %8123 = verf.f32 %v5532_v35 }
0x11c5   : > { %8125 = verf.f32 %v5533_v11  ;;  %v5429_v63 = vpop.f32.mrb[180].mxu1 }
0x11c6   : > { %v5430_v49 = vadd.f32 %v5429_v63, %v10247_v30  ;;  %v5431_v9 = vpop.f32.mrb[181].mxu1 }
0x11c7   : > { %v5432_v8 = vadd.f32 %v5431_v9, %v10249_v38  ;;  %v5433_v43 = vpop.f32.mrb[182].mxu1 }
0x11c8   : > { %v5534_v18 = vmul.f32 0.70710677, %v5430_v49  ;;  %v5434_v46 = vadd.f32 %v5433_v43, %v10247_v30  ;;  %v5435_v61 = vpop.f32.mrb[183].mxu1 }
0x11c9   : > { %v5535_v25 = vmul.f32 0.70710677, %v5432_v8  ;;  %v5436_v50 = vadd.f32 %v5435_v61, %v10249_v38 }
0x11ca   : > { %8127 = verf.f32 %v5534_v18  ;;  %v5536_v10 = vmul.f32 0.70710677, %v5434_v46 }
0x11cb   : > { %8129 = verf.f32 %v5535_v25  ;;  %v5537_v44 = vmul.f32 0.70710677, %v5436_v50  ;;  %v5502_v25 = vmul.f32 0.5, %v5430_v49 }
0x11cc   : > { %v8120_v2 = vpop.eup %8119  ;;  %8131 = verf.f32 %v5536_v10  ;;  %v5504_v10 = vmul.f32 0.5, %v5434_v46 }
0x11cd   : > { %v8122_v23 = vpop.eup %8121  ;;  %v5594_v0 = vadd.f32 1.0, %v8120_v2  ;;  %8133 = verf.f32 %v5537_v44  ;;  %v5439_v5 = vpop.f32.mrb[184].mxu1 }
0x11ce   : > { %v8124_v24 = vpop.eup %8123  ;;  %v5595_v29 = vadd.f32 1.0, %v8122_v23  ;;  %v10260_v14 = vadd.f32 %v5439_v5, %v10247_v30  ;;  %v5441_v7 = vpop.f32.mrb[185].mxu1  ;;  %v5505_v5 = vmul.f32 0.5, %v5436_v50 }
0x11cf   : > { %v8126_v17 = vpop.eup %8125  ;;  %v5596_v26 = vadd.f32 1.0, %v8124_v24  ;;  %v10263_v47 = vadd.f32 %v5441_v7, %v10249_v38  ;;  %v5443_v59 = vpop.f32.mrb[186].mxu1  ;;  %v5626_v60 = vmul.f32 %v5594_v0, %v5498_v6  ;;  %v5503_v0 = vmul.f32 0.5, %v5432_v8 }
0x11d0   : > { %v5597_v48 = vadd.f32 1.0, %v8126_v17  ;;  %v5538_v34 = vmul.f32 0.70710677, %v10260_v14  ;;  %v5445_v13 = vpop.f32.mrb[187].mxu1  ;;  %v5444_v33 = vadd.f32 %v5443_v59, %v10247_v30  ;;  %v5627_v45 = vmul.f32 %v5595_v29, %v5499_v20 }
0x11d1   : > { %v5628_v42 = vmul.f32 %v5596_v26, %v5500_v16  ;;  %v5539_v15 = vmul.f32 0.70710677, %v10263_v47  ;;  %v5446_v37 = vadd.f32 %v5445_v13, %v10249_v38 }
0x11d2   : > { %v5629_v12 = vmul.f32 %v5597_v48, %v5501_v57  ;;  %8135 = verf.f32 %v5538_v34  ;;  %v5540_v21 = vmul.f32 0.70710677, %v5444_v33 }
0x11d3   : > { %v5658_v53 = vpack.c.bf16 %v5628_v42, %v5626_v60  ;;  %8137 = verf.f32 %v5539_v15  ;;  %v5541_v3 = vmul.f32 0.70710677, %v5446_v37 }
0x11d4   : > { %v8128_v52 = vpop.eup %8127  ;;  %v5659_v27 = vpack.c.bf16 %v5629_v12, %v5627_v45  ;;  %8139 = verf.f32 %v5540_v21  ;;  %v5506_v12 = vmul.f32 0.5, %v10260_v14 }
0x11d5   : > { %v8130_v41 = vpop.eup %8129  ;;  %v5598_v35 = vadd.f32 1.0, %v8128_v52  ;;  %v5449_v11 = vpop.f32.mrb[188].mxu1  ;;  %8141 = verf.f32 %v5541_v3 }
0x11d6   : > { %v8132_v63 = vpop.eup %8131  ;;  %v5599_v9 = vadd.f32 1.0, %v8130_v41  ;;  %v10270_v43 = vadd.f32 %v5449_v11, %v10247_v30  ;;  %v5451_v18 = vpop.f32.mrb[189].mxu1  ;;  %5840 = vmatprep.mubr.bf16.mxu0 %v5659_v27  ;;  %v5507_v27 = vmul.f32 0.5, %v10263_v47  ;;  %v5508_v41 = vmul.f32 0.5, %v5444_v33 }
0x11d7   : > { %v8134_v61 = vpop.eup %8133  ;;  %v5600_v44 = vadd.f32 1.0, %v8132_v63  ;;  %v10273_v2 = vadd.f32 %v5451_v18, %v10249_v38  ;;  %v5453_v23 = vpop.f32.mrb[190].mxu1  ;;  %5841 = vmatmul.mubr.bf16.vlgmr.msra.gmra.mrb[160].mxu0 %v5658_v53  ;;  %v5630_v17 = vmul.f32 %v5598_v35, %v5502_v25 }
0x11d8   : > { %v5601_v24 = vadd.f32 1.0, %v8134_v61  ;;  %v5542_v29 = vmul.f32 0.70710677, %v10270_v43  ;;  %v5455_v7 = vpop.f32.mrb[191].mxu1  ;;  %v5454_v26 = vadd.f32 %v5453_v23, %v10247_v30  ;;  %v5631_v49 = vmul.f32 %v5599_v9, %v5503_v0 }
0x11d9   : > { %v5632_v6 = vmul.f32 %v5600_v44, %v5504_v10  ;;  %v5543_v16 = vmul.f32 0.70710677, %v10273_v2  ;;  %v5456_v59 = vadd.f32 %v5455_v7, %v10249_v38  ;;  %v5509_v9 = vmul.f32 0.5, %v5446_v37 }
0x11da   : > { %v5633_v46 = vmul.f32 %v5601_v24, %v5505_v5  ;;  %8143 = verf.f32 %v5542_v29  ;;  %v5544_v20 = vmul.f32 0.70710677, %v5454_v26 }
0x11db   : > { %8145 = verf.f32 %v5543_v16  ;;  %v5660_v57 = vpack.c.bf16 %v5632_v6, %v5630_v17  ;;  %v5545_v50 = vmul.f32 0.70710677, %v5456_v59 }
0x11dc   : > { %v8136_v8 = vpop.eup %8135  ;;  %v5661_v48 = vpack.c.bf16 %v5633_v46, %v5631_v49  ;;  %8147 = verf.f32 %v5544_v20  ;;  %v5510_v46 = vmul.f32 0.5, %v10270_v43 }
0x11dd   : > { %v8138_v34 = vpop.eup %8137  ;;  %v5459_v13 = vpop.f32.mrb[192].mxu1  ;;  %v5602_v60 = vadd.f32 1.0, %v8136_v8  ;;  %8149 = verf.f32 %v5545_v50 }
0x11de   : > { %v10280_v42 = vadd.f32 %v5459_v13, %v10247_v30  ;;  %v5461_v15 = vpop.f32.mrb[193].mxu1  ;;  %5848 = vmatprep.mubr.bf16.mxu0 %v5661_v48  ;;  %v8140_v45 = vpop.eup %8139  ;;  %v5603_v53 = vadd.f32 1.0, %v8138_v34  ;;  %v5511_v48 = vmul.f32 0.5, %v10273_v2  ;;  %v5512_v34 = vmul.f32 0.5, %v5454_v26 }
0x11df   : > { %v10284_v21 = vadd.f32 %v5461_v15, %v10249_v38  ;;  %v5463_v52 = vpop.f32.mrb[194].mxu1  ;;  %5849 = vmatmul.mubr.bf16.gmra.mrb[164].mxu0 %v5660_v57  ;;  %v8142_v3 = vpop.eup %8141  ;;  %v5604_v35 = vadd.f32 1.0, %v8140_v45  ;;  %v5634_v25 = vmul.f32 %v5602_v60, %v5506_v12  ;;  %v5513_v45 = vmul.f32 0.5, %v5456_v59 }
0x11e0   : > { %v5546_v11 = vmul.f32 0.70710677, %v10280_v42  ;;  %v5465_v63 = vpop.f32.mrb[195].mxu1  ;;  %v5605_v18 = vadd.f32 1.0, %v8142_v3  ;;  %v10290_v14 = vadd.f32 %v5463_v52, %v10247_v30  ;;  %v5635_v23 = vmul.f32 %v5603_v53, %v5507_v27 }
0x11e1   : > { %v5547_v61 = vmul.f32 0.70710677, %v10284_v21  ;;  %v5636_v10 = vmul.f32 %v5604_v35, %v5508_v41  ;;  %v10293_v44 = vadd.f32 %v5465_v63, %v10249_v38 }
0x11e2   : > { %8151 = verf.f32 %v5546_v11  ;;  %v5637_v47 = vmul.f32 %v5605_v18, %v5509_v9  ;;  %v5548_v33 = vmul.f32 0.70710677, %v10290_v14 }
0x11e3   : > { %8153 = verf.f32 %v5547_v61  ;;  %v5549_v37 = vmul.f32 0.70710677, %v10293_v44  ;;  %v5662_v5 = vpack.c.bf16 %v5636_v10, %v5634_v25 }
0x11e4   : > { %v8144_v0 = vpop.eup %8143  ;;  %8155 = verf.f32 %v5548_v33  ;;  %v5663_v7 = vpack.c.bf16 %v5637_v47, %v5635_v23  ;;  %v5514_v47 = vmul.f32 0.5, %v10280_v42 }
0x11e5   : > { %v8146_v24 = vpop.eup %8145  ;;  %v5469_v29 = vpop.f32.mrb[196].mxu1  ;;  %v5606_v17 = vadd.f32 1.0, %v8144_v0  ;;  %8157 = verf.f32 %v5549_v37 }
0x11e6   : > { %v10298_v6 = vadd.f32 %v5469_v29, %v10247_v30  ;;  %v5471_v16 = vpop.f32.mrb[197].mxu1  ;;  %v8148_v49 = vpop.eup %8147  ;;  %v5607_v20 = vadd.f32 1.0, %v8146_v24  ;;  %5856 = vmatprep.mubr.bf16.mxu0 %v5663_v7  ;;  %v5515_v24 = vmul.f32 0.5, %v10284_v21  ;;  %v5516_v29 = vmul.f32 0.5, %v10290_v14 }
0x11e7   : > { %v10302_v57 = vadd.f32 %v5471_v16, %v10249_v38  ;;  %v5473_v8 = vpop.f32.mrb[198].mxu1  ;;  %v8150_v50 = vpop.eup %8149  ;;  %v5608_v13 = vadd.f32 1.0, %v8148_v49  ;;  %5857 = vmatmul.mubr.bf16.gmra.mrb[168].mxu0 %v5662_v5  ;;  %v5638_v52 = vmul.f32 %v5606_v17, %v5510_v46  ;;  %v5517_v49 = vmul.f32 0.5, %v10293_v44 }
0x11e8   : > { %v5550_v60 = vmul.f32 0.70710677, %v10298_v6  ;;  %v5475_v15 = vpop.f32.mrb[199].mxu1  ;;  %v5609_v12 = vadd.f32 1.0, %v8150_v50  ;;  %v10308_v43 = vadd.f32 %v5473_v8, %v10247_v30  ;;  %v5639_v2 = vmul.f32 %v5607_v20, %v5511_v48 }
0x11e9   : > { %v5551_v53 = vmul.f32 0.70710677, %v10302_v57  ;;  %v5640_v3 = vmul.f32 %v5608_v13, %v5512_v34  ;;  %v10311_v27 = vadd.f32 %v5475_v15, %v10249_v38 }
0x11ea   : > { %8159 = verf.f32 %v5550_v60  ;;  %v5641_v26 = vmul.f32 %v5609_v12, %v5513_v45  ;;  %v5552_v41 = vmul.f32 0.70710677, %v10308_v43 }
0x11eb   : > { %8161 = verf.f32 %v5551_v53  ;;  %v5553_v59 = vmul.f32 0.70710677, %v10311_v27  ;;  %v5664_v11 = vpack.c.bf16 %v5640_v3, %v5638_v52 }
0x11ec   : > { %v8152_v35 = vpop.eup %8151  ;;  %8163 = verf.f32 %v5552_v41  ;;  %v5665_v18 = vpack.c.bf16 %v5641_v26, %v5639_v2  ;;  %v5518_v26 = vmul.f32 0.5, %v10298_v6 }
0x11ed   : > { %v8154_v63 = vpop.eup %8153  ;;  %v5479_v9 = vpop.f32.mrb[200].mxu1  ;;  %v5610_v61 = vadd.f32 1.0, %v8152_v35  ;;  %8165 = verf.f32 %v5553_v59 }
0x11ee   : > { %v10316_v25 = vadd.f32 %v5479_v9, %v10247_v30  ;;  %v5481_v10 = vpop.f32.mrb[201].mxu1  ;;  %v8156_v23 = vpop.eup %8155  ;;  %v5611_v33 = vadd.f32 1.0, %v8154_v63  ;;  %5864 = vmatprep.mubr.bf16.mxu0 %v5665_v18  ;;  %v5519_v63 = vmul.f32 0.5, %v10302_v57  ;;  %v5520_v9 = vmul.f32 0.5, %v10308_v43 }
0x11ef   : > { %v10320_v0 = vadd.f32 %v5481_v10, %v10249_v38  ;;  %v5483_v37 = vpop.f32.mrb[202].mxu1  ;;  %v8158_v5 = vpop.eup %8157  ;;  %v5612_v7 = vadd.f32 1.0, %v8156_v23  ;;  %5865 = vmatmul.mubr.bf16.gmra.mrb[172].mxu0 %v5664_v11  ;;  %v5642_v8 = vmul.f32 %v5610_v61, %v5514_v47  ;;  %v5521_v23 = vmul.f32 0.5, %v10311_v27 }
0x11f0   : > { %v5554_v17 = vmul.f32 0.70710677, %v10316_v25  ;;  %v5485_v16 = vpop.f32.mrb[203].mxu1  ;;  %v5613_v46 = vadd.f32 1.0, %v8158_v5  ;;  %v5484_v20 = vadd.f32 %v5483_v37, %v10247_v30  ;;  %v5643_v21 = vmul.f32 %v5611_v33, %v5515_v24 }
0x11f1   : > { %v5555_v42 = vmul.f32 0.70710677, %v10320_v0  ;;  %v5644_v50 = vmul.f32 %v5612_v7, %v5516_v29  ;;  %v5486_v48 = vadd.f32 %v5485_v16, %v10249_v38 }
0x11f2   : > { %8167 = verf.f32 %v5554_v17  ;;  %v5645_v34 = vmul.f32 %v5613_v46, %v5517_v49  ;;  %v5556_v14 = vmul.f32 0.70710677, %v5484_v20 }
0x11f3   : > { %8169 = verf.f32 %v5555_v42  ;;  %v5557_v60 = vmul.f32 0.70710677, %v5486_v48  ;;  %v5666_v15 = vpack.c.bf16 %v5644_v50, %v5642_v8  ;;  %v5522_v50 = vmul.f32 0.5, %v10316_v25 }
0x11f4   : > { %v8160_v13 = vpop.eup %8159  ;;  %8171 = verf.f32 %v5556_v14  ;;  %v5667_v12 = vpack.c.bf16 %v5645_v34, %v5643_v21  ;;  %v5524_v21 = vmul.f32 0.5, %v5484_v20  ;;  %v5523_v34 = vmul.f32 0.5, %v10320_v0 }
0x11f5   : > { %v8162_v45 = vpop.eup %8161  ;;  %v5489_v44 = vpop.f32.mrb[204].mxu1  ;;  %v5614_v53 = vadd.f32 1.0, %v8160_v13  ;;  %8173 = verf.f32 %v5557_v60  ;;  %v5525_v14 = vmul.f32 0.5, %v5486_v48 }
0x11f6   : > { %v5490_v52 = vadd.f32 %v5489_v44, %v10247_v30  ;;  %v5491_v3 = vpop.f32.mrb[205].mxu1  ;;  %v8164_v2 = vpop.eup %8163  ;;  %v5615_v41 = vadd.f32 1.0, %v8162_v45  ;;  %5872 = vmatprep.mubr.bf16.mxu0 %v5667_v12 }
0x11f7   : > { %v5492_v35 = vadd.f32 %v5491_v3, %v10249_v38  ;;  %v5493_v59 = vpop.f32.mrb[206].mxu1  ;;  %v8166_v11 = vpop.eup %8165  ;;  %v5616_v18 = vadd.f32 1.0, %v8164_v2  ;;  %5873 = vmatmul.mubr.bf16.gmra.mrb[176].mxu0 %v5666_v15  ;;  %v5646_v37 = vmul.f32 %v5614_v53, %v5518_v26 }
0x11f8   : > { %v5558_v61 = vmul.f32 0.70710677, %v5490_v52  ;;  %v5495_v10 = vpop.f32.mrb[207].mxu1  ;;  %v5617_v47 = vadd.f32 1.0, %v8166_v11  ;;  %v5494_v6 = vadd.f32 %v5493_v59, %v10247_v30  ;;  %v5647_v29 = vmul.f32 %v5615_v41, %v5519_v63 }
0x11f9   : > { %v5559_v33 = vmul.f32 0.70710677, %v5492_v35  ;;  %v5648_v5 = vmul.f32 %v5616_v18, %v5520_v9  ;;  %v5496_v24 = vadd.f32 %v5495_v10, %v10249_v38  ;;  %v5526_v20 = vmul.f32 0.5, %v5490_v52  ;;  %v10343_v52 = vld [vmem:[%s10462_s13] ss:$0 sm:$0xff] }
0x11fa   : > { %8175 = verf.f32 %v5558_v61  ;;  %v5649_v7 = vmul.f32 %v5617_v47, %v5521_v23  ;;  %v5560_v57 = vmul.f32 0.70710677, %v5494_v6  ;;  %v5528_v11 = vmul.f32 0.5, %v5494_v6 }
0x11fb   : > { %8177 = verf.f32 %v5559_v33  ;;  %v5561_v17 = vmul.f32 0.70710677, %v5496_v24  ;;  %v5668_v16 = vpack.c.bf16 %v5648_v5, %v5646_v37  ;;  %v5527_v0 = vmul.f32 0.5, %v5492_v35 }
0x11fc   : > { %v8168_v43 = vpop.eup %8167  ;;  %8179 = verf.f32 %v5560_v57  ;;  %v5669_v46 = vpack.c.bf16 %v5649_v7, %v5647_v29  ;;  %v5529_v48 = vmul.f32 0.5, %v5496_v24 }
0x11fd   : > { %v8170_v49 = vpop.eup %8169  ;;  %v5618_v27 = vadd.f32 1.0, %v8168_v43  ;;  %8181 = verf.f32 %v5561_v17 }
0x11fe   : > { %v8172_v42 = vpop.eup %8171  ;;  %v5619_v8 = vadd.f32 1.0, %v8170_v49  ;;  %5880 = vmatprep.mubr.bf16.mxu0 %v5669_v46 }
0x11ff   : > { %v8174_v30 = vpop.eup %8173  ;;  %v5620_v38 = vadd.f32 1.0, %v8172_v42  ;;  %5881 = vmatmul.mubr.bf16.gmra.mrb[180].mxu0 %v5668_v16  ;;  %v5650_v60 = vmul.f32 %v5618_v27, %v5522_v50 }
0x1200   : > { %v5621_v13 = vadd.f32 1.0, %v8174_v30  ;;  %v5651_v45 = vmul.f32 %v5619_v8, %v5523_v34 }
0x1201   : > { %v5652_v15 = vmul.f32 %v5620_v38, %v5524_v21 }
0x1202   : > { %v5653_v44 = vmul.f32 %v5621_v13, %v5525_v14 }
0x1203   : > { %v5670_v53 = vpack.c.bf16 %v5652_v15, %v5650_v60 }
0x1204   : > { %v8176_v12 = vpop.eup %8175  ;;  %v5671_v2 = vpack.c.bf16 %v5653_v44, %v5651_v45 }
0x1205   : > { %v8178_v3 = vpop.eup %8177  ;;  %v5622_v26 = vadd.f32 1.0, %v8176_v12 }
0x1206   : > { %v8180_v41 = vpop.eup %8179  ;;  %v5623_v59 = vadd.f32 1.0, %v8178_v3  ;;  %5888 = vmatprep.mubr.bf16.mxu0 %v5671_v2 }
0x1207   : > { %v8182_v25 = vpop.eup %8181  ;;  %v5624_v63 = vadd.f32 1.0, %v8180_v41  ;;  %5889 = vmatmul.mubr.bf16.gmra.mrb[184].mxu0 %v5670_v53  ;;  %v5654_v18 = vmul.f32 %v5622_v26, %v5526_v20 }
0x1208   : > { %v5625_v9 = vadd.f32 1.0, %v8182_v25  ;;  %v5655_v10 = vmul.f32 %v5623_v59, %v5527_v0 }
0x1209   : > { %v5656_v61 = vmul.f32 %v5624_v63, %v5528_v11 }
0x120a   : > { %v5657_v23 = vmul.f32 %v5625_v9, %v5529_v48 }
0x120b   : > { %v5672_v47 = vpack.c.bf16 %v5656_v61, %v5654_v18 }
0x120c   : > { %v5673_v33 = vpack.c.bf16 %v5657_v23, %v5655_v10 }
0x120e   : > { %5896 = vmatprep.mubr.bf16.mxu0 %v5673_v33 }
0x120f   : > { %5897 = vmatmul.mubr.bf16.gmra.mrb[188].mxu0 %v5672_v47 }
0x12aa   : > { %v6765_v37 = vpop.f32.mrb[160].mxu0 }
0x12ab   : > { %v6766_v6 = vpop.f32.mrb[161].mxu0 }
0x12ac   : > { %v6767_v35 = vadd.f32 %v6766_v6, %v6765_v37  ;;  %v6768_v5 = vpop.f32.mrb[162].mxu0 }
0x12ad   : > { %v6769_v24 = vpop.f32.mrb[163].mxu0 }
0x12ae   : > { %v5843_v29 = vadd.f32 %v6767_v35, %v10343_v52  ;;  %v6770_v7 = vadd.f32 %v6769_v24, %v6768_v5 }
0x12b0   : > { %v5905_v57 = vadd.f32 %v5843_v29, %v10110_v39  ;;  %v5846_v43 = vadd.f32 %v6770_v7, %v10343_v52 }
0x12b2   : > { %5921 = vst [vmem:[%s10350_s26] sm:$0xff] %v5905_v57  ;;  %v5906_v17 = vadd.f32 %v5846_v43, %v10113_v4  ;;  %v6771_v16 = vpop.f32.mrb[164].mxu0 }
0x12b3   : > { %v6772_v49 = vpop.f32.mrb[165].mxu0 }
0x12b4   : > { %5922 = vst [vmem:[%s10350_s26 + $0x8] sm:$0xff] %v5906_v17  ;;  %v6773_v46 = vadd.f32 %v6772_v49, %v6771_v16  ;;  %v6774_v27 = vpop.f32.mrb[166].mxu0 }
0x12b5   : > { %v6775_v42 = vpop.f32.mrb[167].mxu0 }
0x12b6   : > { %v5851_v8 = vadd.f32 %v6773_v46, %v10343_v52  ;;  %v6776_v39 = vadd.f32 %v6775_v42, %v6774_v27 }
0x12b8   : > { %v5907_v30 = vadd.f32 %v5851_v8, %v10127_v54  ;;  %v5854_v50 = vadd.f32 %v6776_v39, %v10343_v52 }
0x12ba   : > { %5923 = vst [vmem:[%s10350_s26 + $0x10] sm:$0xff] %v5907_v30  ;;  %v5908_v21 = vadd.f32 %v5854_v50, %v10123_v31  ;;  %v6777_v38 = vpop.f32.mrb[168].mxu0 }
0x12bb   : > { %v6778_v4 = vpop.f32.mrb[169].mxu0 }
0x12bc   : > { %5924 = vst [vmem:[%s10350_s26 + $0x18] sm:$0xff] %v5908_v21  ;;  %v6779_v34 = vadd.f32 %v6778_v4, %v6777_v38  ;;  %v6780_v14 = vpop.f32.mrb[170].mxu0 }
0x12bd   : > { %v6781_v13 = vpop.f32.mrb[171].mxu0 }
0x12be   : > { %v5859_v60 = vadd.f32 %v6779_v34, %v10343_v52  ;;  %v6782_v15 = vadd.f32 %v6781_v13, %v6780_v14 }
0x12c0   : > { %v5909_v45 = vadd.f32 %v5859_v60, %v10140_v28  ;;  %v5862_v54 = vadd.f32 %v6782_v15, %v10343_v52 }
0x12c2   : > { %5925 = vst [vmem:[%s10350_s26 + $0x20] sm:$0xff] %v5909_v45  ;;  %v5910_v44 = vadd.f32 %v5862_v54, %v10136_v1  ;;  %v6783_v12 = vpop.f32.mrb[172].mxu0 }
0x12c3   : > { %v6784_v31 = vpop.f32.mrb[173].mxu0 }
0x12c4   : > { %5926 = vst [vmem:[%s10350_s26 + $0x28] sm:$0xff] %v5910_v44  ;;  %v6785_v53 = vadd.f32 %v6784_v31, %v6783_v12  ;;  %v6786_v3 = vpop.f32.mrb[174].mxu0 }
0x12c5   : > { %v6787_v2 = vpop.f32.mrb[175].mxu0 }
0x12c6   : > { %v5867_v26 = vadd.f32 %v6785_v53, %v10343_v52  ;;  %v6788_v41 = vadd.f32 %v6787_v2, %v6786_v3 }
0x12c8   : > { %v5911_v59 = vadd.f32 %v5867_v26, %v10153_v40  ;;  %v5870_v28 = vadd.f32 %v6788_v41, %v10343_v52 }
0x12ca   : > { %5927 = vst [vmem:[%s10350_s26 + $0x30] sm:$0xff] %v5911_v59  ;;  %v5912_v25 = vadd.f32 %v5870_v28, %v10149_v22  ;;  %v6789_v20 = vpop.f32.mrb[176].mxu0 }
0x12cb   : > { %v6790_v1 = vpop.f32.mrb[177].mxu0 }
0x12cc   : > { %5928 = vst [vmem:[%s10350_s26 + $0x38] sm:$0xff] %v5912_v25  ;;  %v6791_v11 = vadd.f32 %v6790_v1, %v6789_v20  ;;  %v6792_v63 = vpop.f32.mrb[178].mxu0 }
0x12cd   : > { %v6793_v0 = vpop.f32.mrb[179].mxu0 }
0x12ce   : > { %v5875_v48 = vadd.f32 %v6791_v11, %v10343_v52  ;;  %v6794_v9 = vadd.f32 %v6793_v0, %v6792_v63 }
0x12d0   : > { %v5913_v18 = vadd.f32 %v5875_v48, %v10166_v32  ;;  %v5878_v40 = vadd.f32 %v6794_v9, %v10343_v52 }
0x12d2   : > { %5929 = vst [vmem:[%s10350_s26 + $0x40] sm:$0xff] %v5913_v18  ;;  %v5914_v61 = vadd.f32 %v5878_v40, %v10162_v55  ;;  %v6795_v10 = vpop.f32.mrb[180].mxu0 }
0x12d3   : > { %v6796_v22 = vpop.f32.mrb[181].mxu0 }
0x12d4   : > { %5930 = vst [vmem:[%s10350_s26 + $0x48] sm:$0xff] %v5914_v61  ;;  %v6797_v23 = vadd.f32 %v6796_v22, %v6795_v10  ;;  %v6798_v47 = vpop.f32.mrb[182].mxu0 }
0x12d5   : > { %v6799_v33 = vpop.f32.mrb[183].mxu0 }
0x12d6   : > { %v5883_v37 = vadd.f32 %v6797_v23, %v10343_v52  ;;  %v6800_v6 = vadd.f32 %v6799_v33, %v6798_v47 }
0x12d8   : > { %v5915_v35 = vadd.f32 %v5883_v37, %v10179_v19  ;;  %v5886_v32 = vadd.f32 %v6800_v6, %v10343_v52 }
0x12da   : > { %5931 = vst [vmem:[%s10350_s26 + $0x50] sm:$0xff] %v5915_v35  ;;  %v5916_v5 = vadd.f32 %v5886_v32, %v10175_v51  ;;  %v6801_v24 = vpop.f32.mrb[184].mxu0 }
0x12db   : > { %v6802_v55 = vpop.f32.mrb[185].mxu0 }
0x12dc   : > { %5932 = vst [vmem:[%s10350_s26 + $0x58] sm:$0xff] %v5916_v5  ;;  %v6803_v29 = vadd.f32 %v6802_v55, %v6801_v24  ;;  %v6804_v7 = vpop.f32.mrb[186].mxu0 }
0x12dd   : > { %v6805_v57 = vpop.f32.mrb[187].mxu0 }
0x12de   : > { %v5891_v43 = vadd.f32 %v6803_v29, %v10343_v52  ;;  %v6806_v17 = vadd.f32 %v6805_v57, %v6804_v7 }
0x12e0   : > { %v5917_v16 = vadd.f32 %v5891_v43, %v10192_v62  ;;  %v5894_v19 = vadd.f32 %v6806_v17, %v10343_v52 }
0x12e2   : > { %5933 = vst [vmem:[%s10350_s26 + $0x60] sm:$0xff] %v5917_v16  ;;  %v5918_v49 = vadd.f32 %v5894_v19, %v10188_v36  ;;  %v6807_v51 = vpop.f32.mrb[188].mxu0 }
0x12e3   : > { %v6808_v46 = vpop.f32.mrb[189].mxu0 }
0x12e4   : > { %5934 = vst [vmem:[%s10350_s26 + $0x68] sm:$0xff] %v5918_v49  ;;  %v6809_v27 = vadd.f32 %v6808_v46, %v6807_v51  ;;  %v6810_v42 = vpop.f32.mrb[190].mxu0 }
0x12e5   : > { %v6811_v8 = vpop.f32.mrb[191].mxu0 }
0x12e6   : > { %v5899_v39 = vadd.f32 %v6809_v27, %v10343_v52  ;;  %v6812_v30 = vadd.f32 %v6811_v8, %v6810_v42 }
0x12e8   : > { %v5919_v62 = vadd.f32 %v5899_v39, %v10204_v56  ;;  %v5902_v50 = vadd.f32 %v6812_v30, %v10343_v52 }
0x12ea   : > { %5935 = vst [vmem:[%s10350_s26 + $0x70] sm:$0xff] %v5919_v62  ;;  %v5920_v36 = vadd.f32 %v5902_v50, %v10201_v58 }
0x12ec   : > { %5936 = vst [vmem:[%s10350_s26 + $0x78] sm:$0xff] %v5920_v36 }
0x12ed   : > { %8212 = shalt.err (!%p8209_p3)
}
0x12ee   : > { %s8213_s21 = scalar_lea.hbm %s10399_s20, 2048  ;;  %s8217_s28 = scalar_lea.hbm %s10463_s14, 4096 }
0x12ef   : > { %p8214_p4 = scmp.ne.s32.totalorder %s10399_s20, %s8213_s21  ;;  %p8218_p9 = scmp.lt.u32.totalorder %s10399_s20, %s10463_s14 }
0x12f0   : > { %p8219_p10 = scmp.lt.u32.totalorder %s8217_s28, %s8213_s21  ;;  %p8221_p12 = scmp.lt.u32.totalorder %s8213_s21, %s10399_s20 }
0x12f1   : > { %p8215_p7 = pnand %p8214_p4, %p8380_p5 }
0x12f2   : > { %p8220_p11 = por %p8219_p10, %p8218_p9 }
0x12f3   : > { %p8216_p8 = pneg %p8215_p7 }
0x12f4   : > { %p8222_p13 = por %p8221_p12, %p8220_p11 }
0x12f6   : > { %p8223_p0 = pnand %p8222_p13, %p8216_p8 }
0x12f8   : > { %8226 = shalt.err (!%p8223_p0)
}
0x12f9   : > { %s8265_s18 = smov 128   ;;  %s8266_s0 = smov 8  }
0x12fa   : > { %7613 = dma.vmem_to_hbm [thread:$0]  (%p8380_p5), %s10401_s22, 2048, %s10399_s20, %s10408_s17, %s8265_s18, %s8265_s18, %s8266_s0  }
0x12fb PF: > { %p7619_p1 = scmp.ge.s32.totalorder %s8261_s16, 2  ;;  %s5966_s26 = sand.u32 1, %s8249_s29  }
0x12fc   : > { %s5967_s21 = scalar_lea.sflag [#allocation3], %s5966_s26 }
0x12fd   : > { %p7616_p2 = pnand %p7619_p1, %p8384_p6 }
0x12ff   : > { %8244 = dma.done.wait (!%p7616_p2), %s5967_s21, 2048  }
0x1300   : > { %8246 = vsyncadd (!%p7616_p2), %s5967_s21, 4294965248  ;;  %s10521_s27 = sld [smem:[#allocation5_spill]]  ;;  %p24_p3 = scmp.ge.s32.totalorder %s8367_s19, 4  }
0x1301   : > { %s10522_s29 = smov %s8253_s30  ;;  %s10523_s30 = smov %s8257_s15 }
0x1302   : > { %s10525_s16 = smov %s8367_s19  ;;  %26 = sbr.rel (!%p24_p3) target bundleno = 6 (0x6), region = 123 }
0x1306   : > { %s10524_s15 = smov %s10521_s27 }
0x1309   :  { %5972 = vsyncpa [#allocation3], 1 }
0x130a   :  { %5974 = vsyncpa [#allocation3 + $0x1], 1 }

</bundles_post_ra>
